<compile_context>
chip_gen: v5e
topology: v5e:2x2
jax: 0.10.0
libtpu: 0.0.40
codegen_flags: <defaults>
</compile_context>

<pallas_src>
import functools

import jax
import jax.numpy as jnp
from jax.experimental import pallas as pl
from jax.experimental.pallas import tpu as pltpu


# 3x3 taps, tap index t = (dh+1)*3 + (dw+1)  (kh*3 + kw), matching the weight
# layout built in the wrapper.
_TAPS = tuple((dh, dw) for dh in (-1, 0, 1) for dw in (-1, 0, 1))


def basic_block_kernel(x_ref, w1_ref, w2_ref, sb_ref, o_ref, *, H, W):
    """One grid step = `bpb` batch elements, all lane-dense [C, N] (N = H*W).

    x_ref : (bpb, Cin, N)   input, NCHW with spatial flattened into lanes
    w1_ref: (Cout, 9*Cin)   conv1 weight (im2col layout, row=cout, col=t*Cin+cin)
    w2_ref: (Cout, 9*Cout)  conv2 weight (same layout)
    sb_ref: (Cout, 4)       folded BN params, columns = [s1, b1, s2, b2]
    o_ref : (bpb, Cout, N)
    """
    bpb, _, N = x_ref.shape

    # ---- 3x3 boundary masks, built once per grid step from a lane iota ----
    pos = jax.lax.broadcasted_iota(jnp.int32, (1, N), 1)      # flat y*W + x
    if W & (W - 1) == 0:                                       # power-of-two W
        xx = pos & (W - 1)
        yy = pos >> (W.bit_length() - 1)
    else:
        yy = pos // W
        xx = pos - yy * W
    masks = [((yy + dh >= 0) & (yy + dh < H) & (xx + dw >= 0) & (xx + dw < W))
             for dh, dw in _TAPS]                              # 9 x (1, N) bool

    # ---- resident params (loaded once per step) ----------------------------
    sb = sb_ref[...]                                           # (Cout, 4) f32
    s1, b1, s2, b2 = sb[:, 0:1], sb[:, 1:2], sb[:, 2:3], sb[:, 3:4]
    w1_mat = w1_ref[...]                                       # (Cout, 9*Cin)
    w2_mat = w2_ref[...]                                       # (Cout, 9*Cout)

    def conv3x3(h_cn, w_mat):
        """3x3/pad-1 conv as ONE im2col matmul: [Cout, 9C] @ [9C, N]."""
        taps = []
        for t, (dh, dw) in enumerate(_TAPS):
            s = dh * W + dw                                    # flat spatial offset
            # shifted[:, p] = h[:, p + s]; wrapped lanes are killed by the mask
            rolled = h_cn if s == 0 else pltpu.roll(h_cn, (-s) % N, 1)
            taps.append(jnp.where(masks[t], rolled, 0.0))
        col = jnp.concatenate(taps, axis=0).astype(w_mat.dtype)  # (9*C, N)
        return jnp.dot(w_mat, col, preferred_element_type=jnp.float32)

    # ---- per-batch-element body (tiny static loop, bpb in {1, 2}) ----------
    for b in range(bpb):
        x_cn = x_ref[b].astype(jnp.float32)                   # (Cin, N) residual copy
        h1 = conv3x3(x_cn, w1_mat)                            # (Cout, N) f32
        h1 = jnp.maximum(h1 * s1 + b1, 0.0)                   # BN1 + ReLU (f32)
        y = conv3x3(h1, w2_mat)                               # (Cout, N) f32
        y = jnp.maximum(y * s2 + b2 + x_cn, 0.0)              # BN2 + identity + ReLU
        o_ref[b] = y.astype(o_ref.dtype)                      # lane-dense store


def _batch_grid_steps(B):
    """2-way 'parallel' batch axis on dual-TensorCore chips (v7x); otherwise a
    single grid step (v5e/v6e are single-TC and per-step overhead dominates)."""
    try:
        kind = jax.devices()[0].device_kind.lower()
    except Exception:
        kind = ""
    return 2 if ("v7" in kind and B % 2 == 0) else 1


def basic_block(x_nchw, w1_hwio, bn1, w2_hwio, bn2, *, eps=1e-5,
                compute_dtype=jnp.bfloat16, batch_steps=None):
    """BasicBlock forward (stride=1, downsample=None, eval-mode BN).

    x_nchw : [B, C, H, W] float32 (PyTorch layout)
    w*_hwio: [3, 3, Cin, Cout] conv weights (torch [Cout,Cin,3,3] transposed)
    bn*    : (gamma, beta, running_mean, running_var), each [Cout]
    compute_dtype: MXU operand dtype (bf16 for perf, f32 for exact checking).
    """
    B, Cin, H, W = x_nchw.shape
    Cout = w1_hwio.shape[-1]
    assert Cin == Cout, "identity residual requires in_planes == planes"
    N = H * W
    assert N % 128 == 0 and Cin % 8 == 0, "keep blocks (8,128)-aligned"

    if batch_steps is None:
        batch_steps = _batch_grid_steps(B)
    assert B % batch_steps == 0
    bpb = B // batch_steps

    # Fold eval-mode BatchNorm into per-channel scale/shift, packed as COLUMNS
    # so the kernel slices (Cout, 1) sublane vectors with no transposes.
    def fold(bn):
        g, b, m, v = bn
        s = g * jax.lax.rsqrt(v + eps)
        return s, b - m * s

    s1, b1 = fold(bn1)
    s2, b2 = fold(bn2)
    sb = jnp.stack([s1, b1, s2, b2], axis=1).astype(jnp.float32)   # (Cout, 4)

    # Conv weights: HWIO -> im2col layout [Cout, 9*Cin] (tap-major, cin-minor),
    # done once in the wrapper; cast to the MXU operand dtype.
    w1 = jnp.transpose(w1_hwio, (3, 0, 1, 2)).reshape(Cout, 9 * Cin).astype(compute_dtype)
    w2 = jnp.transpose(w2_hwio, (3, 0, 1, 2)).reshape(Cout, 9 * Cout).astype(compute_dtype)

    x = x_nchw.reshape(B, Cin, N)        # free reshape, no HBM pass

    kernel = functools.partial(basic_block_kernel, H=H, W=W)
    out = pl.pallas_call(
        kernel,
        out_shape=jax.ShapeDtypeStruct((B, Cout, N), x_nchw.dtype),
        grid_spec=pltpu.PrefetchScalarGridSpec(
            num_scalar_prefetch=0,
            grid=(batch_steps,),
            in_specs=[
                pl.BlockSpec((bpb, Cin, N), lambda i: (i, 0, 0)),     # x (lane-dense)
                pl.BlockSpec((Cout, 9 * Cin), lambda i: (0, 0)),      # conv1 w (resident)
                pl.BlockSpec((Cout, 9 * Cout), lambda i: (0, 0)),     # conv2 w (resident)
                pl.BlockSpec((Cout, 4), lambda i: (0, 0)),            # folded BN (resident)
            ],
            out_specs=pl.BlockSpec((bpb, Cout, N), lambda i: (i, 0, 0)),
        ),
        compiler_params=pltpu.CompilerParams(
            dimension_semantics=("parallel",)),
    )(x, w1, w2, sb)

    return out.reshape(B, Cout, H, W)


def reference(x_nchw, w1_hwio, bn1, w2_hwio, bn2, *, eps=1e-5):
    """Pure-JAX replica of the PyTorch forward for verification (full f32)."""
    x = jnp.transpose(x_nchw, (0, 2, 3, 1))   # NHWC

    def conv(h, w):
        return jax.lax.conv_general_dilated(
            h, w, window_strides=(1, 1), padding=((1, 1), (1, 1)),
            dimension_numbers=("NHWC", "HWIO", "NHWC"),
            precision=jax.lax.Precision.HIGHEST)

    def bn(h, p):
        g, b, m, v = p
        return (h - m) * jax.lax.rsqrt(v + eps) * g + b

    out = jnp.maximum(bn(conv(x, w1_hwio), bn1), 0.0)
    out = bn(conv(out, w2_hwio), bn2)
    out = jnp.maximum(out + x, 0.0)
    return jnp.transpose(out, (0, 3, 1, 2))


if __name__ == "__main__":
    # Small shapes consistent with the module: in_planes = planes = 32,
    # stride = 1, downsample = None, 16x16 spatial (N = 256 lanes).
    B, C, H, W = 2, 32, 16, 16

    key = jax.random.PRNGKey(0)
    (kx, kw1, kw2,
     kg1, kb1, km1, kv1,
     kg2, kb2, km2, kv2) = jax.random.split(key, 11)

    x = jax.random.normal(kx, (B, C, H, W), jnp.float32)
    w1 = jax.random.normal(kw1, (3, 3, C, C), jnp.float32) * 0.1
    w2 = jax.random.normal(kw2, (3, 3, C, C), jnp.float32) * 0.1

    bn1 = (1.0 + 0.1 * jax.random.normal(kg1, (C,), jnp.float32),
           0.1 * jax.random.normal(kb1, (C,), jnp.float32),
           0.1 * jax.random.normal(km1, (C,), jnp.float32),
           jnp.abs(jax.random.normal(kv1, (C,), jnp.float32)) + 0.5)
    bn2 = (1.0 + 0.1 * jax.random.normal(kg2, (C,), jnp.float32),
           0.1 * jax.random.normal(kb2, (C,), jnp.float32),
           0.1 * jax.random.normal(km2, (C,), jnp.float32),
           jnp.abs(jax.random.normal(kv2, (C,), jnp.float32)) + 0.5)

    ref = reference(x, w1, bn1, w2, bn2)
    ref_scale = float(jnp.max(jnp.abs(ref)))

    # 1) Semantics check: f32 MXU operands, tight tolerance.
    out_f32 = jax.block_until_ready(
        basic_block(x, w1, bn1, w2, bn2, compute_dtype=jnp.float32))
    assert out_f32.shape == (B, C, H, W)
    err_f32 = float(jnp.max(jnp.abs(out_f32 - ref)))
    assert jnp.allclose(out_f32, ref, atol=5e-4, rtol=5e-4), err_f32

    # 2) Performance path: bf16 MXU operands (f32 accumulation) -> bf16-level
    #    tolerance, scaled by the reference magnitude.
    out_bf16 = jax.block_until_ready(
        basic_block(x, w1, bn1, w2, bn2, compute_dtype=jnp.bfloat16))
    err_bf16 = float(jnp.max(jnp.abs(out_bf16 - ref)))
    assert err_bf16 <= 3e-2 * ref_scale + 1e-3, (err_bf16, ref_scale)

    print("KERNEL_OK")
</pallas_src>

<mosaic_0001>
module attributes {stable_mosaic.version = 11 : i64} {
  func.func @basic_block_kernel(%arg0: i32, %arg1: memref<2x32x256xf32, #tpu.memory_space<vmem>>, %arg2: memref<32x288xf32, #tpu.memory_space<vmem>>, %arg3: memref<32x288xf32, #tpu.memory_space<vmem>>, %arg4: memref<32x4xf32, #tpu.memory_space<vmem>>, %arg5: memref<2x32x256xf32, #tpu.memory_space<vmem>>) attributes {dimension_semantics = [#tpu.dimension_semantics<parallel>], iteration_bounds = array<i64: 1>, scalar_prefetch = 0 : i64, scratch_operands = 0 : i64, tpu.core_type = #tpu.core_type<tc>, window_params = [{transform_indices = @transform_0, window_bounds = array<i64: 2, 32, 256>}, {pipeline_mode = #tpu.pipeline_mode<synchronous>, transform_indices = @transform_1, window_bounds = array<i64: 32, 288>}, {pipeline_mode = #tpu.pipeline_mode<synchronous>, transform_indices = @transform_2, window_bounds = array<i64: 32, 288>}, {pipeline_mode = #tpu.pipeline_mode<synchronous>, transform_indices = @transform_3, window_bounds = array<i64: 32, 4>}, {transform_indices = @transform_4, window_bounds = array<i64: 2, 32, 256>}]} {
    %0 = tpu.iota {dimensions = array<i32: 1>} : vector<1x256xi32>
    %c15_i32 = arith.constant 15 : i32
    %1 = vector.broadcast %c15_i32 : i32 to vector<1x256xi32>
    %2 = arith.andi %0, %1 : vector<1x256xi32>
    %c4_i32 = arith.constant 4 : i32
    %3 = vector.broadcast %c4_i32 : i32 to vector<1x256xi32>
    %4 = arith.shrsi %0, %3 : vector<1x256xi32>
    %c-1_i32 = arith.constant -1 : i32
    %5 = vector.broadcast %c-1_i32 : i32 to vector<1x256xi32>
    %6 = arith.addi %4, %5 : vector<1x256xi32>
    %c0_i32 = arith.constant 0 : i32
    %7 = vector.broadcast %c0_i32 : i32 to vector<1x256xi32>
    %8 = arith.cmpi sge, %6, %7 : vector<1x256xi32>
    %c-1_i32_0 = arith.constant -1 : i32
    %9 = vector.broadcast %c-1_i32_0 : i32 to vector<1x256xi32>
    %10 = arith.addi %4, %9 : vector<1x256xi32>
    %c16_i32 = arith.constant 16 : i32
    %11 = vector.broadcast %c16_i32 : i32 to vector<1x256xi32>
    %12 = arith.cmpi slt, %10, %11 : vector<1x256xi32>
    %13 = arith.andi %8, %12 : vector<1x256xi1>
    %c-1_i32_1 = arith.constant -1 : i32
    %14 = vector.broadcast %c-1_i32_1 : i32 to vector<1x256xi32>
    %15 = arith.addi %2, %14 : vector<1x256xi32>
    %c0_i32_2 = arith.constant 0 : i32
    %16 = vector.broadcast %c0_i32_2 : i32 to vector<1x256xi32>
    %17 = arith.cmpi sge, %15, %16 : vector<1x256xi32>
    %18 = arith.andi %13, %17 : vector<1x256xi1>
    %c-1_i32_3 = arith.constant -1 : i32
    %19 = vector.broadcast %c-1_i32_3 : i32 to vector<1x256xi32>
    %20 = arith.addi %2, %19 : vector<1x256xi32>
    %c16_i32_4 = arith.constant 16 : i32
    %21 = vector.broadcast %c16_i32_4 : i32 to vector<1x256xi32>
    %22 = arith.cmpi slt, %20, %21 : vector<1x256xi32>
    %23 = arith.andi %18, %22 : vector<1x256xi1>
    %c-1_i32_5 = arith.constant -1 : i32
    %24 = vector.broadcast %c-1_i32_5 : i32 to vector<1x256xi32>
    %25 = arith.addi %4, %24 : vector<1x256xi32>
    %c0_i32_6 = arith.constant 0 : i32
    %26 = vector.broadcast %c0_i32_6 : i32 to vector<1x256xi32>
    %27 = arith.cmpi sge, %25, %26 : vector<1x256xi32>
    %c-1_i32_7 = arith.constant -1 : i32
    %28 = vector.broadcast %c-1_i32_7 : i32 to vector<1x256xi32>
    %29 = arith.addi %4, %28 : vector<1x256xi32>
    %c16_i32_8 = arith.constant 16 : i32
    %30 = vector.broadcast %c16_i32_8 : i32 to vector<1x256xi32>
    %31 = arith.cmpi slt, %29, %30 : vector<1x256xi32>
    %32 = arith.andi %27, %31 : vector<1x256xi1>
    %c0_i32_9 = arith.constant 0 : i32
    %33 = vector.broadcast %c0_i32_9 : i32 to vector<1x256xi32>
    %34 = arith.addi %2, %33 : vector<1x256xi32>
    %c0_i32_10 = arith.constant 0 : i32
    %35 = vector.broadcast %c0_i32_10 : i32 to vector<1x256xi32>
    %36 = arith.cmpi sge, %34, %35 : vector<1x256xi32>
    %37 = arith.andi %32, %36 : vector<1x256xi1>
    %c0_i32_11 = arith.constant 0 : i32
    %38 = vector.broadcast %c0_i32_11 : i32 to vector<1x256xi32>
    %39 = arith.addi %2, %38 : vector<1x256xi32>
    %c16_i32_12 = arith.constant 16 : i32
    %40 = vector.broadcast %c16_i32_12 : i32 to vector<1x256xi32>
    %41 = arith.cmpi slt, %39, %40 : vector<1x256xi32>
    %42 = arith.andi %37, %41 : vector<1x256xi1>
    %c-1_i32_13 = arith.constant -1 : i32
    %43 = vector.broadcast %c-1_i32_13 : i32 to vector<1x256xi32>
    %44 = arith.addi %4, %43 : vector<1x256xi32>
    %c0_i32_14 = arith.constant 0 : i32
    %45 = vector.broadcast %c0_i32_14 : i32 to vector<1x256xi32>
    %46 = arith.cmpi sge, %44, %45 : vector<1x256xi32>
    %c-1_i32_15 = arith.constant -1 : i32
    %47 = vector.broadcast %c-1_i32_15 : i32 to vector<1x256xi32>
    %48 = arith.addi %4, %47 : vector<1x256xi32>
    %c16_i32_16 = arith.constant 16 : i32
    %49 = vector.broadcast %c16_i32_16 : i32 to vector<1x256xi32>
    %50 = arith.cmpi slt, %48, %49 : vector<1x256xi32>
    %51 = arith.andi %46, %50 : vector<1x256xi1>
    %c1_i32 = arith.constant 1 : i32
    %52 = vector.broadcast %c1_i32 : i32 to vector<1x256xi32>
    %53 = arith.addi %2, %52 : vector<1x256xi32>
    %c0_i32_17 = arith.constant 0 : i32
    %54 = vector.broadcast %c0_i32_17 : i32 to vector<1x256xi32>
    %55 = arith.cmpi sge, %53, %54 : vector<1x256xi32>
    %56 = arith.andi %51, %55 : vector<1x256xi1>
    %c1_i32_18 = arith.constant 1 : i32
    %57 = vector.broadcast %c1_i32_18 : i32 to vector<1x256xi32>
    %58 = arith.addi %2, %57 : vector<1x256xi32>
    %c16_i32_19 = arith.constant 16 : i32
    %59 = vector.broadcast %c16_i32_19 : i32 to vector<1x256xi32>
    %60 = arith.cmpi slt, %58, %59 : vector<1x256xi32>
    %61 = arith.andi %56, %60 : vector<1x256xi1>
    %c0_i32_20 = arith.constant 0 : i32
    %62 = vector.broadcast %c0_i32_20 : i32 to vector<1x256xi32>
    %63 = arith.addi %4, %62 : vector<1x256xi32>
    %c0_i32_21 = arith.constant 0 : i32
    %64 = vector.broadcast %c0_i32_21 : i32 to vector<1x256xi32>
    %65 = arith.cmpi sge, %63, %64 : vector<1x256xi32>
    %c0_i32_22 = arith.constant 0 : i32
    %66 = vector.broadcast %c0_i32_22 : i32 to vector<1x256xi32>
    %67 = arith.addi %4, %66 : vector<1x256xi32>
    %c16_i32_23 = arith.constant 16 : i32
    %68 = vector.broadcast %c16_i32_23 : i32 to vector<1x256xi32>
    %69 = arith.cmpi slt, %67, %68 : vector<1x256xi32>
    %70 = arith.andi %65, %69 : vector<1x256xi1>
    %c-1_i32_24 = arith.constant -1 : i32
    %71 = vector.broadcast %c-1_i32_24 : i32 to vector<1x256xi32>
    %72 = arith.addi %2, %71 : vector<1x256xi32>
    %c0_i32_25 = arith.constant 0 : i32
    %73 = vector.broadcast %c0_i32_25 : i32 to vector<1x256xi32>
    %74 = arith.cmpi sge, %72, %73 : vector<1x256xi32>
    %75 = arith.andi %70, %74 : vector<1x256xi1>
    %c-1_i32_26 = arith.constant -1 : i32
    %76 = vector.broadcast %c-1_i32_26 : i32 to vector<1x256xi32>
    %77 = arith.addi %2, %76 : vector<1x256xi32>
    %c16_i32_27 = arith.constant 16 : i32
    %78 = vector.broadcast %c16_i32_27 : i32 to vector<1x256xi32>
    %79 = arith.cmpi slt, %77, %78 : vector<1x256xi32>
    %80 = arith.andi %75, %79 : vector<1x256xi1>
    %c0_i32_28 = arith.constant 0 : i32
    %81 = vector.broadcast %c0_i32_28 : i32 to vector<1x256xi32>
    %82 = arith.addi %4, %81 : vector<1x256xi32>
    %c0_i32_29 = arith.constant 0 : i32
    %83 = vector.broadcast %c0_i32_29 : i32 to vector<1x256xi32>
    %84 = arith.cmpi sge, %82, %83 : vector<1x256xi32>
    %c0_i32_30 = arith.constant 0 : i32
    %85 = vector.broadcast %c0_i32_30 : i32 to vector<1x256xi32>
    %86 = arith.addi %4, %85 : vector<1x256xi32>
    %c16_i32_31 = arith.constant 16 : i32
    %87 = vector.broadcast %c16_i32_31 : i32 to vector<1x256xi32>
    %88 = arith.cmpi slt, %86, %87 : vector<1x256xi32>
    %89 = arith.andi %84, %88 : vector<1x256xi1>
    %c0_i32_32 = arith.constant 0 : i32
    %90 = vector.broadcast %c0_i32_32 : i32 to vector<1x256xi32>
    %91 = arith.addi %2, %90 : vector<1x256xi32>
    %c0_i32_33 = arith.constant 0 : i32
    %92 = vector.broadcast %c0_i32_33 : i32 to vector<1x256xi32>
    %93 = arith.cmpi sge, %91, %92 : vector<1x256xi32>
    %94 = arith.andi %89, %93 : vector<1x256xi1>
    %c0_i32_34 = arith.constant 0 : i32
    %95 = vector.broadcast %c0_i32_34 : i32 to vector<1x256xi32>
    %96 = arith.addi %2, %95 : vector<1x256xi32>
    %c16_i32_35 = arith.constant 16 : i32
    %97 = vector.broadcast %c16_i32_35 : i32 to vector<1x256xi32>
    %98 = arith.cmpi slt, %96, %97 : vector<1x256xi32>
    %99 = arith.andi %94, %98 : vector<1x256xi1>
    %c0_i32_36 = arith.constant 0 : i32
    %100 = vector.broadcast %c0_i32_36 : i32 to vector<1x256xi32>
    %101 = arith.addi %4, %100 : vector<1x256xi32>
    %c0_i32_37 = arith.constant 0 : i32
    %102 = vector.broadcast %c0_i32_37 : i32 to vector<1x256xi32>
    %103 = arith.cmpi sge, %101, %102 : vector<1x256xi32>
    %c0_i32_38 = arith.constant 0 : i32
    %104 = vector.broadcast %c0_i32_38 : i32 to vector<1x256xi32>
    %105 = arith.addi %4, %104 : vector<1x256xi32>
    %c16_i32_39 = arith.constant 16 : i32
    %106 = vector.broadcast %c16_i32_39 : i32 to vector<1x256xi32>
    %107 = arith.cmpi slt, %105, %106 : vector<1x256xi32>
    %108 = arith.andi %103, %107 : vector<1x256xi1>
    %c1_i32_40 = arith.constant 1 : i32
    %109 = vector.broadcast %c1_i32_40 : i32 to vector<1x256xi32>
    %110 = arith.addi %2, %109 : vector<1x256xi32>
    %c0_i32_41 = arith.constant 0 : i32
    %111 = vector.broadcast %c0_i32_41 : i32 to vector<1x256xi32>
    %112 = arith.cmpi sge, %110, %111 : vector<1x256xi32>
    %113 = arith.andi %108, %112 : vector<1x256xi1>
    %c1_i32_42 = arith.constant 1 : i32
    %114 = vector.broadcast %c1_i32_42 : i32 to vector<1x256xi32>
    %115 = arith.addi %2, %114 : vector<1x256xi32>
    %c16_i32_43 = arith.constant 16 : i32
    %116 = vector.broadcast %c16_i32_43 : i32 to vector<1x256xi32>
    %117 = arith.cmpi slt, %115, %116 : vector<1x256xi32>
    %118 = arith.andi %113, %117 : vector<1x256xi1>
    %c1_i32_44 = arith.constant 1 : i32
    %119 = vector.broadcast %c1_i32_44 : i32 to vector<1x256xi32>
    %120 = arith.addi %4, %119 : vector<1x256xi32>
    %c0_i32_45 = arith.constant 0 : i32
    %121 = vector.broadcast %c0_i32_45 : i32 to vector<1x256xi32>
    %122 = arith.cmpi sge, %120, %121 : vector<1x256xi32>
    %c1_i32_46 = arith.constant 1 : i32
    %123 = vector.broadcast %c1_i32_46 : i32 to vector<1x256xi32>
    %124 = arith.addi %4, %123 : vector<1x256xi32>
    %c16_i32_47 = arith.constant 16 : i32
    %125 = vector.broadcast %c16_i32_47 : i32 to vector<1x256xi32>
    %126 = arith.cmpi slt, %124, %125 : vector<1x256xi32>
    %127 = arith.andi %122, %126 : vector<1x256xi1>
    %c-1_i32_48 = arith.constant -1 : i32
    %128 = vector.broadcast %c-1_i32_48 : i32 to vector<1x256xi32>
    %129 = arith.addi %2, %128 : vector<1x256xi32>
    %c0_i32_49 = arith.constant 0 : i32
    %130 = vector.broadcast %c0_i32_49 : i32 to vector<1x256xi32>
    %131 = arith.cmpi sge, %129, %130 : vector<1x256xi32>
    %132 = arith.andi %127, %131 : vector<1x256xi1>
    %c-1_i32_50 = arith.constant -1 : i32
    %133 = vector.broadcast %c-1_i32_50 : i32 to vector<1x256xi32>
    %134 = arith.addi %2, %133 : vector<1x256xi32>
    %c16_i32_51 = arith.constant 16 : i32
    %135 = vector.broadcast %c16_i32_51 : i32 to vector<1x256xi32>
    %136 = arith.cmpi slt, %134, %135 : vector<1x256xi32>
    %137 = arith.andi %132, %136 : vector<1x256xi1>
    %c1_i32_52 = arith.constant 1 : i32
    %138 = vector.broadcast %c1_i32_52 : i32 to vector<1x256xi32>
    %139 = arith.addi %4, %138 : vector<1x256xi32>
    %c0_i32_53 = arith.constant 0 : i32
    %140 = vector.broadcast %c0_i32_53 : i32 to vector<1x256xi32>
    %141 = arith.cmpi sge, %139, %140 : vector<1x256xi32>
    %c1_i32_54 = arith.constant 1 : i32
    %142 = vector.broadcast %c1_i32_54 : i32 to vector<1x256xi32>
    %143 = arith.addi %4, %142 : vector<1x256xi32>
    %c16_i32_55 = arith.constant 16 : i32
    %144 = vector.broadcast %c16_i32_55 : i32 to vector<1x256xi32>
    %145 = arith.cmpi slt, %143, %144 : vector<1x256xi32>
    %146 = arith.andi %141, %145 : vector<1x256xi1>
    %c0_i32_56 = arith.constant 0 : i32
    %147 = vector.broadcast %c0_i32_56 : i32 to vector<1x256xi32>
    %148 = arith.addi %2, %147 : vector<1x256xi32>
    %c0_i32_57 = arith.constant 0 : i32
    %149 = vector.broadcast %c0_i32_57 : i32 to vector<1x256xi32>
    %150 = arith.cmpi sge, %148, %149 : vector<1x256xi32>
    %151 = arith.andi %146, %150 : vector<1x256xi1>
    %c0_i32_58 = arith.constant 0 : i32
    %152 = vector.broadcast %c0_i32_58 : i32 to vector<1x256xi32>
    %153 = arith.addi %2, %152 : vector<1x256xi32>
    %c16_i32_59 = arith.constant 16 : i32
    %154 = vector.broadcast %c16_i32_59 : i32 to vector<1x256xi32>
    %155 = arith.cmpi slt, %153, %154 : vector<1x256xi32>
    %156 = arith.andi %151, %155 : vector<1x256xi1>
    %c1_i32_60 = arith.constant 1 : i32
    %157 = vector.broadcast %c1_i32_60 : i32 to vector<1x256xi32>
    %158 = arith.addi %4, %157 : vector<1x256xi32>
    %c0_i32_61 = arith.constant 0 : i32
    %159 = vector.broadcast %c0_i32_61 : i32 to vector<1x256xi32>
    %160 = arith.cmpi sge, %158, %159 : vector<1x256xi32>
    %c1_i32_62 = arith.constant 1 : i32
    %161 = vector.broadcast %c1_i32_62 : i32 to vector<1x256xi32>
    %162 = arith.addi %4, %161 : vector<1x256xi32>
    %c16_i32_63 = arith.constant 16 : i32
    %163 = vector.broadcast %c16_i32_63 : i32 to vector<1x256xi32>
    %164 = arith.cmpi slt, %162, %163 : vector<1x256xi32>
    %165 = arith.andi %160, %164 : vector<1x256xi1>
    %c1_i32_64 = arith.constant 1 : i32
    %166 = vector.broadcast %c1_i32_64 : i32 to vector<1x256xi32>
    %167 = arith.addi %2, %166 : vector<1x256xi32>
    %c0_i32_65 = arith.constant 0 : i32
    %168 = vector.broadcast %c0_i32_65 : i32 to vector<1x256xi32>
    %169 = arith.cmpi sge, %167, %168 : vector<1x256xi32>
    %170 = arith.andi %165, %169 : vector<1x256xi1>
    %c1_i32_66 = arith.constant 1 : i32
    %171 = vector.broadcast %c1_i32_66 : i32 to vector<1x256xi32>
    %172 = arith.addi %2, %171 : vector<1x256xi32>
    %c16_i32_67 = arith.constant 16 : i32
    %173 = vector.broadcast %c16_i32_67 : i32 to vector<1x256xi32>
    %174 = arith.cmpi slt, %172, %173 : vector<1x256xi32>
    %175 = arith.andi %170, %174 : vector<1x256xi1>
    %c0 = arith.constant 0 : index
    %c0_68 = arith.constant 0 : index
    %176 = vector.load %arg4[%c0, %c0_68] : memref<32x4xf32, #tpu.memory_space<vmem>>, vector<32x4xf32>
    %177 = vector.extract_strided_slice %176 {offsets = [0, 0], sizes = [32, 1], strides = [1, 1]} : vector<32x4xf32> to vector<32x1xf32>
    %178 = vector.extract_strided_slice %176 {offsets = [0, 1], sizes = [32, 1], strides = [1, 1]} : vector<32x4xf32> to vector<32x1xf32>
    %179 = vector.extract_strided_slice %176 {offsets = [0, 2], sizes = [32, 1], strides = [1, 1]} : vector<32x4xf32> to vector<32x1xf32>
    %180 = vector.extract_strided_slice %176 {offsets = [0, 3], sizes = [32, 1], strides = [1, 1]} : vector<32x4xf32> to vector<32x1xf32>
    %c0_69 = arith.constant 0 : index
    %c0_70 = arith.constant 0 : index
    %181 = vector.load %arg2[%c0_69, %c0_70] : memref<32x288xf32, #tpu.memory_space<vmem>>, vector<32x288xf32>
    %c0_71 = arith.constant 0 : index
    %c0_72 = arith.constant 0 : index
    %182 = vector.load %arg3[%c0_71, %c0_72] : memref<32x288xf32, #tpu.memory_space<vmem>>, vector<32x288xf32>
    %c0_73 = arith.constant 0 : index
    %c0_74 = arith.constant 0 : index
    %c0_75 = arith.constant 0 : index
    %183 = vector.load %arg1[%c0_73, %c0_74, %c0_75] : memref<2x32x256xf32, #tpu.memory_space<vmem>>, vector<1x32x256xf32>
    %184 = vector.shape_cast %183 : vector<1x32x256xf32> to vector<32x256xf32>
    %c17_i32 = arith.constant 17 : i32
    %185 = tpu.dynamic_rotate %184 by %c17_i32 dim 1 : vector<32x256xf32>, i32 -> vector<32x256xf32>
    %cst = arith.constant 0.000000e+00 : f32
    %186 = vector.shape_cast %23 : vector<1x256xi1> to vector<1x256xi1>
    %187 = vector.broadcast %186 : vector<1x256xi1> to vector<32x256xi1>
    %188 = vector.broadcast %cst : f32 to vector<32x256xf32>
    %189 = arith.select %187, %185, %188 : vector<32x256xi1>, vector<32x256xf32>
    %c16_i32_76 = arith.constant 16 : i32
    %190 = tpu.dynamic_rotate %184 by %c16_i32_76 dim 1 : vector<32x256xf32>, i32 -> vector<32x256xf32>
    %cst_77 = arith.constant 0.000000e+00 : f32
    %191 = vector.shape_cast %42 : vector<1x256xi1> to vector<1x256xi1>
    %192 = vector.broadcast %191 : vector<1x256xi1> to vector<32x256xi1>
    %193 = vector.broadcast %cst_77 : f32 to vector<32x256xf32>
    %194 = arith.select %192, %190, %193 : vector<32x256xi1>, vector<32x256xf32>
    %c15_i32_78 = arith.constant 15 : i32
    %195 = tpu.dynamic_rotate %184 by %c15_i32_78 dim 1 : vector<32x256xf32>, i32 -> vector<32x256xf32>
    %cst_79 = arith.constant 0.000000e+00 : f32
    %196 = vector.shape_cast %61 : vector<1x256xi1> to vector<1x256xi1>
    %197 = vector.broadcast %196 : vector<1x256xi1> to vector<32x256xi1>
    %198 = vector.broadcast %cst_79 : f32 to vector<32x256xf32>
    %199 = arith.select %197, %195, %198 : vector<32x256xi1>, vector<32x256xf32>
    %c1_i32_80 = arith.constant 1 : i32
    %200 = tpu.dynamic_rotate %184 by %c1_i32_80 dim 1 : vector<32x256xf32>, i32 -> vector<32x256xf32>
    %cst_81 = arith.constant 0.000000e+00 : f32
    %201 = vector.shape_cast %80 : vector<1x256xi1> to vector<1x256xi1>
    %202 = vector.broadcast %201 : vector<1x256xi1> to vector<32x256xi1>
    %203 = vector.broadcast %cst_81 : f32 to vector<32x256xf32>
    %204 = arith.select %202, %200, %203 : vector<32x256xi1>, vector<32x256xf32>
    %cst_82 = arith.constant 0.000000e+00 : f32
    %205 = vector.shape_cast %99 : vector<1x256xi1> to vector<1x256xi1>
    %206 = vector.broadcast %205 : vector<1x256xi1> to vector<32x256xi1>
    %207 = vector.broadcast %cst_82 : f32 to vector<32x256xf32>
    %208 = arith.select %206, %184, %207 : vector<32x256xi1>, vector<32x256xf32>
    %c255_i32 = arith.constant 255 : i32
    %209 = tpu.dynamic_rotate %184 by %c255_i32 dim 1 : vector<32x256xf32>, i32 -> vector<32x256xf32>
    %cst_83 = arith.constant 0.000000e+00 : f32
    %210 = vector.shape_cast %118 : vector<1x256xi1> to vector<1x256xi1>
    %211 = vector.broadcast %210 : vector<1x256xi1> to vector<32x256xi1>
    %212 = vector.broadcast %cst_83 : f32 to vector<32x256xf32>
    %213 = arith.select %211, %209, %212 : vector<32x256xi1>, vector<32x256xf32>
    %c241_i32 = arith.constant 241 : i32
    %214 = tpu.dynamic_rotate %184 by %c241_i32 dim 1 : vector<32x256xf32>, i32 -> vector<32x256xf32>
    %cst_84 = arith.constant 0.000000e+00 : f32
    %215 = vector.shape_cast %137 : vector<1x256xi1> to vector<1x256xi1>
    %216 = vector.broadcast %215 : vector<1x256xi1> to vector<32x256xi1>
    %217 = vector.broadcast %cst_84 : f32 to vector<32x256xf32>
    %218 = arith.select %216, %214, %217 : vector<32x256xi1>, vector<32x256xf32>
    %c240_i32 = arith.constant 240 : i32
    %219 = tpu.dynamic_rotate %184 by %c240_i32 dim 1 : vector<32x256xf32>, i32 -> vector<32x256xf32>
    %cst_85 = arith.constant 0.000000e+00 : f32
    %220 = vector.shape_cast %156 : vector<1x256xi1> to vector<1x256xi1>
    %221 = vector.broadcast %220 : vector<1x256xi1> to vector<32x256xi1>
    %222 = vector.broadcast %cst_85 : f32 to vector<32x256xf32>
    %223 = arith.select %221, %219, %222 : vector<32x256xi1>, vector<32x256xf32>
    %c239_i32 = arith.constant 239 : i32
    %224 = tpu.dynamic_rotate %184 by %c239_i32 dim 1 : vector<32x256xf32>, i32 -> vector<32x256xf32>
    %cst_86 = arith.constant 0.000000e+00 : f32
    %225 = vector.shape_cast %175 : vector<1x256xi1> to vector<1x256xi1>
    %226 = vector.broadcast %225 : vector<1x256xi1> to vector<32x256xi1>
    %227 = vector.broadcast %cst_86 : f32 to vector<32x256xf32>
    %228 = arith.select %226, %224, %227 : vector<32x256xi1>, vector<32x256xf32>
    %229 = tpu.concatenate %189, %194, %199, %204, %208, %213, %218, %223, %228 in 0 : vector<32x256xf32>, vector<32x256xf32>, vector<32x256xf32>, vector<32x256xf32>, vector<32x256xf32>, vector<32x256xf32>, vector<32x256xf32>, vector<32x256xf32>, vector<32x256xf32> -> vector<288x256xf32>
    %cst_87 = arith.constant dense<0.000000e+00> : vector<32x256xf32>
    %230 = tpu.matmul %181, %229, %cst_87 {dimension_numbers = #tpu.dot_dimension_numbers<[1], [0], [0], [1], [0, 0, 1, 1], [], []>} : vector<32x288xf32>, vector<288x256xf32>, vector<32x256xf32> -> vector<32x256xf32>
    %231 = vector.broadcast %177 : vector<32x1xf32> to vector<32x256xf32>
    %232 = arith.mulf %230, %231 : vector<32x256xf32>
    %233 = vector.broadcast %178 : vector<32x1xf32> to vector<32x256xf32>
    %234 = arith.addf %232, %233 : vector<32x256xf32>
    %cst_88 = arith.constant 0.000000e+00 : f32
    %235 = vector.broadcast %cst_88 : f32 to vector<32x256xf32>
    %236 = arith.maximumf %234, %235 : vector<32x256xf32>
    %c17_i32_89 = arith.constant 17 : i32
    %237 = tpu.dynamic_rotate %236 by %c17_i32_89 dim 1 : vector<32x256xf32>, i32 -> vector<32x256xf32>
    %cst_90 = arith.constant 0.000000e+00 : f32
    %238 = vector.shape_cast %23 : vector<1x256xi1> to vector<1x256xi1>
    %239 = vector.broadcast %238 : vector<1x256xi1> to vector<32x256xi1>
    %240 = vector.broadcast %cst_90 : f32 to vector<32x256xf32>
    %241 = arith.select %239, %237, %240 : vector<32x256xi1>, vector<32x256xf32>
    %c16_i32_91 = arith.constant 16 : i32
    %242 = tpu.dynamic_rotate %236 by %c16_i32_91 dim 1 : vector<32x256xf32>, i32 -> vector<32x256xf32>
    %cst_92 = arith.constant 0.000000e+00 : f32
    %243 = vector.shape_cast %42 : vector<1x256xi1> to vector<1x256xi1>
    %244 = vector.broadcast %243 : vector<1x256xi1> to vector<32x256xi1>
    %245 = vector.broadcast %cst_92 : f32 to vector<32x256xf32>
    %246 = arith.select %244, %242, %245 : vector<32x256xi1>, vector<32x256xf32>
    %c15_i32_93 = arith.constant 15 : i32
    %247 = tpu.dynamic_rotate %236 by %c15_i32_93 dim 1 : vector<32x256xf32>, i32 -> vector<32x256xf32>
    %cst_94 = arith.constant 0.000000e+00 : f32
    %248 = vector.shape_cast %61 : vector<1x256xi1> to vector<1x256xi1>
    %249 = vector.broadcast %248 : vector<1x256xi1> to vector<32x256xi1>
    %250 = vector.broadcast %cst_94 : f32 to vector<32x256xf32>
    %251 = arith.select %249, %247, %250 : vector<32x256xi1>, vector<32x256xf32>
    %c1_i32_95 = arith.constant 1 : i32
    %252 = tpu.dynamic_rotate %236 by %c1_i32_95 dim 1 : vector<32x256xf32>, i32 -> vector<32x256xf32>
    %cst_96 = arith.constant 0.000000e+00 : f32
    %253 = vector.shape_cast %80 : vector<1x256xi1> to vector<1x256xi1>
    %254 = vector.broadcast %253 : vector<1x256xi1> to vector<32x256xi1>
    %255 = vector.broadcast %cst_96 : f32 to vector<32x256xf32>
    %256 = arith.select %254, %252, %255 : vector<32x256xi1>, vector<32x256xf32>
    %cst_97 = arith.constant 0.000000e+00 : f32
    %257 = vector.shape_cast %99 : vector<1x256xi1> to vector<1x256xi1>
    %258 = vector.broadcast %257 : vector<1x256xi1> to vector<32x256xi1>
    %259 = vector.broadcast %cst_97 : f32 to vector<32x256xf32>
    %260 = arith.select %258, %236, %259 : vector<32x256xi1>, vector<32x256xf32>
    %c255_i32_98 = arith.constant 255 : i32
    %261 = tpu.dynamic_rotate %236 by %c255_i32_98 dim 1 : vector<32x256xf32>, i32 -> vector<32x256xf32>
    %cst_99 = arith.constant 0.000000e+00 : f32
    %262 = vector.shape_cast %118 : vector<1x256xi1> to vector<1x256xi1>
    %263 = vector.broadcast %262 : vector<1x256xi1> to vector<32x256xi1>
    %264 = vector.broadcast %cst_99 : f32 to vector<32x256xf32>
    %265 = arith.select %263, %261, %264 : vector<32x256xi1>, vector<32x256xf32>
    %c241_i32_100 = arith.constant 241 : i32
    %266 = tpu.dynamic_rotate %236 by %c241_i32_100 dim 1 : vector<32x256xf32>, i32 -> vector<32x256xf32>
    %cst_101 = arith.constant 0.000000e+00 : f32
    %267 = vector.shape_cast %137 : vector<1x256xi1> to vector<1x256xi1>
    %268 = vector.broadcast %267 : vector<1x256xi1> to vector<32x256xi1>
    %269 = vector.broadcast %cst_101 : f32 to vector<32x256xf32>
    %270 = arith.select %268, %266, %269 : vector<32x256xi1>, vector<32x256xf32>
    %c240_i32_102 = arith.constant 240 : i32
    %271 = tpu.dynamic_rotate %236 by %c240_i32_102 dim 1 : vector<32x256xf32>, i32 -> vector<32x256xf32>
    %cst_103 = arith.constant 0.000000e+00 : f32
    %272 = vector.shape_cast %156 : vector<1x256xi1> to vector<1x256xi1>
    %273 = vector.broadcast %272 : vector<1x256xi1> to vector<32x256xi1>
    %274 = vector.broadcast %cst_103 : f32 to vector<32x256xf32>
    %275 = arith.select %273, %271, %274 : vector<32x256xi1>, vector<32x256xf32>
    %c239_i32_104 = arith.constant 239 : i32
    %276 = tpu.dynamic_rotate %236 by %c239_i32_104 dim 1 : vector<32x256xf32>, i32 -> vector<32x256xf32>
    %cst_105 = arith.constant 0.000000e+00 : f32
    %277 = vector.shape_cast %175 : vector<1x256xi1> to vector<1x256xi1>
    %278 = vector.broadcast %277 : vector<1x256xi1> to vector<32x256xi1>
    %279 = vector.broadcast %cst_105 : f32 to vector<32x256xf32>
    %280 = arith.select %278, %276, %279 : vector<32x256xi1>, vector<32x256xf32>
    %281 = tpu.concatenate %241, %246, %251, %256, %260, %265, %270, %275, %280 in 0 : vector<32x256xf32>, vector<32x256xf32>, vector<32x256xf32>, vector<32x256xf32>, vector<32x256xf32>, vector<32x256xf32>, vector<32x256xf32>, vector<32x256xf32>, vector<32x256xf32> -> vector<288x256xf32>
    %cst_106 = arith.constant dense<0.000000e+00> : vector<32x256xf32>
    %282 = tpu.matmul %182, %281, %cst_106 {dimension_numbers = #tpu.dot_dimension_numbers<[1], [0], [0], [1], [0, 0, 1, 1], [], []>} : vector<32x288xf32>, vector<288x256xf32>, vector<32x256xf32> -> vector<32x256xf32>
    %283 = vector.broadcast %179 : vector<32x1xf32> to vector<32x256xf32>
    %284 = arith.mulf %282, %283 : vector<32x256xf32>
    %285 = vector.broadcast %180 : vector<32x1xf32> to vector<32x256xf32>
    %286 = arith.addf %284, %285 : vector<32x256xf32>
    %287 = arith.addf %286, %184 : vector<32x256xf32>
    %cst_107 = arith.constant 0.000000e+00 : f32
    %288 = vector.broadcast %cst_107 : f32 to vector<32x256xf32>
    %289 = arith.maximumf %287, %288 : vector<32x256xf32>
    %c0_108 = arith.constant 0 : index
    %c0_109 = arith.constant 0 : index
    %c0_110 = arith.constant 0 : index
    %290 = vector.load %arg5[%c0_108, %c0_109, %c0_110] : memref<2x32x256xf32, #tpu.memory_space<vmem>>, vector<1x32x256xf32>
    %291 = vector.shape_cast %290 : vector<1x32x256xf32> to vector<32x256xf32>
    %292 = vector.shape_cast %289 : vector<32x256xf32> to vector<1x32x256xf32>
    tpu.vector_store %arg5[%c0_108, %c0_109, %c0_110], %292 {strides = array<i32>} : memref<2x32x256xf32, #tpu.memory_space<vmem>>, vector<1x32x256xf32>,
    %c1 = arith.constant 1 : index
    %c0_111 = arith.constant 0 : index
    %c0_112 = arith.constant 0 : index
    %293 = vector.load %arg1[%c1, %c0_111, %c0_112] : memref<2x32x256xf32, #tpu.memory_space<vmem>>, vector<1x32x256xf32>
    %294 = vector.shape_cast %293 : vector<1x32x256xf32> to vector<32x256xf32>
    %c17_i32_113 = arith.constant 17 : i32
    %295 = tpu.dynamic_rotate %294 by %c17_i32_113 dim 1 : vector<32x256xf32>, i32 -> vector<32x256xf32>
    %cst_114 = arith.constant 0.000000e+00 : f32
    %296 = vector.shape_cast %23 : vector<1x256xi1> to vector<1x256xi1>
    %297 = vector.broadcast %296 : vector<1x256xi1> to vector<32x256xi1>
    %298 = vector.broadcast %cst_114 : f32 to vector<32x256xf32>
    %299 = arith.select %297, %295, %298 : vector<32x256xi1>, vector<32x256xf32>
    %c16_i32_115 = arith.constant 16 : i32
    %300 = tpu.dynamic_rotate %294 by %c16_i32_115 dim 1 : vector<32x256xf32>, i32 -> vector<32x256xf32>
    %cst_116 = arith.constant 0.000000e+00 : f32
    %301 = vector.shape_cast %42 : vector<1x256xi1> to vector<1x256xi1>
    %302 = vector.broadcast %301 : vector<1x256xi1> to vector<32x256xi1>
    %303 = vector.broadcast %cst_116 : f32 to vector<32x256xf32>
    %304 = arith.select %302, %300, %303 : vector<32x256xi1>, vector<32x256xf32>
    %c15_i32_117 = arith.constant 15 : i32
    %305 = tpu.dynamic_rotate %294 by %c15_i32_117 dim 1 : vector<32x256xf32>, i32 -> vector<32x256xf32>
    %cst_118 = arith.constant 0.000000e+00 : f32
    %306 = vector.shape_cast %61 : vector<1x256xi1> to vector<1x256xi1>
    %307 = vector.broadcast %306 : vector<1x256xi1> to vector<32x256xi1>
    %308 = vector.broadcast %cst_118 : f32 to vector<32x256xf32>
    %309 = arith.select %307, %305, %308 : vector<32x256xi1>, vector<32x256xf32>
    %c1_i32_119 = arith.constant 1 : i32
    %310 = tpu.dynamic_rotate %294 by %c1_i32_119 dim 1 : vector<32x256xf32>, i32 -> vector<32x256xf32>
    %cst_120 = arith.constant 0.000000e+00 : f32
    %311 = vector.shape_cast %80 : vector<1x256xi1> to vector<1x256xi1>
    %312 = vector.broadcast %311 : vector<1x256xi1> to vector<32x256xi1>
    %313 = vector.broadcast %cst_120 : f32 to vector<32x256xf32>
    %314 = arith.select %312, %310, %313 : vector<32x256xi1>, vector<32x256xf32>
    %cst_121 = arith.constant 0.000000e+00 : f32
    %315 = vector.shape_cast %99 : vector<1x256xi1> to vector<1x256xi1>
    %316 = vector.broadcast %315 : vector<1x256xi1> to vector<32x256xi1>
    %317 = vector.broadcast %cst_121 : f32 to vector<32x256xf32>
    %318 = arith.select %316, %294, %317 : vector<32x256xi1>, vector<32x256xf32>
    %c255_i32_122 = arith.constant 255 : i32
    %319 = tpu.dynamic_rotate %294 by %c255_i32_122 dim 1 : vector<32x256xf32>, i32 -> vector<32x256xf32>
    %cst_123 = arith.constant 0.000000e+00 : f32
    %320 = vector.shape_cast %118 : vector<1x256xi1> to vector<1x256xi1>
    %321 = vector.broadcast %320 : vector<1x256xi1> to vector<32x256xi1>
    %322 = vector.broadcast %cst_123 : f32 to vector<32x256xf32>
    %323 = arith.select %321, %319, %322 : vector<32x256xi1>, vector<32x256xf32>
    %c241_i32_124 = arith.constant 241 : i32
    %324 = tpu.dynamic_rotate %294 by %c241_i32_124 dim 1 : vector<32x256xf32>, i32 -> vector<32x256xf32>
    %cst_125 = arith.constant 0.000000e+00 : f32
    %325 = vector.shape_cast %137 : vector<1x256xi1> to vector<1x256xi1>
    %326 = vector.broadcast %325 : vector<1x256xi1> to vector<32x256xi1>
    %327 = vector.broadcast %cst_125 : f32 to vector<32x256xf32>
    %328 = arith.select %326, %324, %327 : vector<32x256xi1>, vector<32x256xf32>
    %c240_i32_126 = arith.constant 240 : i32
    %329 = tpu.dynamic_rotate %294 by %c240_i32_126 dim 1 : vector<32x256xf32>, i32 -> vector<32x256xf32>
    %cst_127 = arith.constant 0.000000e+00 : f32
    %330 = vector.shape_cast %156 : vector<1x256xi1> to vector<1x256xi1>
    %331 = vector.broadcast %330 : vector<1x256xi1> to vector<32x256xi1>
    %332 = vector.broadcast %cst_127 : f32 to vector<32x256xf32>
    %333 = arith.select %331, %329, %332 : vector<32x256xi1>, vector<32x256xf32>
    %c239_i32_128 = arith.constant 239 : i32
    %334 = tpu.dynamic_rotate %294 by %c239_i32_128 dim 1 : vector<32x256xf32>, i32 -> vector<32x256xf32>
    %cst_129 = arith.constant 0.000000e+00 : f32
    %335 = vector.shape_cast %175 : vector<1x256xi1> to vector<1x256xi1>
    %336 = vector.broadcast %335 : vector<1x256xi1> to vector<32x256xi1>
    %337 = vector.broadcast %cst_129 : f32 to vector<32x256xf32>
    %338 = arith.select %336, %334, %337 : vector<32x256xi1>, vector<32x256xf32>
    %339 = tpu.concatenate %299, %304, %309, %314, %318, %323, %328, %333, %338 in 0 : vector<32x256xf32>, vector<32x256xf32>, vector<32x256xf32>, vector<32x256xf32>, vector<32x256xf32>, vector<32x256xf32>, vector<32x256xf32>, vector<32x256xf32>, vector<32x256xf32> -> vector<288x256xf32>
    %cst_130 = arith.constant dense<0.000000e+00> : vector<32x256xf32>
    %340 = tpu.matmul %181, %339, %cst_130 {dimension_numbers = #tpu.dot_dimension_numbers<[1], [0], [0], [1], [0, 0, 1, 1], [], []>} : vector<32x288xf32>, vector<288x256xf32>, vector<32x256xf32> -> vector<32x256xf32>
    %341 = vector.broadcast %177 : vector<32x1xf32> to vector<32x256xf32>
    %342 = arith.mulf %340, %341 : vector<32x256xf32>
    %343 = vector.broadcast %178 : vector<32x1xf32> to vector<32x256xf32>
    %344 = arith.addf %342, %343 : vector<32x256xf32>
    %cst_131 = arith.constant 0.000000e+00 : f32
    %345 = vector.broadcast %cst_131 : f32 to vector<32x256xf32>
    %346 = arith.maximumf %344, %345 : vector<32x256xf32>
    %c17_i32_132 = arith.constant 17 : i32
    %347 = tpu.dynamic_rotate %346 by %c17_i32_132 dim 1 : vector<32x256xf32>, i32 -> vector<32x256xf32>
    %cst_133 = arith.constant 0.000000e+00 : f32
    %348 = vector.shape_cast %23 : vector<1x256xi1> to vector<1x256xi1>
    %349 = vector.broadcast %348 : vector<1x256xi1> to vector<32x256xi1>
    %350 = vector.broadcast %cst_133 : f32 to vector<32x256xf32>
    %351 = arith.select %349, %347, %350 : vector<32x256xi1>, vector<32x256xf32>
    %c16_i32_134 = arith.constant 16 : i32
    %352 = tpu.dynamic_rotate %346 by %c16_i32_134 dim 1 : vector<32x256xf32>, i32 -> vector<32x256xf32>
    %cst_135 = arith.constant 0.000000e+00 : f32
    %353 = vector.shape_cast %42 : vector<1x256xi1> to vector<1x256xi1>
    %354 = vector.broadcast %353 : vector<1x256xi1> to vector<32x256xi1>
    %355 = vector.broadcast %cst_135 : f32 to vector<32x256xf32>
    %356 = arith.select %354, %352, %355 : vector<32x256xi1>, vector<32x256xf32>
    %c15_i32_136 = arith.constant 15 : i32
    %357 = tpu.dynamic_rotate %346 by %c15_i32_136 dim 1 : vector<32x256xf32>, i32 -> vector<32x256xf32>
    %cst_137 = arith.constant 0.000000e+00 : f32
    %358 = vector.shape_cast %61 : vector<1x256xi1> to vector<1x256xi1>
    %359 = vector.broadcast %358 : vector<1x256xi1> to vector<32x256xi1>
    %360 = vector.broadcast %cst_137 : f32 to vector<32x256xf32>
    %361 = arith.select %359, %357, %360 : vector<32x256xi1>, vector<32x256xf32>
    %c1_i32_138 = arith.constant 1 : i32
    %362 = tpu.dynamic_rotate %346 by %c1_i32_138 dim 1 : vector<32x256xf32>, i32 -> vector<32x256xf32>
    %cst_139 = arith.constant 0.000000e+00 : f32
    %363 = vector.shape_cast %80 : vector<1x256xi1> to vector<1x256xi1>
    %364 = vector.broadcast %363 : vector<1x256xi1> to vector<32x256xi1>
    %365 = vector.broadcast %cst_139 : f32 to vector<32x256xf32>
    %366 = arith.select %364, %362, %365 : vector<32x256xi1>, vector<32x256xf32>
    %cst_140 = arith.constant 0.000000e+00 : f32
    %367 = vector.shape_cast %99 : vector<1x256xi1> to vector<1x256xi1>
    %368 = vector.broadcast %367 : vector<1x256xi1> to vector<32x256xi1>
    %369 = vector.broadcast %cst_140 : f32 to vector<32x256xf32>
    %370 = arith.select %368, %346, %369 : vector<32x256xi1>, vector<32x256xf32>
    %c255_i32_141 = arith.constant 255 : i32
    %371 = tpu.dynamic_rotate %346 by %c255_i32_141 dim 1 : vector<32x256xf32>, i32 -> vector<32x256xf32>
    %cst_142 = arith.constant 0.000000e+00 : f32
    %372 = vector.shape_cast %118 : vector<1x256xi1> to vector<1x256xi1>
    %373 = vector.broadcast %372 : vector<1x256xi1> to vector<32x256xi1>
    %374 = vector.broadcast %cst_142 : f32 to vector<32x256xf32>
    %375 = arith.select %373, %371, %374 : vector<32x256xi1>, vector<32x256xf32>
    %c241_i32_143 = arith.constant 241 : i32
    %376 = tpu.dynamic_rotate %346 by %c241_i32_143 dim 1 : vector<32x256xf32>, i32 -> vector<32x256xf32>
    %cst_144 = arith.constant 0.000000e+00 : f32
    %377 = vector.shape_cast %137 : vector<1x256xi1> to vector<1x256xi1>
    %378 = vector.broadcast %377 : vector<1x256xi1> to vector<32x256xi1>
    %379 = vector.broadcast %cst_144 : f32 to vector<32x256xf32>
    %380 = arith.select %378, %376, %379 : vector<32x256xi1>, vector<32x256xf32>
    %c240_i32_145 = arith.constant 240 : i32
    %381 = tpu.dynamic_rotate %346 by %c240_i32_145 dim 1 : vector<32x256xf32>, i32 -> vector<32x256xf32>
    %cst_146 = arith.constant 0.000000e+00 : f32
    %382 = vector.shape_cast %156 : vector<1x256xi1> to vector<1x256xi1>
    %383 = vector.broadcast %382 : vector<1x256xi1> to vector<32x256xi1>
    %384 = vector.broadcast %cst_146 : f32 to vector<32x256xf32>
    %385 = arith.select %383, %381, %384 : vector<32x256xi1>, vector<32x256xf32>
    %c239_i32_147 = arith.constant 239 : i32
    %386 = tpu.dynamic_rotate %346 by %c239_i32_147 dim 1 : vector<32x256xf32>, i32 -> vector<32x256xf32>
    %cst_148 = arith.constant 0.000000e+00 : f32
    %387 = vector.shape_cast %175 : vector<1x256xi1> to vector<1x256xi1>
    %388 = vector.broadcast %387 : vector<1x256xi1> to vector<32x256xi1>
    %389 = vector.broadcast %cst_148 : f32 to vector<32x256xf32>
    %390 = arith.select %388, %386, %389 : vector<32x256xi1>, vector<32x256xf32>
    %391 = tpu.concatenate %351, %356, %361, %366, %370, %375, %380, %385, %390 in 0 : vector<32x256xf32>, vector<32x256xf32>, vector<32x256xf32>, vector<32x256xf32>, vector<32x256xf32>, vector<32x256xf32>, vector<32x256xf32>, vector<32x256xf32>, vector<32x256xf32> -> vector<288x256xf32>
    %cst_149 = arith.constant dense<0.000000e+00> : vector<32x256xf32>
    %392 = tpu.matmul %182, %391, %cst_149 {dimension_numbers = #tpu.dot_dimension_numbers<[1], [0], [0], [1], [0, 0, 1, 1], [], []>} : vector<32x288xf32>, vector<288x256xf32>, vector<32x256xf32> -> vector<32x256xf32>
    %393 = vector.broadcast %179 : vector<32x1xf32> to vector<32x256xf32>
    %394 = arith.mulf %392, %393 : vector<32x256xf32>
    %395 = vector.broadcast %180 : vector<32x1xf32> to vector<32x256xf32>
    %396 = arith.addf %394, %395 : vector<32x256xf32>
    %397 = arith.addf %396, %294 : vector<32x256xf32>
    %cst_150 = arith.constant 0.000000e+00 : f32
    %398 = vector.broadcast %cst_150 : f32 to vector<32x256xf32>
    %399 = arith.maximumf %397, %398 : vector<32x256xf32>
    %c1_151 = arith.constant 1 : index
    %c0_152 = arith.constant 0 : index
    %c0_153 = arith.constant 0 : index
    %400 = vector.load %arg5[%c1_151, %c0_152, %c0_153] : memref<2x32x256xf32, #tpu.memory_space<vmem>>, vector<1x32x256xf32>
    %401 = vector.shape_cast %400 : vector<1x32x256xf32> to vector<32x256xf32>
    %402 = vector.shape_cast %399 : vector<32x256xf32> to vector<1x32x256xf32>
    tpu.vector_store %arg5[%c1_151, %c0_152, %c0_153], %402 {strides = array<i32>} : memref<2x32x256xf32, #tpu.memory_space<vmem>>, vector<1x32x256xf32>,
    return
  }
  func.func @transform_0(%arg0: i32) -> (i32, i32, i32) {
    %c0_i32 = arith.constant 0 : i32
    %c0_i32_0 = arith.constant 0 : i32
    %c0_i32_1 = arith.constant 0 : i32
    return %arg0, %c0_i32, %c0_i32_0 : i32, i32, i32
  }
  func.func @transform_1(%arg0: i32) -> (i32, i32) {
    %c0_i32 = arith.constant 0 : i32
    %c0_i32_0 = arith.constant 0 : i32
    %c0_i32_1 = arith.constant 0 : i32
    return %c0_i32, %c0_i32_0 : i32, i32
  }
  func.func @transform_2(%arg0: i32) -> (i32, i32) {
    %c0_i32 = arith.constant 0 : i32
    %c0_i32_0 = arith.constant 0 : i32
    %c0_i32_1 = arith.constant 0 : i32
    return %c0_i32, %c0_i32_0 : i32, i32
  }
  func.func @transform_3(%arg0: i32) -> (i32, i32) {
    %c0_i32 = arith.constant 0 : i32
    %c0_i32_0 = arith.constant 0 : i32
    %c0_i32_1 = arith.constant 0 : i32
    return %c0_i32, %c0_i32_0 : i32, i32
  }
  func.func @transform_4(%arg0: i32) -> (i32, i32, i32) {
    %c0_i32 = arith.constant 0 : i32
    %c0_i32_0 = arith.constant 0 : i32
    %c0_i32_1 = arith.constant 0 : i32
    return %arg0, %c0_i32, %c0_i32_0 : i32, i32, i32
  }
}

</mosaic_0001>

<bundles_post_ra>
// kernel: tpu_custom_call.1
= control target key start
LH: loop header
LB: loop body
LE: loop exit
PB: predicated region body
PF: predicated region fallthrough
CT: control target
= control target key end

     0   :  { %9 = vsyncpa [#allocation3], 0  ;;  %s5328_s0 = inlined_call_operand.hbm [shape: f32[2,32,256], index: 0, kind: input, shape index: {}]   ;;  %s5329_s1 = inlined_call_operand.hbm [shape: f32[32,288], index: 1, kind: input, shape index: {}]   ;;  %s5330_s2 = inlined_call_operand.hbm [shape: f32[32,288], index: 2, kind: input, shape index: {}]   ;;  %s5331_s3 = inlined_call_operand.vmem [shape: f32[32,4], index: 3, kind: input, shape index: {}]   ;;  %s5332_s4 = inlined_call_operand.hbm [shape: f32[2,32,256], index: 4, kind: output, shape index: {}]  }
   0x1   :  { %10 = vsyncpa [#allocation6], 0  ;;  %s29_s17 = sshll.u32 %s5329_s1, 4  ;;  %s30_s17 = int_to_ptr.hbm [resolvable:$true] %s29_s17 }
   0x2   :  { %11 = vsyncpa [#allocation4], 0  ;;  %s2726_s18 = smov [#allocation5]   ;;  %s16_s22 = sshll.u32 %s5328_s0, 4  ;;  %s17_s22 = int_to_ptr.hbm [resolvable:$true] %s16_s22 }
   0x3   :  { %s31_s19 = sshll.u32 %s2726_s18, 4  ;;  %s2727_s23 = smov 384   ;;  %s32_s19 = int_to_ptr.vmem [resolvable:$true] %s31_s19 }
   0x4   :  { %s2728_s24 = smov 24   ;;  %s2729_s25 = smov [#allocation2]  }
   0x5   :  { %37 = dma.hbm_to_vmem [thread:$0]  %s30_s17, 1536, %s32_s19, [#allocation6], %s2727_s23, %s2727_s23, %s2728_s24  }
   0x6   :  { %s18_s26 = sshll.u32 %s2729_s25, 4  ;;  %s2730_s27 = smov 256   ;;  %s19_s26 = int_to_ptr.vmem [resolvable:$true] %s18_s26 }
   0x7   :  { %s2731_s28 = smov 16   ;;  %s42_s30 = sshll.u32 %s5330_s2, 4  ;;  %s43_s30 = int_to_ptr.hbm [resolvable:$true] %s42_s30 }
   0x8   :  { %24 = dma.hbm_to_vmem [thread:$0]  %s17_s22, 2048, %s19_s26, [#allocation3], %s2730_s27, %s2730_s27, %s2731_s28  }
   0x9   :  { %s2732_s5 = smov [#allocation7]  }
   0xa   :  { %s44_s0 = sshll.u32 %s2732_s5, 4  ;;  %s45_s0 = int_to_ptr.vmem [resolvable:$true] %s44_s0 }
   0xb   :  { %50 = dma.hbm_to_vmem [thread:$0]  %s43_s30, 1536, %s45_s0, [#allocation6], %s2727_s23, %s2727_s23, %s2728_s24  }
   0xc   :  { %2720 = dma.done.wait [#allocation3], 2048  }
   0xd   :  { %2721 = vsyncadd [#allocation3], 4294965248 }
   0xe   :  { %2722 = dma.done.wait [#allocation6], 3072  }
   0xf   :  { %2723 = vsyncadd [#allocation6], 4294964224  ;;  %v2782_v0 = vld [vmem:[#allocation2 + $0x20] sm:$0xff]  ;;  %s2733_s6 = smov 17   ;;  %v2790_v2 = vld [vmem:[#allocation2 + $0x8] sm:$0xff]  ;;  %s2734_s2 = smov 1   ;;  %v65_v16 = vlaneseq }
  0x10   :  { %v2784_v1 = vld [vmem:[#allocation2] sm:$0xff]  ;;  %186 = vrot.lane.b32.xlu1 %v2782_v0, %s2733_s6  ;;  %190 = vrot.lane.b32.xlu2 %v2790_v2, %s2733_s6  ;;  %v2794_v3 = vld [vmem:[#allocation2 + $0x30] sm:$0xff]  ;;  %v2798_v5 = vld [vmem:[#allocation2 + $0x18] sm:$0xff]  ;;  %s2735_s7 = smov 15   ;;  %s2736_s8 = smov 111   ;;  %v5435_v32 = vmov 0 }
  0x11   :  { %182 = vrot.lane.b32.xlu0 %v2784_v1, %s2733_s6  ;;  %v2796_v4 = vld [vmem:[#allocation2 + $0x10] sm:$0xff]  ;;  %v2806_v6 = vld [vmem:[#allocation2 + $0x38] sm:$0xff]  ;;  %v2808_v7 = vld [vmem:[#allocation2 + $0x28] sm:$0xff]  ;;  %s2737_s9 = smov 112   ;;  %s2738_s10 = smov 113   ;;  %v2912_v18 = vand.u32 127, %v65_v16 }
  0x12   :  { %v5438_v33 = vmov 0  ;;  %v5443_v35 = vmov 0  ;;  %s2739_s11 = smov 127   ;;  %v5448_v53 = vmov 0  ;;  %v5452_v60 = vmov 0  ;;  %s2215_s0 = sshll.u32 %s5332_s4, 4  ;;  %s2216_s0 = int_to_ptr.hbm [resolvable:$true] %s2215_s0 }
  0x13   :  { %v67_v21 = vadd.s32 128, %v2912_v18  ;;  %v68_v23 = vand.u32 15, %v2912_v18  ;;  %v2925_v24 = vshra.s32 %v2912_v18, 4  ;;  %vm5334_vm9 = vcmp.lt.s32.totalorder %v2912_v18, 1 }
  0x15   :  { %v69_v25 = vand.u32 15, %v67_v21  ;;  %v2927_v26 = vshra.s32 %v67_v21, 4  ;;  %v2933_v27 = vadd.s32 4294967295, %v68_v23  ;;  %vm108_vm0 = vcmp.ge.s32.totalorder %v2925_v24, 0 }
  0x16   :  { %vm110_vm1 = vcmp.lt.s32.totalorder %v2925_v24, 16  ;;  %v72_v43 = vadd.s32 4294967295, %v2925_v24  ;;  %v3008_v49 = vadd.s32 1, %v68_v23 }
  0x17   :  { %v2941_v30 = vadd.s32 4294967295, %v69_v25  ;;  %vm109_vm2 = vcmp.ge.s32.totalorder %v2927_v26, 0  ;;  %vm111_vm3 = vcmp.lt.s32.totalorder %v2927_v26, 16  ;;  %vm5342_vm4 = vcmp.ge.s32.totalorder %v2933_v27, 0  ;;  %vm2948_vm5 = vmand %vm108_vm0, %vm110_vm1 }
  0x18   :  { %188 = vrot.lane.b32.xlu1 %v2794_v3, %s2733_s6  ;;  %192 = vrot.lane.b32.xlu2 %v2798_v5, %s2733_s6  ;;  %v5436_v32 = vsel %vm2948_vm5, 4294967295, %v5435_v32  ;;  %vm2953_vm7 = vmand %vm109_vm2, %vm111_vm3  ;;  %v73_v44 = vadd.s32 4294967295, %v2927_v26  ;;  %vm74_vm11 = vcmp.ge.s32.totalorder %v72_v43, 0  ;;  %vm76_vm12 = vcmp.lt.s32.totalorder %v72_v43, 16 }
  0x19   :  { %184 = vrot.lane.b32.xlu0 %v2796_v4, %s2733_s6  ;;  %5437 = vst [vmem:[#allocation12_spill] sm:$0xff] %v5436_v32  ;;  %vm5336_vm6 = vcmp.ge.s32.totalorder %v2941_v30, 0  ;;  %v5439_v33 = vsel %vm2953_vm7, 4294967295, %v5438_v33  ;;  %vm2965_vm8 = vmand %vm2948_vm5, %vm5342_vm4  ;;  %v3014_v50 = vadd.s32 1, %v69_v25  ;;  %vm5337_vm0 = vcmp.lt.s32.totalorder %v3008_v49, 16 }
  0x1a   :  { %5440 = vst [vmem:[#allocation13_spill] sm:$0xff] %v5439_v33  ;;  %vm2974_vm10 = vmand %vm2953_vm7, %vm5336_vm6  ;;  %vm75_vm13 = vcmp.ge.s32.totalorder %v73_v44, 0  ;;  %vm77_vm14 = vcmp.lt.s32.totalorder %v73_v44, 16  ;;  %vm5333_vm1 = vcmp.lt.s32.totalorder %v2912_v18, 15  ;;  %v5457_v44 = vmov 0  ;;  %v3731_v33 = vld [vmem:[#allocation2 + $0x48] sm:$0xff] }
  0x1b   :  { %v5444_v35 = vsel %vm2974_vm10, 4294967295, %v5443_v35  ;;  %vm3016_vm15 = vmand %vm74_vm11, %vm76_vm12  ;;  %vm5335_vm3 = vcmp.lt.s32.totalorder %v3014_v50, 16 }
  0x1c   :  { %5445 = vst [vmem:[#allocation14_spill] sm:$0xff] %v5444_v35  ;;  %vm3022_vm2 = vmand %vm75_vm13, %vm77_vm14  ;;  %vm5340_vm13 = vcmp.lt.s32.totalorder %v2912_v18, 16 }
  0x1d   :  { %v5449_v53 = vsel %vm3022_vm2, 4294967295, %v5448_v53  ;;  %vm3035_vm11 = vmand %vm3016_vm15, %vm5337_vm0 }
  0x1e   :  { %vm3053_vm12 = vmand %vm3022_vm2, %vm5335_vm3  ;;  %vm5341_vm3 = vcmp.lt.s32.totalorder %v2912_v18, 111 }
  0x1f   :  { %v5453_v60 = vsel %vm3053_vm12, 4294967295, %v5452_v60 }
  0x20   :  { %196 = vrot.lane.b32.xlu1 %v2806_v6, %s2733_s6  ;;  %219 = vrot.lane.b32.xlu2 %v2784_v1, %s2731_s28 }
  0x21   :  { %194 = vrot.lane.b32.xlu0 %v2808_v7, %s2733_s6 }
  0x28   :  { %223 = vrot.lane.b32.xlu1 %v2782_v0, %s2731_s28  ;;  %299 = vrot.lane.b32.xlu2 %v2794_v3, %s2734_s2 }
  0x29   :  { %221 = vrot.lane.b32.xlu0 %v2796_v4, %s2731_s28 }
  0x30   :  { %297 = vrot.lane.b32.xlu1 %v2782_v0, %s2734_s2  ;;  %305 = vrot.lane.b32.xlu2 %v2808_v7, %s2734_s2 }
  0x31   :  { %307 = vrot.lane.b32.xlu0 %v2806_v6, %s2734_s2 }
  0x38   :  { %303 = vrot.lane.b32.xlu1 %v2798_v5, %s2734_s2  ;;  %293 = vrot.lane.b32.xlu2 %v2784_v1, %s2734_s2 }
  0x39   :  { %295 = vrot.lane.b32.xlu0 %v2796_v4, %s2734_s2 }
  0x40   :  { %262 = vrot.lane.b32.xlu1 %v2794_v3, %s2735_s7  ;;  %270 = vrot.lane.b32.xlu2 %v2806_v6, %s2735_s7 }
  0x41   :  { %301 = vrot.lane.b32.xlu0 %v2790_v2, %s2734_s2 }
  0x48   :  { %268 = vrot.lane.b32.xlu1 %v2808_v7, %s2735_s7  ;;  %258 = vrot.lane.b32.xlu2 %v2796_v4, %s2735_s7 }
  0x49   :  { %260 = vrot.lane.b32.xlu0 %v2782_v0, %s2735_s7 }
  0x50   :  { %256 = vrot.lane.b32.xlu1 %v2784_v1, %s2735_s7  ;;  %264 = vrot.lane.b32.xlu2 %v2790_v2, %s2735_s7 }
  0x51   :  { %266 = vrot.lane.b32.xlu0 %v2798_v5, %s2735_s7 }
  0x58   :  { %233 = vrot.lane.b32.xlu1 %v2806_v6, %s2731_s28  ;;  %459 = vrot.lane.b32.xlu2 %v2794_v3, %s2736_s8 }
  0x59   :  { %225 = vrot.lane.b32.xlu0 %v2794_v3, %s2731_s28 }
  0x60   :  { %231 = vrot.lane.b32.xlu1 %v2808_v7, %s2731_s28  ;;  %457 = vrot.lane.b32.xlu2 %v2782_v0, %s2736_s8 }
  0x61   :  { %467 = vrot.lane.b32.xlu0 %v2806_v6, %s2736_s8 }
  0x68   :  { %229 = vrot.lane.b32.xlu1 %v2798_v5, %s2731_s28  ;;  %455 = vrot.lane.b32.xlu2 %v2796_v4, %s2736_s8 }
  0x69   :  { %465 = vrot.lane.b32.xlu0 %v2808_v7, %s2736_s8 }
  0x6a   :  { %v2870_v8 = vpop.permute.xlu2 %190 }
  0x70   :  { %227 = vrot.lane.b32.xlu1 %v2790_v2, %s2731_s28  ;;  %453 = vrot.lane.b32.xlu2 %v2784_v1, %s2736_s8 }
  0x71   :  { %463 = vrot.lane.b32.xlu0 %v2798_v5, %s2736_s8 }
  0x72   :  { %v2878_v9 = vpop.permute.xlu2 %192 }
  0x78   :  { %422 = vrot.lane.b32.xlu1 %v2794_v3, %s2737_s9  ;;  %430 = vrot.lane.b32.xlu2 %v2806_v6, %s2737_s9 }
  0x79   :  { %461 = vrot.lane.b32.xlu0 %v2790_v2, %s2736_s8 }
  0x7a   :  { %v2886_v10 = vpop.permute.xlu2 %219 }
  0x80   :  { %428 = vrot.lane.b32.xlu1 %v2808_v7, %s2737_s9  ;;  %418 = vrot.lane.b32.xlu2 %v2796_v4, %s2737_s9 }
  0x81   :  { %420 = vrot.lane.b32.xlu0 %v2782_v0, %s2737_s9 }
  0x82   :  { %v2892_v11 = vpop.permute.xlu1 %186  ;;  %v300_v13 = vpop.permute.xlu2 %299 }
  0x83   :  { %v2894_v12 = vpop.permute.xlu0 %182 }
  0x88   :  { %416 = vrot.lane.b32.xlu1 %v2784_v1, %s2737_s9  ;;  %424 = vrot.lane.b32.xlu2 %v2790_v2, %s2737_s9 }
  0x89   :  { %426 = vrot.lane.b32.xlu0 %v2798_v5, %s2737_s9 }
  0x8a   :  { %v2902_v14 = vpop.permute.xlu1 %188  ;;  %v306_v17 = vpop.permute.xlu2 %305 }
  0x8b   :  { %v2904_v15 = vpop.permute.xlu0 %184 }
  0x90   :  { %393 = vrot.lane.b32.xlu1 %v2806_v6, %s2738_s10  ;;  %383 = vrot.lane.b32.xlu2 %v2782_v0, %s2738_s10 }
  0x91   :  { %385 = vrot.lane.b32.xlu0 %v2794_v3, %s2738_s10 }
  0x92   :  { %v2914_v19 = vpop.permute.xlu1 %196  ;;  %v2921_v22 = vpop.permute.xlu2 %293 }
  0x93   :  { %v2916_v20 = vpop.permute.xlu0 %194 }
  0x98   :  { %381 = vrot.lane.b32.xlu1 %v2796_v4, %s2738_s10  ;;  %389 = vrot.lane.b32.xlu2 %v2798_v5, %s2738_s10 }
  0x99   :  { %391 = vrot.lane.b32.xlu0 %v2808_v7, %s2738_s10 }
  0x9a   :  { %v2935_v28 = vpop.permute.xlu1 %223  ;;  %v271_v31 = vpop.permute.xlu2 %270 }
  0x9b   :  { %v2937_v29 = vpop.permute.xlu0 %221 }
  0xa0   :  { %387 = vrot.lane.b32.xlu1 %v2790_v2, %s2738_s10  ;;  %348 = vrot.lane.b32.xlu2 %v2794_v3, %s2739_s11 }
  0xa1   :  { %379 = vrot.lane.b32.xlu0 %v2784_v1, %s2738_s10 }
  0xa2   :  { %v298_v36 = vpop.permute.xlu1 %297  ;;  %v259_v42 = vpop.permute.xlu2 %258 }
  0xa3   :  { %v308_v37 = vpop.permute.xlu0 %307  ;;  %v316_v40 = vsel %vm5334_vm9, %v306_v17, %v298_v36  ;;  %v312_v41 = vsel %vm5334_vm9, %v298_v36, %v306_v17 }
  0xa4   :  { %v317_v38 = vsel %vm5334_vm9, %v308_v37, %v300_v13  ;;  %v313_v39 = vsel %vm5334_vm9, %v300_v13, %v308_v37 }
  0xa5   :  { %2229 = vmatpush.msk.msra.mxu0 %vm2965_vm8, %v317_v38  ;;  %2269 = vmatpush.msk.msra.mxu3 %vm2974_vm10, %v313_v39  ;;  %v126_v38 = vadd.s32 1, %v2925_v24  ;;  %v5454_v24 = vmov 0 }
  0xa7   :  { %2230 = vmatpush.msk.msra.mxu0 %vm2965_vm8, %v316_v40  ;;  %2270 = vmatpush.msk.msra.mxu3 %vm2974_vm10, %v312_v41  ;;  %vm128_vm14 = vcmp.ge.s32.totalorder %v126_v38, 0 }
  0xa8   :  { %346 = vrot.lane.b32.xlu1 %v2782_v0, %s2739_s11  ;;  %354 = vrot.lane.b32.xlu2 %v2808_v7, %s2739_s11 }
  0xa9   :  { %356 = vrot.lane.b32.xlu0 %v2806_v6, %s2739_s11 }
  0xaa   :  { %v304_v45 = vpop.permute.xlu1 %303  ;;  %v265_v51 = vpop.permute.xlu2 %264 }
  0xab   :  { %v296_v46 = vpop.permute.xlu0 %295 }
  0xac   :  { %v315_v47 = vsel %vm5334_vm9, %v304_v45, %v296_v46  ;;  %v311_v48 = vsel %vm5334_vm9, %v296_v46, %v304_v45 }
  0xad   :  { %2231 = vmatpush.msk.msra.mxu0 %vm2965_vm8, %v315_v47  ;;  %2271 = vmatpush.msk.msra.mxu3 %vm2974_vm10, %v311_v48 }
  0xb0   :  { %352 = vrot.lane.b32.xlu1 %v2798_v5, %s2739_s11  ;;  %342 = vrot.lane.b32.xlu2 %v2784_v1, %s2739_s11 }
  0xb1   :  { %344 = vrot.lane.b32.xlu0 %v2796_v4, %s2739_s11 }
  0xb2   :  { %v263_v54 = vpop.permute.xlu1 %262  ;;  %v3063_v62 = vpop.permute.xlu2 %459 }
  0xb3   :  { %v302_v55 = vpop.permute.xlu0 %301  ;;  %v280_v59 = vsel %vm5333_vm1, %v271_v31, %v263_v54  ;;  %v276_v61 = vsel %vm5333_vm1, %v263_v54, %v271_v31 }
  0xb4   :  { %v314_v57 = vsel %vm5334_vm9, %v302_v55, %v2921_v22  ;;  %v310_v58 = vsel %vm5334_vm9, %v2921_v22, %v302_v55 }
  0xb5   :  { %2232 = vmatpush.msk.msra.mxu0 %vm2965_vm8, %v314_v57  ;;  %2272 = vmatpush.msk.msra.mxu3 %vm2974_vm10, %v310_v58 }
  0xb7   :  { %2233 = vmatpush.msk.msra.mxu0 %vm3035_vm11, %v280_v59  ;;  %2273 = vmatpush.msk.msra.mxu3 %vm3053_vm12, %v276_v61 }
  0xb9   :  { %350 = vrot.lane.b32.xlu0 %v2790_v2, %s2739_s11 }
  0xba   :  { %v269_v63 = vpop.permute.xlu1 %268  ;;  %v3079_v21 = vpop.permute.xlu2 %457 }
  0xbb   :  { %v261_v13 = vpop.permute.xlu0 %260 }
  0xbc   :  { %v279_v16 = vsel %vm5333_vm1, %v269_v63, %v261_v13  ;;  %v275_v17 = vsel %vm5333_vm1, %v261_v13, %v269_v63  ;;  %v127_v63 = vadd.s32 1, %v2927_v26  ;;  %v5460_v26 = vmov 0 }
  0xbd   :  { %2234 = vmatpush.msk.msra.mxu0 %vm3035_vm11, %v279_v16  ;;  %2274 = vmatpush.msk.msra.mxu3 %vm3053_vm12, %v275_v17 }
  0xc2   :  { %v257_v22 = vpop.permute.xlu1 %256  ;;  %v3098_v39 = vpop.permute.xlu2 %455 }
  0xc3   :  { %v267_v23 = vpop.permute.xlu0 %266  ;;  %v277_v36 = vsel %vm5333_vm1, %v265_v51, %v257_v22  ;;  %v273_v37 = vsel %vm5333_vm1, %v257_v22, %v265_v51 }
  0xc4   :  { %v278_v25 = vsel %vm5333_vm1, %v267_v23, %v259_v42  ;;  %v274_v31 = vsel %vm5333_vm1, %v259_v42, %v267_v23  ;;  %vm130_vm1 = vcmp.lt.s32.totalorder %v126_v38, 16 }
  0xc5   :  { %2235 = vmatpush.msk.msra.mxu0 %vm3035_vm11, %v278_v25  ;;  %2275 = vmatpush.msk.msra.mxu3 %vm3053_vm12, %v274_v31  ;;  %vm3109_vm9 = vmand %vm128_vm14, %vm130_vm1  ;;  %vm5345_vm14 = vcmp.lt.s32.totalorder %v2912_v18, 17 }
  0xc6   :  { %v5455_v24 = vsel %vm3109_vm9, 4294967295, %v5454_v24  ;;  %vm3118_vm6 = vmand %vm3109_vm9, %vm5337_vm0  ;;  %vm129_vm0 = vcmp.ge.s32.totalorder %v127_v63, 0  ;;  %v206_v23 = vsel %vm5345_vm14, %v2914_v19, %v2902_v14  ;;  %v202_v31 = vsel %vm5345_vm14, %v2902_v14, %v2914_v19 }
  0xc7   :  { %2236 = vmatpush.msk.msra.mxu0 %vm3035_vm11, %v277_v36  ;;  %2276 = vmatpush.msk.msra.mxu3 %vm3053_vm12, %v273_v37  ;;  %5456 = vst [vmem:[#allocation15_spill] sm:$0xff] %v5455_v24  ;;  %v5458_v44 = vsel %vm3118_vm6, 4294967295, %v5457_v44  ;;  %vm3168_vm1 = vmand %vm3016_vm15, %vm5342_vm4  ;;  %vm131_vm12 = vcmp.lt.s32.totalorder %v127_v63, 16  ;;  %v5465_v36 = vmov 0  ;;  %v205_v37 = vsel %vm5345_vm14, %v2916_v20, %v2892_v11  ;;  %v150_v63 = vld [vmem:[#allocation5] sm:$0xff] }
  0xc8   :  { %5459 = vst [vmem:[#allocation16_spill] sm:$0xff] %v5458_v44  ;;  %v5461_v26 = vsel %vm3168_vm1, 4294967295, %v5460_v26  ;;  %v201_v14 = vsel %vm5345_vm14, %v2892_v11, %v2916_v20  ;;  %v204_v19 = vsel %vm5345_vm14, %v2878_v9, %v2904_v15  ;;  %v5469_v11 = vmov 0 }
  0xc9   :  { %v203_v20 = vsel %vm5345_vm14, %v2870_v8, %v2894_v12  ;;  %vm5472_vm4 = vcmp.lt.s32.totalorder %v2912_v18, 111 }
  0xca   :  { %v234_v40 = vpop.permute.xlu1 %233  ;;  %v3122_v45 = vpop.permute.xlu2 %453 }
  0xcb   :  { %v226_v41 = vpop.permute.xlu0 %225 }
  0xcc   :  { %v243_v42 = vsel %vm5340_vm13, %v234_v40, %v226_v41  ;;  %v239_v43 = vsel %vm5340_vm13, %v226_v41, %v234_v40  ;;  %v200_v40 = vsel %vm5345_vm14, %v2904_v15, %v2878_v9 }
  0xcd   :  { %2237 = vmatpush.msk.msra.mxu0 %vm3016_vm15, %v243_v42  ;;  %2277 = vmatpush.msk.msra.mxu3 %vm3022_vm2, %v239_v43  ;;  %v199_v43 = vsel %vm5345_vm14, %v2894_v12, %v2870_v8 }
  0xd2   :  { %v232_v46 = vpop.permute.xlu1 %231  ;;  %v431_v61 = vpop.permute.xlu2 %430 }
  0xd3   :  { %v468_v47 = vpop.permute.xlu0 %467  ;;  %v242_v48 = vsel %vm5340_vm13, %v232_v46, %v2935_v28  ;;  %v238_v54 = vsel %vm5340_vm13, %v2935_v28, %v232_v46 }
  0xd4   :  { %v473_v51 = vsel %vm5341_vm3, %v3063_v62, %v468_v47  ;;  %2238 = vmatpush.msk.msra.mxu0 %vm3016_vm15, %v242_v48  ;;  %2278 = vmatpush.msk.msra.mxu3 %vm3022_vm2, %v238_v54  ;;  %v477_v46 = vsel %vm5472_vm4, %v468_v47, %v3063_v62 }
  0xd5   :  { %2261 = vmatpush.msk.msra.mxu2 %vm3118_vm6, %v473_v51 }
  0xda   :  { %v230_v55 = vpop.permute.xlu1 %229  ;;  %v419_v25 = vpop.permute.xlu2 %418 }
  0xdb   :  { %v466_v57 = vpop.permute.xlu0 %465  ;;  %v241_v58 = vsel %vm5340_vm13, %v230_v55, %v2937_v29  ;;  %v237_v28 = vsel %vm5340_vm13, %v2937_v29, %v230_v55 }
  0xdc   :  { %v472_v59 = vsel %vm5341_vm3, %v3079_v21, %v466_v57  ;;  %2239 = vmatpush.msk.msra.mxu0 %vm3016_vm15, %v241_v58  ;;  %2279 = vmatpush.msk.msra.mxu3 %vm3022_vm2, %v237_v28 }
  0xdd   :  { %2262 = vmatpush.msk.msra.mxu2 %vm3118_vm6, %v472_v59 }
  0xe2   :  { %v228_v13 = vpop.permute.xlu1 %227  ;;  %v425_v8 = vpop.permute.xlu2 %424 }
  0xe3   :  { %v464_v16 = vpop.permute.xlu0 %463  ;;  %v240_v17 = vsel %vm5340_vm13, %v228_v13, %v2886_v10  ;;  %v236_v22 = vsel %vm5340_vm13, %v2886_v10, %v228_v13  ;;  %vm5462_vm13 = vcmp.ge.s32.totalorder %v2941_v30, 0  ;;  %v5463_v10 = vmov 0  ;;  %v3305_v13 = vld [vmem:[#allocation5 + $0x28] sm:$0xff] }
  0xe4   :  { %v471_v29 = vsel %vm5341_vm3, %v3098_v39, %v464_v16  ;;  %2240 = vmatpush.msk.msra.mxu0 %vm3016_vm15, %v240_v17  ;;  %vm3181_vm3 = vmand %vm3022_vm2, %vm5462_vm13  ;;  %2280 = vmatpush.msk.msra.mxu3 %vm3022_vm2, %v236_v22  ;;  %vm5473_vm2 = vcmp.lt.s32.totalorder %v2912_v18, 112  ;;  %v5487_v17 = vmov 0 }
  0xe5   :  { %2263 = vmatpush.msk.msra.mxu2 %vm3118_vm6, %v471_v29  ;;  %v5464_v10 = vsel %vm3181_vm3, 4294967295, %v5463_v10  ;;  %vm3197_vm13 = vmand %vm129_vm0, %vm131_vm12  ;;  %vm5468_vm0 = vcmp.lt.s32.totalorder %v3014_v50, 16 }
  0xe6   :  { %2241 = vmatpush.msk.msra.mxu0 %vm3168_vm1, %v206_v23  ;;  %v5466_v36 = vsel %vm3197_vm13, 4294967295, %v5465_v36  ;;  %2281 = vmatpush.msk.msra.mxu3 %vm3181_vm3, %v202_v31  ;;  %vm3230_vm12 = vmand %vm3197_vm13, %vm5468_vm0  ;;  %v3338_v31 = vld [vmem:[#allocation5 + $0x40] sm:$0xff] }
  0xe7   :  { %5467 = vst [vmem:[#allocation17_spill] sm:$0xff] %v5466_v36  ;;  %v5470_v11 = vsel %vm3230_vm12, 4294967295, %v5469_v11  ;;  %vm5474_vm0 = vmmov %vm5473_vm2 }
  0xe8   :  { %2242 = vmatpush.msk.msra.mxu0 %vm3168_vm1, %v205_v37  ;;  %2282 = vmatpush.msk.msra.mxu3 %vm3181_vm3, %v201_v14  ;;  %5471 = vst [vmem:[#allocation18_spill] sm:$0xff] %v5470_v11 }
  0xea   :  { %v423_v38 = vpop.permute.xlu1 %422  ;;  %2243 = vmatpush.msk.msra.mxu0 %vm3168_vm1, %v204_v19  ;;  %2283 = vmatpush.msk.msra.mxu3 %vm3181_vm3, %v200_v40 }
  0xeb   :  { %v462_v41 = vpop.permute.xlu0 %461  ;;  %v436_v15 = vsel %vm5473_vm2, %v423_v38, %v431_v61  ;;  %v440_v42 = vsel %vm5474_vm0, %v431_v61, %v423_v38  ;;  %vm5475_vm2 = vmmov %vm5472_vm4 }
  0xec   :  { %v470_v9 = vsel %vm5472_vm4, %v3122_v45, %v462_v41  ;;  %2244 = vmatpush.msk.msra.mxu0 %vm3168_vm1, %v203_v20  ;;  %2284 = vmatpush.msk.msra.mxu3 %vm3181_vm3, %v199_v43  ;;  %v476_v48 = vsel %vm5475_vm2, %v466_v57, %v3079_v21  ;;  %vm5476_vm0 = vmmov %vm5475_vm2  ;;  %vm5478_vm2 = vcmp.lt.s32.totalorder %v2912_v18, 112  ;;  %v156_v20 = vld [vmem:[#allocation5 + $0x30] sm:$0xff] }
  0xed   :  { %2264 = vmatpush.msk.msra.mxu2 %vm3118_vm6, %v470_v9  ;;  %2245 = vmatpush.msk.msra.mxu1 %vm3109_vm9, %v436_v15  ;;  %v475_v12 = vsel %vm5476_vm0, %v464_v16, %v3098_v39  ;;  %vm5477_vm4 = vmmov %vm5476_vm0  ;;  %v3289_v39 = vld [vmem:[#allocation5 + $0x10] sm:$0xff]  ;;  %vm5348_vm0 = vcmask 261120   ;;  %v3354_v9 = vld [vmem:[#allocation5 + $0x58] sm:$0xff] }
  0xee   :  { %2301 = vmatpush.msk.msrb.mxu0 %vm3230_vm12, %v477_v46  ;;  %v474_v21 = vsel %vm5477_vm4, %v462_v41, %v3122_v45  ;;  %vm5479_vm14 = vmmov %vm5478_vm2  ;;  %2265 = vmatmul.msk.f32.vlgmr.msra.gmra.mxu2 %vm5348_vm0, %v3289_v39  ;;  %v384_v45 = vpop.permute.xlu2 %383 }
  0xef   :  { %2285 = vmatpush.msk.msrb.mxu2 %vm3197_vm13, %v440_v42  ;;  %vm5480_vm4 = vmmov %vm5478_vm2  ;;  %519 = vmatmul.f32.vlgmr.msra.gmra.mxu0 %v150_v63 }
  0xf0   :  { %2302 = vmatpush.msk.msrb.mxu0 %vm3230_vm12, %v476_v48  ;;  %606 = vmatmul.f32.vlgmr.msra.gmra.mxu3 %v150_v63 }
  0xf2   :  { %2303 = vmatpush.msk.msrb.mxu0 %vm3230_vm12, %v475_v12  ;;  %v429_v62 = vpop.permute.xlu1 %428  ;;  %v146_v12 = vld [vmem:[%s5331_s3] sm:$0xff] }
  0xf3   :  { %v421_v47 = vpop.permute.xlu0 %420 }
  0xf4   :  { %2304 = vmatpush.msk.msrb.mxu0 %vm3230_vm12, %v474_v21  ;;  %v435_v51 = vsel %vm5478_vm2, %v421_v47, %v429_v62  ;;  %v439_v54 = vsel %vm5479_vm14, %v429_v62, %v421_v47  ;;  %vm5481_vm14 = vmmov %vm5478_vm2  ;;  %v2740_v62 = vmov 0  }
  0xf5   :  { %2246 = vmatpush.msk.msra.mxu1 %vm3109_vm9, %v435_v51  ;;  %2286 = vmatpush.msk.msrb.mxu2 %vm3197_vm13, %v439_v54  ;;  %vm5482_vm12 = vmmov %vm5478_vm2  ;;  %v5496_v51 = vmov 0 }
  0xf6   :  { %2266 = vmatmul.msk.f32.gmra.mxu2 %vm5348_vm0, %v3305_v13  ;;  %2568 = vset.pattern.permute.xlu1 %v2740_v62 }
  0xf7   :  { %2569 = vset.pattern.permute.xlu2 %v2740_v62  ;;  %679 = vperm.xlu1 %2568, %v146_v12  }
  0xf8   :  { %2570 = vset.pattern.permute.xlu0 %v2740_v62 }
  0xfa   :  { %v417_v55 = vpop.permute.xlu1 %416 }
  0xfb   :  { %v427_v57 = vpop.permute.xlu0 %426  ;;  %v433_v28 = vsel %vm5478_vm2, %v417_v55, %v425_v8  ;;  %v437_v61 = vsel %vm5482_vm12, %v425_v8, %v417_v55  ;;  %vm5349_vm12 = vcmp.lt.s32.totalorder %v2912_v18, 113  ;;  %vm5486_vm2 = vcmp.ge.s32.totalorder %v2941_v30, 0  ;;  %v390_v30 = vpop.permute.xlu2 %389  ;;  %v159_v8 = vld [vmem:[#allocation5 + $0x48] sm:$0xff] }
  0xfc   :  { %v434_v58 = vsel %vm5480_vm4, %v419_v25, %v427_v57  ;;  %v438_v59 = vsel %vm5481_vm14, %v427_v57, %v419_v25  ;;  %vm5483_vm4 = vcmp.ge.s32.totalorder %v2933_v27, 0  ;;  %vm3326_vm0 = vmand %vm3197_vm13, %vm5486_vm2  ;;  %v153_v25 = vld [vmem:[#allocation5 + $0x18] sm:$0xff] }
  0xfd   :  { %2247 = vmatpush.msk.msra.mxu1 %vm3109_vm9, %v434_v58  ;;  %2287 = vmatpush.msk.msrb.mxu2 %vm3197_vm13, %v438_v59  ;;  %vm3318_vm14 = vmand %vm3109_vm9, %vm5483_vm4  ;;  %v5488_v17 = vsel %vm3326_vm0, 4294967295, %v5487_v17  ;;  %vm5490_vm4 = vcmask 261120   ;;  %v149_v58 = vld [vmem:[%s5331_s3 + $0x18] sm:$0xff] }
  0xfe   :  { %5489 = vst [vmem:[#allocation19_spill] sm:$0xff] %v5488_v17  ;;  %522 = vmatmul.f32.gmra.mxu0 %v153_v25  ;;  %2267 = vmatmul.msk.f32.gmra.mxu2 %vm5490_vm4, %v3338_v31  ;;  %vm5491_vm2 = vmmov %vm5490_vm4  ;;  %vm5397_vm4 = vcmp.lt.s32.totalorder %v2912_v18, 127 }
  0xff   :  { %2248 = vmatpush.msk.msra.mxu1 %vm3109_vm9, %v433_v28  ;;  %2288 = vmatpush.msk.msrb.mxu2 %vm3197_vm13, %v437_v61 }
 0x100   :  { %609 = vmatmul.f32.gmra.mxu3 %v153_v25  ;;  %694 = vperm.xlu1 %2568, %v149_v58  }
 0x102   :  { %v394_v29 = vpop.permute.xlu1 %393 }
 0x103   :  { %v386_v22 = vpop.permute.xlu0 %385  ;;  %v349_v15 = vpop.permute.xlu2 %348 }
 0x104   :  { %v399_v23 = vsel %vm5349_vm12, %v386_v22, %v394_v29  ;;  %v403_v27 = vsel %vm5349_vm12, %v394_v29, %v386_v22 }
 0x105   :  { %2249 = vmatpush.msk.msra.mxu1 %vm3318_vm14, %v399_v23  ;;  %2289 = vmatpush.msk.msrb.mxu2 %vm3326_vm0, %v403_v27  ;;  %v148_v27 = vld [vmem:[%s5331_s3 + $0x10] sm:$0xff] }
 0x106   :  { %525 = vmatmul.f32.gmra.mxu0 %v156_v20  ;;  %2268 = vmatmul.msk.f32.gmra.mxu2 %vm5491_vm2, %v3354_v9  ;;  %vm5492_vm2 = vcmp.lt.s32.totalorder %v3008_v49, 16 }
 0x107   :  { %689 = vperm.xlu0 %2570, %v148_v27  }
 0x108   :  { %612 = vmatmul.f32.gmra.mxu3 %v156_v20 }
 0x10a   :  { %v382_v37 = vpop.permute.xlu1 %381 }
 0x10b   :  { %v392_v14 = vpop.permute.xlu0 %391  ;;  %v397_v40 = vsel %vm5349_vm12, %v382_v37, %v390_v30  ;;  %v401_v41 = vsel %vm5349_vm12, %v390_v30, %v382_v37  ;;  %v355_v21 = vpop.permute.xlu2 %354  ;;  %v2741_v30 = vmov 1  }
 0x10c   :  { %v398_v19 = vsel %vm5349_vm12, %v384_v45, %v392_v14  ;;  %v402_v38 = vsel %vm5349_vm12, %v392_v14, %v384_v45  ;;  %2572 = vset.pattern.permute.xlu1 %v2741_v30 }
 0x10d   :  { %2250 = vmatpush.msk.msra.mxu1 %vm3318_vm14, %v398_v19  ;;  %2290 = vmatpush.msk.msrb.mxu2 %vm3326_vm0, %v402_v38 }
 0x10e   :  { %528 = vmatmul.f32.gmra.mxu0 %v159_v8 }
 0x10f   :  { %2251 = vmatpush.msk.msra.mxu1 %vm3318_vm14, %v397_v40  ;;  %2291 = vmatpush.msk.msrb.mxu2 %vm3326_vm0, %v401_v41 }
 0x110   :  { %615 = vmatmul.f32.gmra.mxu3 %v159_v8  ;;  %2573 = vset.pattern.permute.xlu0 %v2741_v30 }
 0x111   :  { %718 = vperm.xlu0 %2573, %v149_v58  }
 0x112   :  { %v388_v42 = vpop.permute.xlu1 %387 }
 0x113   :  { %v380_v43 = vpop.permute.xlu0 %379 }
 0x114   :  { %v396_v46 = vsel %vm5349_vm12, %v380_v43, %v388_v42  ;;  %v400_v48 = vsel %vm5349_vm12, %v388_v42, %v380_v43  ;;  %vm3378_vm12 = vmand %vm2948_vm5, %vm5492_vm2 }
 0x115   :  { %2252 = vmatpush.msk.msra.mxu1 %vm3318_vm14, %v396_v46  ;;  %2292 = vmatpush.msk.msrb.mxu2 %vm3326_vm0, %v400_v48  ;;  %vm5495_vm0 = vcmp.lt.s32.totalorder %v3014_v50, 16 }
 0x116   :  { %vm3386_vm13 = vmand %vm2953_vm7, %vm5495_vm0  ;;  %vm5499_vm0 = vcmask 261120  }
 0x117   :  { %v5497_v51 = vsel %vm3386_vm13, 4294967295, %v5496_v51  ;;  %2305 = vmatmul.msk.f32.vlgmr.msrb.gmra.mxu0 %vm5499_vm0, %v3289_v39  ;;  %vm5500_vm2 = vmmov %vm5499_vm0  ;;  %v343_v39 = vpop.permute.xlu2 %342 }
 0x118   :  { %5498 = vst [vmem:[#allocation20_spill] sm:$0xff] %v5497_v51 }
 0x11a   :  { %v347_v54 = vpop.permute.xlu1 %346 }
 0x11b   :  { %v357_v45 = vpop.permute.xlu0 %356  ;;  %v361_v57 = vsel %vm5397_vm4, %v347_v54, %v355_v21  ;;  %v365_v50 = vsel %vm5397_vm4, %v355_v21, %v347_v54 }
 0x11c   :  { %v362_v49 = vsel %vm5397_vm4, %v349_v15, %v357_v45  ;;  %v366_v55 = vsel %vm5397_vm4, %v357_v45, %v349_v15 }
 0x11d   :  { %2253 = vmatpush.msk.msra.mxu1 %vm3378_vm12, %v362_v49  ;;  %2293 = vmatpush.msk.msrb.mxu2 %vm3386_vm13, %v366_v55 }
 0x11f   :  { %2254 = vmatpush.msk.msra.mxu1 %vm3378_vm12, %v361_v57  ;;  %2294 = vmatpush.msk.msrb.mxu2 %vm3386_vm13, %v365_v50 }
 0x120   :  { %2306 = vmatmul.msk.f32.gmra.mxu0 %vm5500_vm2, %v3305_v13  ;;  %v147_v13 = vld [vmem:[%s5331_s3 + $0x8] sm:$0xff]  ;;  %vm5501_vm2 = vmmov %vm5499_vm0 }
 0x121   :  { %684 = vperm.xlu2 %2569, %v147_v13   ;;  %710 = vperm.xlu1 %2572, %v147_v13  }
 0x122   :  { %v353_v59 = vpop.permute.xlu1 %352 }
 0x123   :  { %v345_v28 = vpop.permute.xlu0 %344 }
 0x124   :  { %v360_v61 = vsel %vm5397_vm4, %v345_v28, %v353_v59  ;;  %v364_v63 = vsel %vm5397_vm4, %v353_v59, %v345_v28 }
 0x125   :  { %2255 = vmatpush.msk.msra.mxu1 %vm3378_vm12, %v360_v61  ;;  %2295 = vmatpush.msk.msrb.mxu2 %vm3386_vm13, %v364_v63 }
 0x128   :  { %2307 = vmatmul.msk.f32.gmra.mxu0 %vm5499_vm0, %v3338_v31  ;;  %vm5527_vm0 = vcmp.lt.s32.totalorder %v2912_v18, 1 }
 0x129   :  { %2571 = vset.pattern.permute.xlu2 %v2741_v30 }
 0x12a   :  { %706 = vperm.xlu2 %2571, %v146_v12  }
 0x12b   :  { %v351_v29 = vpop.permute.xlu0 %350 }
 0x12c   :  { %v359_v22 = vsel %vm5397_vm4, %v343_v39, %v351_v29  ;;  %v363_v23 = vsel %vm5397_vm4, %v351_v29, %v343_v39  ;;  %vm5529_vm4 = vmmov %vm5527_vm0 }
 0x12d   :  { %2256 = vmatpush.msk.msra.mxu1 %vm3378_vm12, %v359_v22  ;;  %2296 = vmatpush.msk.msrb.mxu2 %vm3386_vm13, %v363_v23 }
 0x12f   :  { %2257 = vmatpush.msk.msra.mxu1 %vm2948_vm5, %v2794_v3  ;;  %2297 = vmatpush.msk.msrb.mxu2 %vm2953_vm7, %v2806_v6  ;;  %v151_v3 = vld [vmem:[#allocation5 + $0x8] sm:$0xff] }
 0x130   :  { %2308 = vmatmul.msk.f32.gmra.mxu0 %vm5501_vm2, %v3354_v9  ;;  %vm5528_vm2 = vmmov %vm5527_vm0 }
 0x131   :  { %2258 = vmatpush.msk.msra.mxu1 %vm2948_vm5, %v2782_v0  ;;  %2298 = vmatpush.msk.msrb.mxu2 %vm2953_vm7, %v2808_v7  ;;  %v154_v0 = vld [vmem:[#allocation5 + $0x20] sm:$0xff] }
 0x132   :  { %714 = vperm.xlu2 %2571, %v148_v27  }
 0x133   :  { %2259 = vmatpush.msk.msra.mxu1 %vm2948_vm5, %v2796_v4  ;;  %2299 = vmatpush.msk.msrb.mxu2 %vm2953_vm7, %v2798_v5  ;;  %v157_v4 = vld [vmem:[#allocation5 + $0x38] sm:$0xff] }
 0x135   :  { %2260 = vmatpush.msk.msra.mxu1 %vm2948_vm5, %v2784_v1  ;;  %2300 = vmatpush.msk.msrb.mxu2 %vm2953_vm7, %v2790_v2  ;;  %v160_v1 = vld [vmem:[#allocation5 + $0x50] sm:$0xff]  ;;  %vm5530_vm7 = vmmov %vm5527_vm0 }
 0x136   :  { %548 = vmatmul.f32.vlgmr.msra.gmra.mxu1 %v151_v3  ;;  %635 = vmatmul.f32.vlgmr.msrb.gmra.mxu2 %v151_v3 }
 0x13e   :  { %551 = vmatmul.f32.gmra.mxu1 %v154_v0  ;;  %638 = vmatmul.f32.gmra.mxu2 %v154_v0 }
 0x146   :  { %554 = vmatmul.f32.gmra.mxu1 %v157_v4  ;;  %641 = vmatmul.f32.gmra.mxu2 %v157_v4 }
 0x14e   :  { %557 = vmatmul.f32.gmra.mxu1 %v160_v1  ;;  %644 = vmatmul.f32.gmra.mxu2 %v160_v1 }
 0x169   :  { %v3465_v6 = vpop.permute.xlu1 %679 }
 0x16a   :  { %5503 = vst [vmem:[#allocation22_spill] sm:$0xff] %v3465_v6 }
 0x16c   :  { %v520_v5 = vpop.f32.mrf.mxu0 }
 0x171   :  { %v578_v31 = vpop.f32.mrf.mxu2 }
 0x172   :  { %v3473_v15 = vpop.permute.xlu1 %694 }
 0x173   :  { %5506 = vst [vmem:[#allocation25_spill] sm:$0xff] %v3473_v15  ;;  %v607_v22 = vpop.f32.mrf.mxu3 }
 0x179   :  { %v581_v42 = vpop.f32.mrf.mxu2  ;;  %v3499_v55 = vpop.permute.xlu0 %689 }
 0x17a   :  { %5509 = vst [vmem:[#allocation28_spill] sm:$0xff] %v3499_v55 }
 0x17b   :  { %v3463_v2 = vpop.permute.xlu2 %684  ;;  %v523_v40 = vpop.f32.mrf.mxu0 }
 0x17c   :  { %5502 = vst [vmem:[#allocation21_spill] sm:$0xff] %v3463_v2 }
 0x181   :  { %v584_v45 = vpop.f32.mrf.mxu2 }
 0x183   :  { %v526_v62 = vpop.f32.mrf.mxu0  ;;  %v3520_v3 = vpop.permute.xlu0 %718 }
 0x184   :  { %v3468_v19 = vpop.permute.xlu2 %706  ;;  %5512 = vst [vmem:[#allocation31_spill] sm:$0xff] %v3520_v3 }
 0x185   :  { %5504 = vst [vmem:[#allocation23_spill] sm:$0xff] %v3468_v19 }
 0x189   :  { %v587_v50 = vpop.f32.mrf.mxu2 }
 0x18b   :  { %v529_v61 = vpop.f32.mrf.mxu0 }
 0x18c   :  { %v3506_v58 = vpop.permute.xlu2 %714 }
 0x18d   :  { %5510 = vst [vmem:[#allocation29_spill] sm:$0xff] %v3506_v58 }
 0x193   :  { %v3482_v48 = vpop.permute.xlu1 %710 }
 0x194   :  { %5507 = vst [vmem:[#allocation26_spill] sm:$0xff] %v3482_v48  ;;  %v665_v30 = vpop.f32.mrf.mxu0 }
 0x1b3   :  { %v549_v7 = vpop.f32.mrf.mxu1 }
 0x1b4   :  { %v550_v25 = vadd.f32 %v549_v7, %v520_v5 }
 0x1b6   :  { %v579_v37 = vadd.f32 %v578_v31, %v550_v25  ;;  %v610_v31 = vpop.f32.mrf.mxu3 }
 0x1b8   :  { %v697_v14 = vmul.f32 %v3465_v6, %v579_v37 }
 0x1b9   :  { %v636_v23 = vpop.f32.mrf.mxu2 }
 0x1ba   :  { %v721_v38 = vadd.f32 %v3468_v19, %v697_v14  ;;  %v637_v13 = vadd.f32 %v636_v23, %v607_v22 }
 0x1bb   :  { %v552_v41 = vpop.f32.mrf.mxu1 }
 0x1bc   :  { %v3471_v20 = vmax.f32 %v721_v38, 0.0  ;;  %v553_v9 = vadd.f32 %v552_v41, %v523_v40  ;;  %v666_v0 = vadd.f32 %v665_v30, %v637_v13  ;;  %v668_v38 = vpop.f32.mrf.mxu0 }
 0x1be   :  { %5505 = vst [vmem:[#allocation24_spill] sm:$0xff] %v3471_v20  ;;  %937 = vrot.lane.b32.xlu2 %v3471_v20, %s2737_s9  ;;  %801 = vrot.lane.b32.xlu0 %v3471_v20, %s2735_s7  ;;  %v582_v43 = vadd.f32 %v581_v42, %v553_v9  ;;  %v698_v1 = vmul.f32 %v3465_v6, %v666_v0  ;;  %v3719_v6 = vld [vmem:[#allocation2 + $0x50] sm:$0xff] }
 0x1bf   :  { %737 = vrot.lane.b32.xlu1 %v3471_v20, %s2733_s6 }
 0x1c0   :  { %v699_v46 = vmul.f32 %v3463_v2, %v582_v43  ;;  %v722_v7 = vadd.f32 %v3468_v19, %v698_v1  ;;  %v613_v43 = vpop.f32.mrf.mxu3  ;;  %v3717_v19 = vld [vmem:[#allocation2 + $0x58] sm:$0xff] }
 0x1c1   :  { %v639_v37 = vpop.f32.mrf.mxu2 }
 0x1c2   :  { %v723_v8 = vadd.f32 %v3482_v48, %v699_v46  ;;  %v3539_v25 = vmax.f32 %v722_v7, 0.0  ;;  %v640_v14 = vadd.f32 %v639_v37, %v610_v31 }
 0x1c3   :  { %v555_v12 = vpop.f32.mrf.mxu1 }
 0x1c4   :  { %v3491_v21 = vmax.f32 %v723_v8, 0.0  ;;  %v556_v54 = vadd.f32 %v555_v12, %v526_v62  ;;  %5514 = vst [vmem:[#allocation33_spill] sm:$0xff] %v3539_v25  ;;  %v669_v40 = vadd.f32 %v668_v38, %v640_v14  ;;  %v671_v12 = vpop.f32.mrf.mxu0 }
 0x1c6   :  { %873 = vrot.lane.b32.xlu2 %v3471_v20, %s2739_s11  ;;  %905 = vrot.lane.b32.xlu0 %v3471_v20, %s2738_s10  ;;  %5508 = vst [vmem:[#allocation27_spill] sm:$0xff] %v3491_v21  ;;  %v585_v49 = vadd.f32 %v584_v45, %v556_v54  ;;  %v700_v41 = vmul.f32 %v3463_v2, %v669_v40 }
 0x1c7   :  { %769 = vrot.lane.b32.xlu1 %v3471_v20, %s2731_s28 }
 0x1c8   :  { %v701_v57 = vmul.f32 %v3499_v55, %v585_v49  ;;  %v724_v9 = vadd.f32 %v3482_v48, %v700_v41 }
 0x1c9   :  { %v642_v46 = vpop.f32.mrf.mxu2 }
 0x1ca   :  { %v725_v59 = vadd.f32 %v3506_v58, %v701_v57  ;;  %v3561_v42 = vmax.f32 %v724_v9, 0.0  ;;  %v643_v8 = vadd.f32 %v642_v46, %v613_v43 }
 0x1cb   :  { %v558_v28 = vpop.f32.mrf.mxu1 }
 0x1cc   :  { %v3511_v63 = vmax.f32 %v725_v59, 0.0  ;;  %v559_v39 = vadd.f32 %v558_v28, %v529_v61  ;;  %5515 = vst [vmem:[#allocation34_spill] sm:$0xff] %v3561_v42  ;;  %v672_v62 = vadd.f32 %v671_v12, %v643_v8 }
 0x1ce   :  { %939 = vrot.lane.b32.xlu0 %v3491_v21, %s2737_s9  ;;  %739 = vrot.lane.b32.xlu2 %v3491_v21, %s2733_s6  ;;  %5511 = vst [vmem:[#allocation30_spill] sm:$0xff] %v3511_v63  ;;  %v588_v29 = vadd.f32 %v587_v50, %v559_v39  ;;  %v702_v45 = vmul.f32 %v3499_v55, %v672_v62  ;;  %v616_v50 = vpop.f32.mrf.mxu3  ;;  %v674_v39 = vpop.f32.mrf.mxu0 }
 0x1cf   :  { %833 = vrot.lane.b32.xlu1 %v3471_v20, %s2734_s2 }
 0x1d0   :  { %v703_v27 = vmul.f32 %v3473_v15, %v588_v29  ;;  %v726_v49 = vadd.f32 %v3506_v58, %v702_v45  ;;  %v3705_v58 = vld [vmem:[#allocation2 + $0x78] sm:$0xff] }
 0x1d1   :  { %v645_v59 = vpop.f32.mrf.mxu2 }
 0x1d2   :  { %v727_v4 = vadd.f32 %v3520_v3, %v703_v27  ;;  %v3587_v28 = vmax.f32 %v726_v49, 0.0  ;;  %v646_v61 = vadd.f32 %v645_v59, %v616_v50  ;;  %v3673_v49 = vld [vmem:[#allocation2 + $0x70] sm:$0xff] }
 0x1d4   :  { %v3530_v5 = vmax.f32 %v727_v4, 0.0  ;;  %5517 = vst [vmem:[#allocation36_spill] sm:$0xff] %v3587_v28  ;;  %v675_v29 = vadd.f32 %v674_v39, %v646_v61  ;;  %v3687_v39 = vld [vmem:[#allocation2 + $0x68] sm:$0xff] }
 0x1d6   :  { %835 = vrot.lane.b32.xlu0 %v3491_v21, %s2734_s2  ;;  %771 = vrot.lane.b32.xlu2 %v3491_v21, %s2731_s28  ;;  %5513 = vst [vmem:[#allocation32_spill] sm:$0xff] %v3530_v5  ;;  %v704_v23 = vmul.f32 %v3473_v15, %v675_v29  ;;  %v3703_v15 = vld [vmem:[#allocation2 + $0x60] sm:$0xff] }
 0x1d7   :  { %803 = vrot.lane.b32.xlu1 %v3491_v21, %s2735_s7 }
 0x1d8   :  { %v728_v13 = vadd.f32 %v3520_v3, %v704_v23  ;;  %v3701_v3 = vld [vmem:[#allocation2 + $0x40] sm:$0xff] }
 0x1da   :  { %v3611_v4 = vmax.f32 %v728_v13, 0.0 }
 0x1dc   :  { %5519 = vst [vmem:[#allocation38_spill] sm:$0xff] %v3611_v4 }
 0x1de   :  { %773 = vrot.lane.b32.xlu0 %v3511_v63, %s2731_s28  ;;  %907 = vrot.lane.b32.xlu2 %v3491_v21, %s2738_s10 }
 0x1df   :  { %741 = vrot.lane.b32.xlu1 %v3511_v63, %s2733_s6 }
 0x1e6   :  { %805 = vrot.lane.b32.xlu0 %v3511_v63, %s2735_s7  ;;  %875 = vrot.lane.b32.xlu2 %v3491_v21, %s2739_s11 }
 0x1e7   :  { %941 = vrot.lane.b32.xlu1 %v3511_v63, %s2737_s9 }
 0x1ee   :  { %911 = vrot.lane.b32.xlu0 %v3530_v5, %s2738_s10  ;;  %837 = vrot.lane.b32.xlu2 %v3511_v63, %s2734_s2 }
 0x1ef   :  { %909 = vrot.lane.b32.xlu1 %v3511_v63, %s2738_s10 }
 0x1f6   :  { %745 = vrot.lane.b32.xlu0 %v3539_v25, %s2733_s6  ;;  %877 = vrot.lane.b32.xlu2 %v3511_v63, %s2739_s11 }
 0x1f7   :  { %775 = vrot.lane.b32.xlu1 %v3530_v5, %s2731_s28 }
 0x1fe   :  { %945 = vrot.lane.b32.xlu0 %v3539_v25, %s2737_s9  ;;  %743 = vrot.lane.b32.xlu2 %v3530_v5, %s2733_s6 }
 0x1ff   :  { %839 = vrot.lane.b32.xlu1 %v3530_v5, %s2734_s2 }
 0x206   :  { %881 = vrot.lane.b32.xlu0 %v3539_v25, %s2739_s11  ;;  %943 = vrot.lane.b32.xlu2 %v3530_v5, %s2737_s9 }
 0x207   :  { %879 = vrot.lane.b32.xlu1 %v3530_v5, %s2739_s11 }
 0x20e   :  { %779 = vrot.lane.b32.xlu0 %v3561_v42, %s2731_s28  ;;  %807 = vrot.lane.b32.xlu2 %v3530_v5, %s2735_s7 }
 0x20f   :  { %975 = vrot.lane.b32.xlu1 %v3530_v5, %s2736_s8 }
 0x216   :  { %915 = vrot.lane.b32.xlu0 %v3561_v42, %s2738_s10  ;;  %777 = vrot.lane.b32.xlu2 %v3539_v25, %s2731_s28 }
 0x217   :  { %913 = vrot.lane.b32.xlu1 %v3539_v25, %s2738_s10 }
 0x218   :  { %v3575_v54 = vpop.permute.xlu2 %937 }
 0x21e   :  { %883 = vrot.lane.b32.xlu0 %v3561_v42, %s2739_s11  ;;  %841 = vrot.lane.b32.xlu2 %v3539_v25, %s2734_s2 }
 0x21f   :  { %809 = vrot.lane.b32.xlu1 %v3539_v25, %s2735_s7 }
 0x220   :  { %v3585_v57 = vpop.permute.xlu2 %873 }
 0x221   :  { %5516 = vst [vmem:[#allocation35_spill] sm:$0xff] %v3585_v57 }
 0x226   :  { %845 = vrot.lane.b32.xlu0 %v3587_v28, %s2734_s2  ;;  %749 = vrot.lane.b32.xlu2 %v3587_v28, %s2733_s6 }
 0x227   :  { %747 = vrot.lane.b32.xlu1 %v3561_v42, %s2733_s6 }
 0x228   :  { %v3595_v22 = vpop.permute.xlu2 %739 }
 0x22e   :  { %885 = vrot.lane.b32.xlu0 %v3587_v28, %s2739_s11  ;;  %949 = vrot.lane.b32.xlu2 %v3587_v28, %s2737_s9 }
 0x22f   :  { %947 = vrot.lane.b32.xlu1 %v3561_v42, %s2737_s9 }
 0x230   :  { %v3605_v27 = vpop.permute.xlu0 %801  ;;  %v3607_v30 = vpop.permute.xlu2 %771 }
 0x231   :  { %v3609_v0 = vpop.permute.xlu1 %737 }
 0x232   :  { %5518 = vst [vmem:[#allocation37_spill] sm:$0xff] %v3609_v0 }
 0x236   :  { %751 = vrot.lane.b32.xlu0 %v3611_v4, %s2733_s6  ;;  %917 = vrot.lane.b32.xlu2 %v3587_v28, %s2738_s10 }
 0x237   :  { %843 = vrot.lane.b32.xlu1 %v3561_v42, %s2734_s2 }
 0x238   :  { %v3619_v1 = vpop.permute.xlu0 %905  ;;  %v3621_v7 = vpop.permute.xlu2 %907 }
 0x239   :  { %v3623_v31 = vpop.permute.xlu1 %769 }
 0x23e   :  { %951 = vrot.lane.b32.xlu0 %v3611_v4, %s2737_s9  ;;  %783 = vrot.lane.b32.xlu2 %v3611_v4, %s2731_s28 }
 0x23f   :  { %811 = vrot.lane.b32.xlu1 %v3561_v42, %s2735_s7 }
 0x240   :  { %v3631_v37 = vpop.permute.xlu0 %939  ;;  %v3633_v14 = vpop.permute.xlu2 %875 }
 0x241   :  { %5520 = vst [vmem:[#allocation39_spill] sm:$0xff] %v3633_v14  ;;  %v3635_v38 = vpop.permute.xlu1 %833 }
 0x246   :  { %815 = vrot.lane.b32.xlu0 %v3611_v4, %s2735_s7  ;;  %847 = vrot.lane.b32.xlu2 %v3611_v4, %s2734_s2 }
 0x247   :  { %781 = vrot.lane.b32.xlu1 %v3587_v28, %s2731_s28 }
 0x248   :  { %v3643_v40 = vpop.permute.xlu0 %835  ;;  %v3645_v41 = vpop.permute.xlu2 %837 }
 0x249   :  { %v3647_v9 = vpop.permute.xlu1 %803 }
 0x24e   :  { %973 = vrot.lane.b32.xlu0 %v3511_v63, %s2736_s8  ;;  %887 = vrot.lane.b32.xlu2 %v3611_v4, %s2739_s11 }
 0x24f   :  { %813 = vrot.lane.b32.xlu1 %v3587_v28, %s2735_s7 }
 0x250   :  { %v3655_v43 = vpop.permute.xlu0 %773  ;;  %v3657_v46 = vpop.permute.xlu2 %877 }
 0x251   :  { %5521 = vst [vmem:[#allocation40_spill] sm:$0xff] %v3657_v46  ;;  %v3659_v8 = vpop.permute.xlu1 %741 }
 0x256   :  { %979 = vrot.lane.b32.xlu0 %v3561_v42, %s2736_s8  ;;  %983 = vrot.lane.b32.xlu2 %v3611_v4, %s2736_s8 }
 0x257   :  { %919 = vrot.lane.b32.xlu1 %v3611_v4, %s2738_s10 }
 0x258   :  { %v3667_v12 = vpop.permute.xlu0 %805  ;;  %v3669_v62 = vpop.permute.xlu2 %743 }
 0x259   :  { %v3671_v45 = vpop.permute.xlu1 %941 }
 0x25e   :  { %971 = vrot.lane.b32.xlu2 %v3491_v21, %s2736_s8  ;;  %1370 = vrot.lane.b32.xlu0 %v3673_v49, %s2734_s2 }
 0x25f   :  { %981 = vrot.lane.b32.xlu1 %v3587_v28, %s2736_s8 }
 0x260   :  { %v3681_v50 = vpop.permute.xlu0 %911  ;;  %v3683_v59 = vpop.permute.xlu2 %943 }
 0x261   :  { %v3685_v61 = vpop.permute.xlu1 %909 }
 0x266   :  { %977 = vrot.lane.b32.xlu2 %v3539_v25, %s2736_s8  ;;  %1376 = vrot.lane.b32.xlu0 %v3687_v39, %s2734_s2 }
 0x267   :  { %969 = vrot.lane.b32.xlu1 %v3471_v20, %s2736_s8 }
 0x268   :  { %v3695_v29 = vpop.permute.xlu0 %745  ;;  %v3697_v23 = vpop.permute.xlu2 %807 }
 0x269   :  { %5522 = vst [vmem:[#allocation41_spill] sm:$0xff] %v3695_v29  ;;  %v3699_v13 = vpop.permute.xlu1 %775 }
 0x26e   :  { %1364 = vrot.lane.b32.xlu0 %v3701_v3, %s2734_s2  ;;  %1368 = vrot.lane.b32.xlu2 %v3703_v15, %s2734_s2 }
 0x26f   :  { %1378 = vrot.lane.b32.xlu1 %v3705_v58, %s2734_s2 }
 0x270   :  { %v3713_v55 = vpop.permute.xlu0 %945  ;;  %v3715_v48 = vpop.permute.xlu2 %777 }
 0x271   :  { %v840_v2 = vpop.permute.xlu1 %839 }
 0x276   :  { %1346 = vrot.lane.b32.xlu0 %v3705_v58, %s2735_s7  ;;  %1374 = vrot.lane.b32.xlu2 %v3717_v19, %s2734_s2 }
 0x277   :  { %1366 = vrot.lane.b32.xlu1 %v3719_v6, %s2734_s2 }
 0x278   :  { %v3727_v25 = vpop.permute.xlu0 %881  ;;  %v842_v42 = vpop.permute.xlu2 %841 }
 0x279   :  { %5523 = vst [vmem:[#allocation42_spill] sm:$0xff] %v3727_v25  ;;  %v3729_v28 = vpop.permute.xlu1 %879 }
 0x27e   :  { %1336 = vrot.lane.b32.xlu0 %v3703_v15, %s2735_s7  ;;  %1338 = vrot.lane.b32.xlu2 %v3673_v49, %s2735_s7 }
 0x27f   :  { %1372 = vrot.lane.b32.xlu1 %v3731_v33, %s2734_s2 }
 0x280   :  { %v3739_v4 = vpop.permute.xlu0 %779  ;;  %v3741_v51 = vpop.permute.xlu2 %749 }
 0x281   :  { %v3743_v11 = vpop.permute.xlu1 %975 }
 0x286   :  { %1480 = vrot.lane.b32.xlu0 %v3687_v39, %s2737_s9  ;;  %1482 = vrot.lane.b32.xlu2 %v3705_v58, %s2737_s9 }
 0x287   :  { %1474 = vrot.lane.b32.xlu1 %v3673_v49, %s2737_s9 }
 0x288   :  { %v3751_v20 = vpop.permute.xlu0 %915  ;;  %v3753_v17 = vpop.permute.xlu2 %949 }
 0x289   :  { %v3755_v21 = vpop.permute.xlu1 %913 }
 0x28e   :  { %1470 = vrot.lane.b32.xlu0 %v3719_v6, %s2737_s9  ;;  %1472 = vrot.lane.b32.xlu2 %v3703_v15, %s2737_s9 }
 0x28f   :  { %1344 = vrot.lane.b32.xlu1 %v3687_v39, %s2735_s7 }
 0x290   :  { %v3763_v63 = vpop.permute.xlu0 %883  ;;  %v3765_v32 = vpop.permute.xlu2 %917 }
 0x291   :  { %5524 = vst [vmem:[#allocation43_spill] sm:$0xff] %v3763_v63  ;;  %v3767_v5 = vpop.permute.xlu1 %809 }
 0x296   :  { %1340 = vrot.lane.b32.xlu0 %v3731_v33, %s2735_s7  ;;  %1342 = vrot.lane.b32.xlu2 %v3717_v19, %s2735_s7 }
 0x297   :  { %1334 = vrot.lane.b32.xlu1 %v3719_v6, %s2735_s7 }
 0x298   :  { %v846_v57 = vpop.permute.xlu0 %845  ;;  %v3775_v25 = vpop.permute.xlu2 %783 }
 0x299   :  { %v3777_v36 = vpop.permute.xlu1 %747 }
 0x29a   :  { %5525 = vst [vmem:[#allocation44_spill] sm:$0xff] %v3777_v36  ;;  %v855_v36 = vsel %vm5529_vm4, %v846_v57, %v3645_v41  ;;  %vm5532_vm4 = vmmov %vm5527_vm0 }
 0x29e   :  { %1306 = vrot.lane.b32.xlu0 %v3673_v49, %s2731_s28  ;;  %1332 = vrot.lane.b32.xlu2 %v3701_v3, %s2735_s7 }
 0x29f   :  { %1478 = vrot.lane.b32.xlu1 %v3717_v19, %s2737_s9 }
 0x2a0   :  { %v3785_v14 = vpop.permute.xlu0 %885  ;;  %v848_v63 = vpop.permute.xlu2 %847 }
 0x2a1   :  { %5526 = vst [vmem:[#allocation45_spill] sm:$0xff] %v3785_v14  ;;  %v852_v29 = vsel %vm5527_vm0, %v840_v2, %v848_v63  ;;  %v3789_v0 = vpop.permute.xlu1 %947  ;;  %v856_v46 = vsel %vm5528_vm2, %v848_v63, %v840_v2  ;;  %v851_v14 = vsel %vm5530_vm7, %v3645_v41, %v846_v57  ;;  %vm5531_vm7 = vmmov %vm5527_vm0  ;;  %v853_v41 = vsel %vm5527_vm0, %v842_v42, %v3635_v38 }
 0x2a2   :  { %2309 = vmatpush.msk.msrb.mxu1 %vm2965_vm8, %v856_v46  ;;  %2349 = vmatpush.msk.msra.mxu0 %vm2974_vm10, %v852_v29  ;;  %vm5533_vm2 = vmmov %vm5527_vm0 }
 0x2a3   :  { %v849_v46 = vsel %vm5533_vm2, %v3635_v38, %v842_v42 }
 0x2a4   :  { %2310 = vmatpush.msk.msrb.mxu1 %vm2965_vm8, %v855_v36  ;;  %2350 = vmatpush.msk.msra.mxu0 %vm2974_vm10, %v851_v14 }
 0x2a6   :  { %1450 = vrot.lane.b32.xlu0 %v3705_v58, %s2738_s10  ;;  %1476 = vrot.lane.b32.xlu2 %v3731_v33, %s2737_s9 }
 0x2a7   :  { %1468 = vrot.lane.b32.xlu1 %v3701_v3, %s2737_s9 }
 0x2a8   :  { %v3813_v2 = vpop.permute.xlu0 %751  ;;  %v3815_v63 = vpop.permute.xlu2 %887 }
 0x2a9   :  { %v844_v57 = vpop.permute.xlu1 %843 }
 0x2aa   :  { %v854_v36 = vsel %vm5531_vm7, %v844_v57, %v3643_v40  ;;  %v850_v14 = vsel %vm5532_vm4, %v3643_v40, %v844_v57  ;;  %vm5534_vm7 = vcmp.lt.s32.totalorder %v2912_v18, 111  ;;  %vm5535_vm4 = vcmp.lt.s32.totalorder %v2912_v18, 112 }
 0x2ab   :  { %2311 = vmatpush.msk.msrb.mxu1 %vm2965_vm8, %v854_v36  ;;  %2351 = vmatpush.msk.msra.mxu0 %vm2974_vm10, %v850_v14  ;;  %vm5536_vm0 = vmmov %vm5535_vm4 }
 0x2ac   :  { %v955_v36 = vsel %vm5536_vm0, %v3671_v45, %v3753_v17  ;;  %vm5537_vm2 = vmmov %vm5536_vm0 }
 0x2ad   :  { %2312 = vmatpush.msk.msrb.mxu1 %vm2965_vm8, %v853_v41  ;;  %2352 = vmatpush.msk.msra.mxu0 %vm2974_vm10, %v849_v46  ;;  %v954_v14 = vsel %vm5537_vm2, %v3631_v37, %v3789_v0  ;;  %vm5541_vm2 = vnez %v5453_v60 }
 0x2ae   :  { %1440 = vrot.lane.b32.xlu0 %v3703_v15, %s2738_s10  ;;  %1442 = vrot.lane.b32.xlu2 %v3673_v49, %s2738_s10 }
 0x2af   :  { %1314 = vrot.lane.b32.xlu1 %v3705_v58, %s2731_s28 }
 0x2b0   :  { %v3843_v40 = vpop.permute.xlu0 %951  ;;  %v3845_v29 = vpop.permute.xlu2 %983 }
 0x2b1   :  { %v988_v42 = vsel %vm5534_vm7, %v3743_v11, %v3845_v29  ;;  %v812_v38 = vpop.permute.xlu1 %811  ;;  %v956_v57 = vsel %vm5535_vm4, %v3683_v59, %v3843_v40  ;;  %vm5538_vm7 = vmmov %vm5536_vm0  ;;  %vm5539_vm4 = vcmp.lt.s32.totalorder %v2912_v18, 15 }
 0x2b2   :  { %2325 = vmatpush.msk.msrb.mxu3 %vm3109_vm9, %v956_v57  ;;  %2341 = vmatpush.msk.msra.mxu2 %vm3118_vm6, %v988_v42  ;;  %v953_v41 = vsel %vm5538_vm7, %v3575_v54, %v3713_v55  ;;  %vm5540_vm0 = vmmov %vm5539_vm4 }
 0x2b3   :  { %vm5542_vm7 = vmmov %vm5540_vm0 }
 0x2b4   :  { %2326 = vmatpush.msk.msrb.mxu3 %vm3109_vm9, %v955_v36 }
 0x2b6   :  { %2327 = vmatpush.msk.msrb.mxu3 %vm3109_vm9, %v954_v14  ;;  %1310 = vrot.lane.b32.xlu0 %v3717_v19, %s2731_s28 }
 0x2b7   :  { %1304 = vrot.lane.b32.xlu1 %v3703_v15, %s2731_s28  ;;  %1312 = vrot.lane.b32.xlu2 %v3687_v39, %s2731_s28 }
 0x2b8   :  { %v816_v46 = vpop.permute.xlu0 %815  ;;  %v3881_v42 = vpop.permute.xlu2 %971  ;;  %2328 = vmatpush.msk.msrb.mxu3 %vm3109_vm9, %v953_v41  ;;  %vm5544_vm9 = vmmov %vm5540_vm0 }
 0x2b9   :  { %v820_v57 = vsel %vm5539_vm4, %v3697_v23, %v816_v46  ;;  %v782_v36 = vpop.permute.xlu1 %781  ;;  %v824_v14 = vsel %vm5540_vm0, %v816_v46, %v3697_v23  ;;  %vm5543_vm4 = vmmov %vm5540_vm0  ;;  %v818_v35 = vsel %vm5544_vm9, %v3647_v9, %v812_v38 }
 0x2ba   :  { %2313 = vmatpush.msk.msrb.mxu1 %vm3035_vm11, %v824_v14  ;;  %2353 = vmatpush.msk.msra.mxu0 %vm5541_vm2, %v820_v57  ;;  %v822_v14 = vsel %vm5540_vm0, %v812_v38, %v3647_v9  ;;  %vm5546_vm9 = vmmov %vm5540_vm0 }
 0x2bb   :  { %v817_v9 = vsel %vm5546_vm9, %v3605_v27, %v3767_v5 }
 0x2be   :  { %1300 = vrot.lane.b32.xlu0 %v3701_v3, %s2731_s28 }
 0x2bf   :  { %1448 = vrot.lane.b32.xlu1 %v3687_v39, %s2738_s10  ;;  %1302 = vrot.lane.b32.xlu2 %v3719_v6, %s2731_s28 }
 0x2c0   :  { %v3901_v41 = vpop.permute.xlu0 %973  ;;  %v3903_v24 = vpop.permute.xlu2 %977 }
 0x2c1   :  { %v814_v23 = vpop.permute.xlu1 %813 }
 0x2c2   :  { %v823_v46 = vsel %vm5542_vm7, %v814_v23, %v3667_v12  ;;  %v819_v57 = vsel %vm5543_vm4, %v3667_v12, %v814_v23  ;;  %vm5545_vm7 = vmmov %vm5540_vm0  ;;  %vm5547_vm4 = vcmp.lt.s32.totalorder %v2912_v18, 16 }
 0x2c3   :  { %2314 = vmatpush.msk.msrb.mxu1 %vm3035_vm11, %v823_v46  ;;  %2354 = vmatpush.msk.msra.mxu0 %vm5541_vm2, %v819_v57  ;;  %v821_v12 = vsel %vm5545_vm7, %v3767_v5, %v3605_v27  ;;  %v792_v38 = vsel %vm5547_vm4, %v3775_v25, %v3699_v13  ;;  %vm5548_vm0 = vmmov %vm5547_vm4  ;;  %vm5549_vm7 = vnez %v5449_v53  ;;  %vm5551_vm4 = vcmp.lt.s32.totalorder %v2912_v18, 113 }
 0x2c4   :  { %v788_v5 = vsel %vm5548_vm0, %v3699_v13, %v3775_v25  ;;  %vm5550_vm9 = vmmov %vm5548_vm0  ;;  %v787_v25 = vsel %vm5548_vm0, %v3655_v43, %v782_v36 }
 0x2c5   :  { %2315 = vmatpush.msk.msrb.mxu1 %vm3035_vm11, %v822_v14  ;;  %2355 = vmatpush.msk.msra.mxu0 %vm5541_vm2, %v818_v35  ;;  %v791_v46 = vsel %vm5550_vm9, %v782_v36, %v3655_v43  ;;  %vm5552_vm9 = vmmov %vm5548_vm0  ;;  %v923_v14 = vsel %vm5551_vm4, %v3685_v61, %v3765_v32  ;;  %v786_v43 = vsel %vm5548_vm0, %v3607_v30, %v3739_v4 }
 0x2c6   :  { %1444 = vrot.lane.b32.xlu0 %v3731_v33, %s2738_s10  ;;  %v790_v13 = vsel %vm5552_vm9, %v3739_v4, %v3607_v30  ;;  %vm5553_vm9 = vmmov %vm5548_vm0  ;;  %v922_v30 = vsel %vm5551_vm4, %v3621_v7, %v3751_v20  ;;  %v785_v4 = vsel %vm5548_vm0, %v3623_v31, %v3715_v48 }
 0x2c7   :  { %1438 = vrot.lane.b32.xlu1 %v3719_v6, %s2738_s10  ;;  %2316 = vmatpush.msk.msrb.mxu1 %vm3035_vm11, %v821_v12  ;;  %v789_v36 = vsel %vm5553_vm9, %v3715_v48, %v3623_v31  ;;  %vm5554_vm9 = vcmp.lt.s32.totalorder %v2912_v18, 17  ;;  %v921_v48 = vsel %vm5551_vm4, %v3619_v1, %v3755_v21 }
 0x2c8   :  { %2356 = vmatpush.msk.msra.mxu0 %vm5541_vm2, %v817_v9  ;;  %v3941_v35 = vpop.permute.xlu0 %979  ;;  %1446 = vrot.lane.b32.xlu2 %v3717_v19, %s2738_s10  ;;  %v3949_v23 = vpop.permute.xlu2 %1368  ;;  %v760_v12 = vsel %vm5554_vm9, %v3813_v2, %v3669_v62  ;;  %vm5555_vm0 = vmmov %vm5554_vm9  ;;  %vm5556_vm9 = vcmp.lt.s32.totalorder %v2912_v18, 111 }
 0x2c9   :  { %2317 = vmatpush.msk.msrb.mxu1 %vm3016_vm15, %v792_v38  ;;  %v3957_v27 = vpop.permute.xlu1 %919  ;;  %v756_v31 = vsel %vm5555_vm0, %v3669_v62, %v3813_v2 }
 0x2ca   :  { %2357 = vmatpush.msk.msra.mxu0 %vm5549_vm7, %v788_v5  ;;  %v924_v57 = vsel %vm5551_vm4, %v3681_v50, %v3957_v27  ;;  %vm5557_vm4 = vmmov %vm5555_vm0  ;;  %vm5558_vm0 = vcmp.lt.s32.totalorder %v2912_v18, 127 }
 0x2cb   :  { %2318 = vmatpush.msk.msrb.mxu1 %vm3016_vm15, %v791_v46  ;;  %2329 = vmatpush.msk.msrb.mxu3 %vm3318_vm14, %v924_v57  ;;  %v759_v62 = vsel %vm5557_vm4, %v3741_v51, %v3659_v8  ;;  %v892_v2 = vsel %vm5558_vm0, %v3729_v28, %v3815_v63 }
 0x2cc   :  { %2358 = vmatpush.msk.msra.mxu0 %vm5549_vm7, %v787_v25 }
 0x2cd   :  { %2319 = vmatpush.msk.msrb.mxu1 %vm3016_vm15, %v790_v13  ;;  %2330 = vmatpush.msk.msrb.mxu3 %vm3318_vm14, %v923_v14  ;;  %v5561_v13 = vld [vmem:[#allocation44_spill] sm:$0xff] }
 0x2ce   :  { %2359 = vmatpush.msk.msra.mxu0 %vm5549_vm7, %v786_v43  ;;  %1410 = vrot.lane.b32.xlu0 %v3673_v49, %s2739_s11 }
 0x2cf   :  { %1308 = vrot.lane.b32.xlu1 %v3731_v33, %s2731_s28  ;;  %2320 = vmatpush.msk.msrb.mxu1 %vm3016_vm15, %v789_v36 }
 0x2d0   :  { %2331 = vmatpush.msk.msrb.mxu3 %vm3318_vm14, %v922_v30  ;;  %2360 = vmatpush.msk.msra.mxu0 %vm5549_vm7, %v785_v4  ;;  %v4021_v9 = vpop.permute.xlu0 %1370  ;;  %v4023_v38 = vpop.permute.xlu2 %1374  ;;  %v5567_v30 = vld [vmem:[#allocation37_spill] sm:$0xff] }
 0x2d1   :  { %2321 = vmatpush.msk.msrb.mxu1 %vm3168_vm1, %v760_v12  ;;  %v4035_v5 = vpop.permute.xlu1 %981  ;;  %1436 = vrot.lane.b32.xlu2 %v3701_v3, %s2738_s10  ;;  %v5568_v4 = vld [vmem:[#allocation41_spill] sm:$0xff] }
 0x2d2   :  { %2332 = vmatpush.msk.msrb.mxu3 %vm3318_vm14, %v921_v48  ;;  %2361 = vmatpush.msk.msra.mxu0 %vm3181_vm3, %v756_v31  ;;  %v987_v46 = vsel %vm5556_vm9, %v3901_v41, %v4035_v5  ;;  %vm5559_vm9 = vmmov %vm5557_vm4  ;;  %vm5560_vm4 = vcmp.lt.s32.totalorder %v2912_v18, 111  ;;  %v5569_v48 = vld [vmem:[#allocation43_spill] sm:$0xff] }
 0x2d3   :  { %2322 = vmatpush.msk.msrb.mxu1 %vm3168_vm1, %v759_v62  ;;  %2342 = vmatpush.msk.msra.mxu2 %vm3118_vm6, %v987_v46  ;;  %v755_v57 = vsel %vm5559_vm9, %v3659_v8, %v3741_v51  ;;  %v986_v25 = vsel %vm5560_vm4, %v3881_v42, %v3941_v35  ;;  %vm5562_vm0 = vmmov %vm5559_vm9  ;;  %v5563_v51 = vld [vmem:[#allocation45_spill] sm:$0xff]  ;;  %v5564_v8 = vld [vmem:[#allocation40_spill] sm:$0xff]  ;;  %vm5565_vm9 = vcmp.lt.s32.totalorder %v2912_v18, 127 }
 0x2d4   :  { %2333 = vmatpush.msk.msrb.mxu3 %vm3378_vm12, %v892_v2  ;;  %2362 = vmatpush.msk.msra.mxu0 %vm3181_vm3, %v755_v57  ;;  %v758_v14 = vsel %vm5562_vm0, %v5561_v13, %v3595_v22  ;;  %v891_v43 = vsel %vm5565_vm9, %v5564_v8, %v5563_v51  ;;  %vm5566_vm4 = vmmov %vm5562_vm0  ;;  %v757_v12 = vsel %vm5562_vm0, %v5568_v4, %v5567_v30  ;;  %v5570_v31 = vld [vmem:[#allocation39_spill] sm:$0xff] }
 0x2d5   :  { %2323 = vmatpush.msk.msrb.mxu1 %vm3168_vm1, %v758_v14  ;;  %2343 = vmatpush.msk.msra.mxu2 %vm3118_vm6, %v986_v25  ;;  %v754_v36 = vsel %vm5566_vm4, %v3595_v22, %v5561_v13  ;;  %v890_v22 = vsel %vm5565_vm9, %v5570_v31, %v5569_v48  ;;  %vm5571_vm4 = vmmov %vm5562_vm0  ;;  %vm5572_vm0 = vcmp.lt.s32.totalorder %v2912_v18, 112  ;;  %v5573_v25 = vld [vmem:[#allocation17_spill] sm:$0xff]  ;;  %v5575_v13 = vld [vmem:[#allocation42_spill] sm:$0xff] }
 0x2d6   :  { %2334 = vmatpush.msk.msrb.mxu3 %vm3378_vm12, %v891_v43  ;;  %2363 = vmatpush.msk.msra.mxu0 %vm3181_vm3, %v754_v36  ;;  %v753_v46 = vsel %vm5571_vm4, %v5567_v30, %v5568_v4  ;;  %v960_v62 = vsel %vm5572_vm0, %v3843_v40, %v3683_v59  ;;  %vm5574_vm9 = vnez %v5573_v25  ;;  %v5576_v14 = vld [vmem:[#allocation35_spill] sm:$0xff]  ;;  %vm5577_vm4 = vcmp.lt.s32.totalorder %v2912_v18, 127  ;;  %v5580_v30 = vld [vmem:[#allocation32_spill] sm:$0xff] }
 0x2d7   :  { %1274 = vrot.lane.b32.xlu1 %v3673_v49, %s2733_s6  ;;  %2324 = vmatpush.msk.msrb.mxu1 %vm3168_vm1, %v757_v12  ;;  %v889_v43 = vsel %vm5577_vm4, %v5576_v14, %v5575_v13  ;;  %vm5578_vm0 = vcmp.lt.s32.totalorder %v2912_v18, 111  ;;  %v5581_v4 = vld [vmem:[#allocation12_spill] sm:$0xff] }
 0x2d8   :  { %2335 = vmatpush.msk.msrb.mxu3 %vm3378_vm12, %v890_v22  ;;  %2364 = vmatpush.msk.msra.mxu0 %vm3181_vm3, %v753_v46  ;;  %v1377_v2 = vpop.permute.xlu0 %1376  ;;  %v4115_v57 = vpop.permute.xlu2 %1338  ;;  %vm5579_vm3 = vcmp.lt.s32.totalorder %v2912_v18, 112 }
 0x2d9   :  { %2365 = vmatpush.msk.msra.mxu1 %vm5574_vm9, %v960_v62  ;;  %v970_v36 = vpop.permute.xlu1 %969  ;;  %1280 = vrot.lane.b32.xlu0 %v3687_v39, %s2733_s6  ;;  %v959_v40 = vsel %vm5579_vm3, %v3753_v17, %v3671_v45  ;;  %vm5582_vm4 = vmmov %vm5579_vm3  ;;  %v5583_v17 = vld [vmem:[#allocation30_spill] sm:$0xff]  ;;  %v957_v45 = vsel %vm5579_vm3, %v3713_v55, %v3575_v54  ;;  %v5586_v62 = vld [vmem:[#allocation19_spill] sm:$0xff]  ;;  %vm5588_vm3 = vcmp.lt.s32.totalorder %v2912_v18, 111 }
 0x2da   :  { %2336 = vmatpush.msk.msrb.mxu3 %vm3378_vm12, %v889_v43  ;;  %v985_v59 = vsel %vm5578_vm0, %v970_v36, %v3903_v24  ;;  %1282 = vrot.lane.b32.xlu2 %v3705_v58, %s2733_s6  ;;  %v958_v12 = vsel %vm5582_vm4, %v3789_v0, %v3631_v37  ;;  %vm5584_vm0 = vcmp.lt.s32.totalorder %v2912_v18, 113  ;;  %v5585_v37 = vld [vmem:[#allocation27_spill] sm:$0xff]  ;;  %vm5587_vm4 = vnez %v5586_v62  ;;  %v4173_v54 = vld [vmem:[#allocation7 + $0x8] sm:$0xff] }
 0x2db   :  { %2366 = vmatpush.msk.msra.mxu1 %vm5574_vm9, %v959_v40  ;;  %2344 = vmatpush.msk.msra.mxu2 %vm3118_vm6, %v985_v59  ;;  %v928_v0 = vsel %vm5584_vm0, %v3957_v27, %v3681_v50  ;;  %v992_v50 = vsel %vm5588_vm3, %v3845_v29, %v3743_v11  ;;  %v5589_v27 = vld [vmem:[#allocation24_spill] sm:$0xff]  ;;  %vm5590_vm0 = vcmp.lt.s32.totalorder %v2912_v18, 1  ;;  %vm5591_vm6 = vcmp.lt.s32.totalorder %v2912_v18, 113  ;;  %v5592_v11 = vld [vmem:[#allocation18_spill] sm:$0xff] }
 0x2dc   :  { %2337 = vmatpush.msk.msrb.mxu3 %vm2948_vm5, %v5580_v30  ;;  %v927_v59 = vsel %vm5591_vm6, %v3765_v32, %v3685_v61  ;;  %vm5593_vm3 = vnez %v5592_v11  ;;  %v926_v32 = vsel %vm5591_vm6, %v3751_v20, %v3621_v7 }
 0x2dd   :  { %2367 = vmatpush.msk.msra.mxu1 %vm5574_vm9, %v958_v12 }
 0x2de   :  { %2338 = vmatpush.msk.msrb.mxu3 %vm2948_vm5, %v5583_v17 }
 0x2df   :  { %2368 = vmatpush.msk.msra.mxu1 %vm5574_vm9, %v957_v45  ;;  %1418 = vrot.lane.b32.xlu1 %v3705_v58, %s2739_s11  ;;  %v5614_v45 = vld [vmem:[#allocation34_spill] sm:$0xff] }
 0x2e0   :  { %2339 = vmatpush.msk.msrb.mxu3 %vm2948_vm5, %v5585_v37  ;;  %v1365_v22 = vpop.permute.xlu0 %1364  ;;  %v4167_v46 = vpop.permute.xlu2 %1482 }
 0x2e1   :  { %2369 = vmatpush.msk.msra.mxu1 %vm5587_vm4, %v928_v0  ;;  %v1379_v55 = vpop.permute.xlu1 %1378  ;;  %1270 = vrot.lane.b32.xlu0 %v3719_v6, %s2733_s6 }
 0x2e2   :  { %2340 = vmatpush.msk.msrb.mxu3 %vm2948_vm5, %v5589_v27  ;;  %v1387_v43 = vsel %vm5590_vm0, %v1379_v55, %v4021_v9  ;;  %1272 = vrot.lane.b32.xlu2 %v3703_v15, %s2733_s6  ;;  %vm5594_vm5 = vmmov %vm5590_vm0  ;;  %vm5595_vm0 = vcmp.lt.s32.totalorder %v2912_v18, 111 }
 0x2e3   :  { %2370 = vmatpush.msk.msra.mxu1 %vm5587_vm4, %v927_v59  ;;  %v1386_v29 = vsel %vm5594_vm5, %v1377_v2, %v3949_v23  ;;  %v991_v40 = vsel %vm5595_vm0, %v4035_v5, %v3901_v41  ;;  %2389 = vmatpush.msk.msrb.mxu2 %vm2965_vm8, %v1387_v43  ;;  %vm5596_vm5 = vmmov %vm5595_vm0  ;;  %v5620_v59 = vld [vmem:[#allocation15_spill] sm:$0xff] }
 0x2e4   :  { %2381 = vmatpush.msk.msra.mxu3 %vm5593_vm3, %v992_v50  ;;  %v990_v61 = vsel %vm5596_vm5, %v3941_v35, %v3881_v42  ;;  %vm5597_vm0 = vmmov %vm5591_vm6  ;;  %vm5598_vm6 = vcmp.lt.s32.totalorder %v2912_v18, 127  ;;  %v989_v42 = vsel %vm5596_vm5, %v3903_v24, %v970_v36  ;;  %v5600_v35 = vld [vmem:[#allocation20_spill] sm:$0xff]  ;;  %vm5603_vm5 = vcmp.lt.s32.totalorder %v2912_v18, 127 }
 0x2e5   :  { %1058 = vmatmul.f32.vlgmr.msrb.gmra.mxu3 %v4173_v54  ;;  %2371 = vmatpush.msk.msra.mxu1 %vm5587_vm4, %v926_v32  ;;  %v925_v20 = vsel %vm5597_vm0, %v3755_v21, %v3619_v1  ;;  %v896_v7 = vsel %vm5598_vm6, %v3815_v63, %v3729_v28  ;;  %vm5599_vm0 = vcmp.lt.s32.totalorder %v2912_v18, 1  ;;  %v5601_v63 = vld [vmem:[#allocation14_spill] sm:$0xff]  ;;  %v895_v5 = vsel %vm5603_vm5, %v5563_v51, %v5564_v8 }
 0x2e6   :  { %2382 = vmatpush.msk.msra.mxu3 %vm5593_vm3, %v991_v40  ;;  %2390 = vmatpush.msk.msrb.mxu2 %vm2965_vm8, %v1386_v29  ;;  %v1383_v1 = vsel %vm5599_vm0, %v4021_v9, %v1379_v55  ;;  %vm5602_vm6 = vmmov %vm5599_vm0  ;;  %v1382_v9 = vsel %vm5599_vm0, %v3949_v23, %v1377_v2  ;;  %v5608_v2 = vld [vmem:[#allocation13_spill] sm:$0xff] }
 0x2e7   :  { %2372 = vmatpush.msk.msra.mxu1 %vm5587_vm4, %v925_v20  ;;  %1408 = vrot.lane.b32.xlu1 %v3703_v15, %s2739_s11 }
 0x2e8   :  { %2383 = vmatpush.msk.msra.mxu3 %vm5593_vm3, %v990_v61  ;;  %v1347_v41 = vpop.permute.xlu0 %1346  ;;  %v1473_v21 = vpop.permute.xlu2 %1472 }
 0x2e9   :  { %2373 = vmatpush.msk.msra.mxu1 %vm3386_vm13, %v896_v7  ;;  %v1367_v28 = vpop.permute.xlu1 %1366  ;;  %1414 = vrot.lane.b32.xlu0 %v3717_v19, %s2739_s11 }
 0x2ea   :  { %2384 = vmatpush.msk.msra.mxu3 %vm5593_vm3, %v989_v42  ;;  %v1385_v24 = vsel %vm5602_vm6, %v4023_v38, %v1367_v28  ;;  %vm5604_vm6 = vmmov %vm5603_vm5  ;;  %1416 = vrot.lane.b32.xlu2 %v3687_v39, %s2739_s11 }
 0x2eb   :  { %2374 = vmatpush.msk.msra.mxu1 %vm3386_vm13, %v895_v5  ;;  %2391 = vmatpush.msk.msrb.mxu2 %vm2965_vm8, %v1385_v24  ;;  %v894_v51 = vsel %vm5604_vm6, %v5569_v48, %v5570_v31  ;;  %vm5605_vm5 = vmmov %vm5599_vm0 }
 0x2ec   :  { %2429 = vmatpush.msk.msrb.mxu3 %vm2974_vm10, %v1383_v1  ;;  %v1381_v23 = vsel %vm5605_vm5, %v1367_v28, %v4023_v38  ;;  %vm5606_vm0 = vmmov %vm5604_vm6  ;;  %v5607_v38 = vld [vmem:[#allocation38_spill] sm:$0xff]  ;;  %vm5609_vm6 = vnez %v5608_v2 }
 0x2ed   :  { %2375 = vmatpush.msk.msra.mxu1 %vm3386_vm13, %v894_v51  ;;  %v893_v8 = vsel %vm5606_vm0, %v5575_v13, %v5576_v14  ;;  %vm5610_vm3 = vmmov %vm5605_vm5  ;;  %vm5611_vm0 = vcmp.lt.s32.totalorder %v2912_v18, 15  ;;  %v5612_v14 = vld [vmem:[#allocation36_spill] sm:$0xff] }
 0x2ee   :  { %2430 = vmatpush.msk.msrb.mxu3 %vm2974_vm10, %v1382_v9  ;;  %v1355_v13 = vsel %vm5611_vm0, %v1347_v41, %v4115_v57 }
 0x2ef   :  { %2376 = vmatpush.msk.msra.mxu1 %vm3386_vm13, %v893_v8  ;;  %1278 = vrot.lane.b32.xlu1 %v3717_v19, %s2733_s6  ;;  %vm5613_vm13 = vmmov %vm5611_vm0 }
 0x2f0   :  { %2431 = vmatpush.msk.msrb.mxu3 %vm2974_vm10, %v1381_v23  ;;  %v1337_v48 = vpop.permute.xlu0 %1336  ;;  %v1343_v31 = vpop.permute.xlu2 %1342  ;;  %v1351_v17 = vsel %vm5613_vm13, %v4115_v57, %v1347_v41  ;;  %v5615_v57 = vld [vmem:[#allocation33_spill] sm:$0xff]  ;;  %vm5616_vm13 = vcmp.lt.s32.totalorder %v2912_v18, 112 }
 0x2f1   :  { %2377 = vmatpush.msk.msra.mxu1 %vm5609_vm6, %v5607_v38  ;;  %v1373_v36 = vpop.permute.xlu1 %1372  ;;  %1404 = vrot.lane.b32.xlu0 %v3701_v3, %s2739_s11 }
 0x2f2   :  { %v1380_v30 = vsel %vm5605_vm5, %v1365_v22, %v1373_v36  ;;  %v1384_v12 = vsel %vm5610_vm3, %v1373_v36, %v1365_v22  ;;  %1406 = vrot.lane.b32.xlu2 %v3719_v6, %s2739_s11  ;;  %vm5617_vm3 = vmmov %vm5616_vm13 }
 0x2f3   :  { %2378 = vmatpush.msk.msra.mxu1 %vm5609_vm6, %v5612_v14  ;;  %2392 = vmatpush.msk.msrb.mxu2 %vm2965_vm8, %v1384_v12  ;;  %vm5618_vm5 = vmmov %vm5617_vm3  ;;  %v162_v12 = vld [vmem:[#allocation7] sm:$0xff] }
 0x2f4   :  { %2432 = vmatpush.msk.msrb.mxu3 %vm2974_vm10, %v1380_v30  ;;  %vm5619_vm0 = vmmov %vm5617_vm3  ;;  %vm5621_vm10 = vnez %v5620_v59  ;;  %1029 = vmatmul.f32.vlgmr.msrb.gmra.mxu1 %v162_v12 }
 0x2f5   :  { %2379 = vmatpush.msk.msra.mxu1 %vm5609_vm6, %v5614_v45  ;;  %2393 = vmatpush.msk.msrb.mxu2 %vm3035_vm11, %v1355_v13 }
 0x2f6   :  { %2433 = vmatpush.msk.msrb.mxu3 %vm5541_vm2, %v1351_v17  ;;  %1116 = vmatmul.f32.vlgmr.msra.gmra.mxu0 %v162_v12  ;;  %v166_v17 = vld [vmem:[#allocation7 + $0x20] sm:$0xff] }
 0x2f7   :  { %2380 = vmatpush.msk.msra.mxu1 %vm5609_vm6, %v5615_v57  ;;  %1268 = vrot.lane.b32.xlu1 %v3701_v3, %s2733_s6 }
 0x2f8   :  { %v1481_v0 = vpop.permute.xlu0 %1480  ;;  %v1333_v37 = vpop.permute.xlu2 %1332  ;;  %1061 = vmatmul.f32.gmra.mxu3 %v166_v17 }
 0x2f9   :  { %v1475_v22 = vpop.permute.xlu1 %1474  ;;  %v4322_v55 = vsel %vm5616_vm13, %v1481_v0, %v1473_v21  ;;  %1514 = vrot.lane.b32.xlu0 %v3705_v58, %s2736_s8  ;;  %v1486_v43 = vsel %vm5619_vm0, %v1473_v21, %v1481_v0  ;;  %vm5622_vm13 = vcmp.lt.s32.totalorder %v2912_v18, 15 }
 0x2fa   :  { %v1487_v50 = vsel %vm5617_vm3, %v1475_v22, %v4167_v46  ;;  %v4330_v27 = vsel %vm5618_vm5, %v4167_v46, %v1475_v22  ;;  %1276 = vrot.lane.b32.xlu2 %v3731_v33, %s2733_s6  ;;  %vm5623_vm3 = vmmov %vm5622_vm13  ;;  %v165_v22 = vld [vmem:[#allocation7 + $0x18] sm:$0xff] }
 0x2fb   :  { %2405 = vmatpush.msk.msrb.mxu0 %vm5621_vm10, %v1487_v50  ;;  %vm5624_vm5 = vmmov %vm5623_vm3 }
 0x2fc   :  { %vm5625_vm0 = vmmov %vm5623_vm3  ;;  %1032 = vmatmul.f32.gmra.mxu1 %v165_v22 }
 0x2fd   :  { %2406 = vmatpush.msk.msrb.mxu0 %vm5621_vm10, %v1486_v43 }
 0x2fe   :  { %1119 = vmatmul.f32.gmra.mxu0 %v165_v22 }
 0x2ff   :  { %1412 = vrot.lane.b32.xlu1 %v3731_v33, %s2739_s11 }
 0x300   :  { %v1471_v46 = vpop.permute.xlu0 %1470  ;;  %v1477_v29 = vpop.permute.xlu2 %1476 }
 0x301   :  { %v1345_v40 = vpop.permute.xlu1 %1344  ;;  %1502 = vrot.lane.b32.xlu0 %v3719_v6, %s2736_s8 }
 0x302   :  { %v1350_v32 = vsel %vm5622_vm13, %v1337_v48, %v1345_v40  ;;  %v1354_v61 = vsel %vm5623_vm3, %v1345_v40, %v1337_v48  ;;  %1506 = vrot.lane.b32.xlu2 %v3673_v49, %s2736_s8  ;;  %vm5626_vm13 = vmmov %vm5625_vm0 }
 0x303   :  { %2394 = vmatpush.msk.msrb.mxu2 %vm3035_vm11, %v1354_v61  ;;  %2434 = vmatpush.msk.msrb.mxu3 %vm5541_vm2, %v1350_v32  ;;  %vm5627_vm3 = vmmov %vm5625_vm0 }
 0x307   :  { %1504 = vrot.lane.b32.xlu1 %v3703_v15, %s2736_s8 }
 0x308   :  { %v1341_v20 = vpop.permute.xlu0 %1340  ;;  %v1443_v7 = vpop.permute.xlu2 %1442 }
 0x309   :  { %v1335_v42 = vpop.permute.xlu1 %1334  ;;  %1508 = vrot.lane.b32.xlu0 %v3731_v33, %s2736_s8  ;;  %v1348_v1 = vsel %vm5626_vm13, %v1333_v37, %v1341_v20  ;;  %v1352_v28 = vsel %vm5627_vm3, %v1341_v20, %v1333_v37  ;;  %vm5630_vm13 = vcmp.lt.s32.totalorder %v2912_v18, 113  ;;  %v164_v37 = vld [vmem:[#allocation7 + $0x10] sm:$0xff] }
 0x30a   :  { %v1349_v41 = vsel %vm5624_vm5, %v1335_v42, %v1343_v31  ;;  %v1353_v21 = vsel %vm5625_vm0, %v1343_v31, %v1335_v42  ;;  %1512 = vrot.lane.b32.xlu2 %v3687_v39, %s2736_s8  ;;  %vm5628_vm5 = vcmp.lt.s32.totalorder %v2912_v18, 112  ;;  %v168_v42 = vld [vmem:[#allocation7 + $0x30] sm:$0xff] }
 0x30b   :  { %2395 = vmatpush.msk.msrb.mxu2 %vm3035_vm11, %v1353_v21  ;;  %2435 = vmatpush.msk.msrb.mxu3 %vm5541_vm2, %v1349_v41  ;;  %vm5629_vm0 = vmmov %vm5628_vm5 }
 0x30c   :  { %vm5631_vm3 = vmmov %vm5629_vm0  ;;  %1035 = vmatmul.f32.gmra.mxu1 %v168_v42  ;;  %1122 = vmatmul.f32.gmra.mxu0 %v168_v42 }
 0x30d   :  { %2396 = vmatpush.msk.msrb.mxu2 %vm3035_vm11, %v1352_v28  ;;  %2436 = vmatpush.msk.msrb.mxu3 %vm5541_vm2, %v1348_v1  ;;  %v172_v1 = vld [vmem:[#allocation7 + $0x50] sm:$0xff] }
 0x30f   :  { %1510 = vrot.lane.b32.xlu1 %v3717_v19, %s2736_s8 }
 0x310   :  { %v1307_v24 = vpop.permute.xlu0 %1306 }
 0x311   :  { %v1479_v5 = vpop.permute.xlu1 %1478  ;;  %v1313_v23 = vpop.permute.xlu2 %1312 }
 0x312   :  { %v1485_v9 = vsel %vm5628_vm5, %v1471_v46, %v1479_v5  ;;  %v4384_v51 = vsel %vm5629_vm0, %v1479_v5, %v1471_v46  ;;  %1500 = vrot.lane.b32.xlu2 %v3701_v3, %s2736_s8  ;;  %vm5632_vm5 = vmmov %vm5629_vm0  ;;  %v169_v46 = vld [vmem:[#allocation7 + $0x38] sm:$0xff] }
 0x313   :  { %2407 = vmatpush.msk.msrb.mxu0 %vm5621_vm10, %v1485_v9  ;;  %vm5633_vm0 = vmmov %vm5630_vm13  ;;  %1064 = vmatmul.f32.gmra.mxu3 %v169_v46  ;;  %v170_v9 = vld [vmem:[#allocation7 + $0x40] sm:$0xff] }
 0x318   :  { %v1451_v8 = vpop.permute.xlu0 %1450 }
 0x319   :  { %v1469_v48 = vpop.permute.xlu1 %1468  ;;  %v4392_v31 = vsel %vm5630_vm13, %v1451_v8, %v1443_v7  ;;  %v1455_v30 = vsel %vm5633_vm0, %v1443_v7, %v1451_v8  ;;  %v1303_v13 = vpop.permute.xlu2 %1302  ;;  %vm5634_vm13 = vcmp.lt.s32.totalorder %v2912_v18, 16  ;;  %v167_v7 = vld [vmem:[#allocation7 + $0x28] sm:$0xff] }
 0x31a   :  { %v1484_v38 = vsel %vm5631_vm3, %v1469_v48, %v1477_v29  ;;  %v4398_v36 = vsel %vm5632_vm5, %v1477_v29, %v1469_v48  ;;  %vm5635_vm3 = vmmov %vm5634_vm13  ;;  %vm5636_vm5 = vcmask 261120  }
 0x31b   :  { %2408 = vmatpush.msk.msrb.mxu0 %vm5621_vm10, %v1484_v38  ;;  %2345 = vmatmul.msk.f32.vlgmr.msra.gmra.mxu2 %vm5636_vm5, %v164_v37  ;;  %vm5637_vm0 = vmmov %vm5635_vm3 }
 0x31c   :  { %vm5640_vm2 = vmmov %vm5637_vm0  ;;  %1067 = vmatmul.f32.gmra.mxu3 %v172_v1 }
 0x31d   :  { %2409 = vmatpush.msk.msrb.mxu0 %vm3318_vm14, %v1455_v30 }
 0x320   :  { %v1441_v14 = vpop.permute.xlu0 %1440 }
 0x321   :  { %v1315_v45 = vpop.permute.xlu1 %1314 }
 0x322   :  { %v1319_v57 = vsel %vm5634_vm13, %v1307_v24, %v1315_v45  ;;  %v1323_v0 = vsel %vm5635_vm3, %v1315_v45, %v1307_v24  ;;  %v4415_v50 = vpop.permute.xlu2 %1446  ;;  %vm5638_vm13 = vmmov %vm5637_vm0 }
 0x323   :  { %2397 = vmatpush.msk.msrb.mxu2 %vm3016_vm15, %v1323_v0  ;;  %2437 = vmatpush.msk.msrb.mxu3 %vm5549_vm7, %v1319_v57  ;;  %vm5639_vm3 = vmmov %vm5637_vm0 }
 0x324   :  { %2346 = vmatmul.msk.f32.gmra.mxu2 %vm5636_vm5, %v167_v7 }
 0x328   :  { %v1311_v43 = vpop.permute.xlu0 %1310 }
 0x329   :  { %v1305_v29 = vpop.permute.xlu1 %1304  ;;  %v1317_v61 = vsel %vm5639_vm3, %v1303_v13, %v1311_v43  ;;  %v1321_v20 = vsel %vm5640_vm2, %v1311_v43, %v1303_v13  ;;  %vm5641_vm2 = vcmp.lt.s32.totalorder %v2912_v18, 113  ;;  %vm5644_vm3 = vmmov %vm5636_vm5  ;;  %v173_v13 = vld [vmem:[#allocation7 + $0x58] sm:$0xff] }
 0x32a   :  { %v1318_v40 = vsel %vm5637_vm0, %v1305_v29, %v1313_v23  ;;  %v1322_v32 = vsel %vm5638_vm13, %v1313_v23, %v1305_v29  ;;  %vm5642_vm0 = vmmov %vm5641_vm2  ;;  %v171_v23 = vld [vmem:[#allocation7 + $0x48] sm:$0xff]  ;;  %2385 = vmatmul.msk.f32.vlgmr.msra.gmra.mxu3 %vm5644_vm3, %v164_v37 }
 0x32b   :  { %2398 = vmatpush.msk.msrb.mxu2 %vm3016_vm15, %v1322_v32  ;;  %2438 = vmatpush.msk.msrb.mxu3 %vm5549_vm7, %v1318_v40  ;;  %v4434_v21 = vpop.permute.xlu2 %1436  ;;  %vm5643_vm13 = vmmov %vm5636_vm5 }
 0x32c   :  { %2347 = vmatmul.msk.f32.gmra.mxu2 %vm5643_vm13, %v170_v9  ;;  %1038 = vmatmul.f32.gmra.mxu1 %v171_v23  ;;  %vm5645_vm5 = vmmov %vm5642_vm0 }
 0x32d   :  { %2399 = vmatpush.msk.msrb.mxu2 %vm3016_vm15, %v1321_v20  ;;  %2439 = vmatpush.msk.msrb.mxu3 %vm5549_vm7, %v1317_v61 }
 0x32e   :  { %1125 = vmatmul.f32.gmra.mxu0 %v171_v23 }
 0x330   :  { %v1301_v41 = vpop.permute.xlu0 %1300 }
 0x331   :  { %v1449_v28 = vpop.permute.xlu1 %1448 }
 0x332   :  { %v1454_v24 = vsel %vm5641_vm2, %v1441_v14, %v1449_v28  ;;  %v4440_v5 = vsel %vm5642_vm0, %v1449_v28, %v1441_v14  ;;  %vm5646_vm2 = vmmov %vm5642_vm0 }
 0x333   :  { %2410 = vmatpush.msk.msrb.mxu0 %vm3318_vm14, %v1454_v24  ;;  %vm5647_vm0 = vmmov %vm5644_vm3  ;;  %vm5649_vm3 = vcmp.lt.s32.totalorder %v2912_v18, 16 }
 0x334   :  { %v1283_v12 = vpop.permute.xlu2 %1282  ;;  %2348 = vmatmul.msk.f32.gmra.mxu2 %vm5647_vm0, %v173_v13  ;;  %1145 = vmatmul.f32.vlgmr.msra.gmra.mxu1 %v4173_v54  ;;  %vm5648_vm13 = vmmov %vm5647_vm0 }
 0x335   :  { %2386 = vmatmul.msk.f32.gmra.mxu3 %vm5648_vm13, %v167_v7 }
 0x338   :  { %v4445_v8 = vpop.permute.xlu0 %1444 }
 0x339   :  { %v4447_v48 = vpop.permute.xlu1 %1438  ;;  %v1452_v30 = vsel %vm5646_vm2, %v4434_v21, %v4445_v8  ;;  %vm5651_vm2 = vmmov %vm5647_vm0  ;;  %vm5652_vm0 = vcmp.lt.s32.totalorder %v2912_v18, 17 }
 0x33a   :  { %v1453_v38 = vsel %vm5645_vm5, %v4447_v48, %v4415_v50  ;;  %vm5650_vm5 = vmmov %vm5649_vm3 }
 0x33b   :  { %2411 = vmatpush.msk.msrb.mxu0 %vm3318_vm14, %v1453_v38  ;;  %vm5653_vm13 = vmmov %vm5652_vm0 }
 0x33c   :  { %v1273_v54 = vpop.permute.xlu2 %1272  ;;  %1148 = vmatmul.f32.gmra.mxu1 %v166_v17 }
 0x33d   :  { %2412 = vmatpush.msk.msrb.mxu0 %vm3318_vm14, %v1452_v30  ;;  %2387 = vmatmul.msk.f32.gmra.mxu3 %vm5651_vm2, %v170_v9 }
 0x340   :  { %v4464_v45 = vpop.permute.xlu0 %1410 }
 0x341   :  { %v1309_v14 = vpop.permute.xlu1 %1308 }
 0x342   :  { %v1316_v57 = vsel %vm5649_vm3, %v1301_v41, %v1309_v14  ;;  %v1320_v0 = vsel %vm5650_vm5, %v1309_v14, %v1301_v41  ;;  %vm5654_vm3 = vnez %v5464_v10  ;;  %vm5655_vm5 = vmmov %vm5652_vm0 }
 0x343   :  { %2400 = vmatpush.msk.msrb.mxu2 %vm3016_vm15, %v1320_v0  ;;  %2440 = vmatpush.msk.msrb.mxu3 %vm5549_vm7, %v1316_v57  ;;  %vm5656_vm7 = vmmov %vm5652_vm0 }
 0x344   :  { %1151 = vmatmul.f32.gmra.mxu1 %v169_v46  ;;  %v4492_v32 = vpop.permute.xlu2 %1416 }
 0x345   :  { %2388 = vmatmul.msk.f32.gmra.mxu3 %vm5651_vm2, %v173_v13  ;;  %vm5660_vm2 = vmmov %vm5655_vm5 }
 0x349   :  { %v1275_v37 = vpop.permute.xlu1 %1274 }
 0x34a   :  { %v1287_v22 = vsel %vm5652_vm0, %v1275_v37, %v1283_v12  ;;  %v1291_v43 = vsel %vm5653_vm13, %v1283_v12, %v1275_v37  ;;  %vm5657_vm0 = vcmp.lt.s32.totalorder %v2912_v18, 127  ;;  %v2580_v37 = vld [vmem:[#allocation5] sm:$0xff] }
 0x34b   :  { %2401 = vmatpush.msk.msrb.mxu2 %vm3168_vm1, %v1291_v43  ;;  %2441 = vmatpush.msk.msrb.mxu3 %vm5654_vm3, %v1287_v22  ;;  %v1281_v29 = vpop.permute.xlu0 %1280  ;;  %vm5659_vm13 = vmmov %vm5657_vm0 }
 0x34c   :  { %v1286_v40 = vsel %vm5655_vm5, %v1273_v54, %v1281_v29  ;;  %v1290_v17 = vsel %vm5656_vm7, %v1281_v29, %v1273_v54  ;;  %1154 = vmatmul.f32.gmra.mxu1 %v172_v1  ;;  %v4500_v46 = vpop.permute.xlu2 %1406  ;;  %vm5658_vm7 = vmmov %vm5657_vm0 }
 0x34d   :  { %2402 = vmatpush.msk.msrb.mxu2 %vm3168_vm1, %v1290_v17  ;;  %2442 = vmatpush.msk.msrb.mxu3 %vm5654_vm3, %v1286_v40 }
 0x351   :  { %v1419_v61 = vpop.permute.xlu1 %1418 }
 0x352   :  { %v1423_v20 = vsel %vm5657_vm0, %v4464_v45, %v1419_v61  ;;  %vm5661_vm0 = vmmov %vm5660_vm2 }
 0x353   :  { %2413 = vmatpush.msk.msrb.mxu0 %vm3378_vm12, %v1423_v20  ;;  %v1271_v7 = vpop.permute.xlu0 %1270 }
 0x354   :  { %v1277_v1 = vpop.permute.xlu2 %1276 }
 0x359   :  { %v1409_v42 = vpop.permute.xlu1 %1408 }
 0x35a   :  { %v1422_v41 = vsel %vm5658_vm7, %v1409_v42, %v4492_v32  ;;  %vm5662_vm7 = vmmov %vm5661_vm0 }
 0x35b   :  { %2414 = vmatpush.msk.msrb.mxu0 %vm3378_vm12, %v1422_v41  ;;  %v1415_v28 = vpop.permute.xlu0 %1414  ;;  %v2586_v41 = vld [vmem:[#allocation5 + $0x48] sm:$0xff] }
 0x35c   :  { %v1421_v24 = vsel %vm5659_vm13, %v4500_v46, %v1415_v28  ;;  %v1507_v57 = vpop.permute.xlu2 %1506  ;;  %vm5663_vm13 = vcmp.lt.s32.totalorder %v2912_v18, 111 }
 0x35d   :  { %2415 = vmatpush.msk.msrb.mxu0 %vm3378_vm12, %v1421_v24  ;;  %v2589_v24 = vld [vmem:[#allocation5 + $0x50] sm:$0xff] }
 0x361   :  { %v1279_v9 = vpop.permute.xlu1 %1278 }
 0x362   :  { %v1285_v23 = vsel %vm5655_vm5, %v1271_v7, %v1279_v9  ;;  %v1289_v38 = vsel %vm5660_vm2, %v1279_v9, %v1271_v7  ;;  %vm5664_vm5 = vnez %v5458_v44  ;;  %vm5665_vm2 = vcmp.lt.s32.totalorder %v2912_v18, 127  ;;  %v2590_v9 = vld [vmem:[#allocation5 + $0x40] sm:$0xff] }
 0x363   :  { %2403 = vmatpush.msk.msrb.mxu2 %vm3168_vm1, %v1289_v38  ;;  %2443 = vmatpush.msk.msrb.mxu3 %vm5654_vm3, %v1285_v23  ;;  %v1405_v30 = vpop.permute.xlu0 %1404 }
 0x369   :  { %v1269_v12 = vpop.permute.xlu1 %1268 }
 0x36a   :  { %v1284_v13 = vsel %vm5661_vm0, %v1269_v12, %v1277_v1  ;;  %v1288_v14 = vsel %vm5662_vm7, %v1277_v1, %v1269_v12  ;;  %vm5666_vm0 = vnez %v5581_v4  ;;  %vm5667_vm7 = vcmp.lt.s32.totalorder %v2912_v18, 113  ;;  %v1059_v1 = vpop.f32.mrf.mxu3 }
 0x36b   :  { %2404 = vmatpush.msk.msrb.mxu2 %vm3168_vm1, %v1288_v14  ;;  %2444 = vmatpush.msk.msrb.mxu3 %vm5654_vm3, %v1284_v13  ;;  %v1515_v0 = vpop.permute.xlu0 %1514 }
 0x36c   :  { %v1519_v54 = vsel %vm5663_vm13, %v1507_v57, %v1515_v0  ;;  %1635 = vmatmul.f32.vlgmr.msrb.gmra.mxu3 %v2580_v37  ;;  %1548 = vmatmul.f32.vlgmr.msrb.gmra.mxu2 %v2580_v37  ;;  %vm5668_vm13 = vmmov %vm5667_vm7 }
 0x36d   :  { %2445 = vmatpush.msk.msra.mxu2 %vm5574_vm9, %v4330_v27  ;;  %2421 = vmatpush.msk.msrb.mxu1 %vm5664_vm5, %v1519_v54 }
 0x36f   :  { %2446 = vmatpush.msk.msra.mxu2 %vm5574_vm9, %v4322_v55  ;;  %v2581_v55 = vld [vmem:[#allocation5 + $0x18] sm:$0xff] }
 0x371   :  { %2447 = vmatpush.msk.msra.mxu2 %vm5574_vm9, %v4384_v51  ;;  %v1413_v22 = vpop.permute.xlu1 %1412 }
 0x372   :  { %v1420_v27 = vsel %vm5665_vm2, %v1405_v30, %v1413_v22  ;;  %vm5669_vm2 = vcmp.lt.s32.totalorder %v2912_v18, 111 }
 0x373   :  { %2448 = vmatpush.msk.msra.mxu2 %vm5574_vm9, %v4398_v36  ;;  %2416 = vmatpush.msk.msrb.mxu0 %vm3378_vm12, %v1420_v27  ;;  %v1503_v51 = vpop.permute.xlu0 %1502  ;;  %v1457_v36 = vsel %vm5667_vm7, %v4415_v50, %v4447_v48  ;;  %vm5670_vm7 = vcmp.lt.s32.totalorder %v2912_v18, 127  ;;  %v2583_v48 = vld [vmem:[#allocation5 + $0x30] sm:$0xff]  ;;  %v1117_v27 = vpop.f32.mrf.mxu0 }
 0x374   :  { %1638 = vmatmul.f32.gmra.mxu3 %v2581_v55  ;;  %1551 = vmatmul.f32.gmra.mxu2 %v2581_v55 }
 0x375   :  { %2449 = vmatpush.msk.msra.mxu2 %vm5587_vm4, %v4392_v31  ;;  %2417 = vmatpush.msk.msrb.mxu0 %vm5666_vm0, %v3673_v49  ;;  %v1513_v31 = vpop.permute.xlu2 %1512  ;;  %v1456_v49 = vsel %vm5668_vm13, %v4445_v8, %v4434_v21  ;;  %vm5671_vm13 = vmmov %vm5669_vm2  ;;  %v2582_v21 = vld [vmem:[#allocation5 + $0x8] sm:$0xff] }
 0x376   :  { %vm5675_vm9 = vmmov %vm5671_vm13 }
 0x377   :  { %2450 = vmatpush.msk.msra.mxu2 %vm5587_vm4, %v4440_v5  ;;  %2418 = vmatpush.msk.msrb.mxu0 %vm5666_vm0, %v3703_v15  ;;  %v1427_v15 = vsel %vm5670_vm7, %v1419_v61, %v4464_v45  ;;  %vm5677_vm3 = vmmov %vm5675_vm9 }
 0x378   :  { %vm5679_vm1 = vmmov %vm5677_vm3 }
 0x379   :  { %2451 = vmatpush.msk.msra.mxu2 %vm5587_vm4, %v1457_v36  ;;  %2419 = vmatpush.msk.msrb.mxu0 %vm5666_vm0, %v3719_v6  ;;  %v1505_v5 = vpop.permute.xlu1 %1504  ;;  %v1523_v6 = vsel %vm5671_vm13, %v1515_v0, %v1507_v57 }
 0x37a   :  { %v1518_v50 = vsel %vm5669_vm2, %v1505_v5, %v1513_v31  ;;  %vm5672_vm2 = vnez %v5600_v35 }
 0x37b   :  { %2452 = vmatpush.msk.msra.mxu2 %vm5587_vm4, %v1456_v49  ;;  %2420 = vmatpush.msk.msrb.mxu0 %vm5666_vm0, %v3701_v3  ;;  %vm5673_vm4 = vmmov %vm5670_vm7  ;;  %vm5674_vm7 = vnez %v5592_v11  ;;  %v1522_v3 = vsel %vm5675_vm9, %v1513_v31, %v1505_v5  ;;  %v1509_v43 = vpop.permute.xlu0 %1508  ;;  %v1062_v38 = vpop.f32.mrf.mxu3 }
 0x37c   :  { %2422 = vmatpush.msk.msrb.mxu1 %vm5664_vm5, %v1518_v50  ;;  %1577 = vmatmul.f32.vlgmr.msrb.gmra.mxu0 %v2582_v21  ;;  %v1426_v8 = vsel %vm5673_vm4, %v4492_v32, %v1409_v42  ;;  %vm5676_vm13 = vmmov %vm5673_vm4  ;;  %v1424_v40 = vsel %vm5673_vm4, %v1413_v22, %v1405_v30  ;;  %v2585_v42 = vld [vmem:[#allocation5 + $0x10] sm:$0xff]  ;;  %v1120_v50 = vpop.f32.mrf.mxu0 }
 0x37d   :  { %2453 = vmatpush.msk.msra.mxu2 %vm5672_vm2, %v1427_v15  ;;  %2461 = vmatpush.msk.msra.mxu0 %vm5674_vm7, %v1523_v6  ;;  %v1425_v45 = vsel %vm5676_vm13, %v1415_v28, %v4500_v46  ;;  %v1501_v29 = vpop.permute.xlu2 %1500  ;;  %vm5678_vm13 = vmmov %vm5677_vm3  ;;  %v2584_v46 = vld [vmem:[#allocation5 + $0x20] sm:$0xff]  ;;  %v2588_v28 = vld [vmem:[#allocation5 + $0x28] sm:$0xff] }
 0x37e   :  { %1554 = vmatmul.f32.gmra.mxu2 %v2583_v48  ;;  %1641 = vmatmul.f32.gmra.mxu3 %v2583_v48  ;;  %v1516_v20 = vsel %vm5678_vm13, %v1501_v29, %v1509_v43  ;;  %v1520_v7 = vsel %vm5679_vm1, %v1509_v43, %v1501_v29  ;;  %vm5680_vm1 = vcmask 261120  }
 0x37f   :  { %2454 = vmatpush.msk.msra.mxu2 %vm5672_vm2, %v1426_v8  ;;  %2462 = vmatpush.msk.msra.mxu0 %vm5674_vm7, %v1522_v3  ;;  %vm5682_vm4 = vmmov %vm5680_vm1 }
 0x380   :  { %vm5684_vm13 = vmmov %vm5680_vm1 }
 0x381   :  { %2455 = vmatpush.msk.msra.mxu2 %vm5672_vm2, %v1425_v45  ;;  %v1511_v17 = vpop.permute.xlu1 %1510 }
 0x382   :  { %v1517_v32 = vsel %vm5675_vm9, %v1503_v51, %v1511_v17  ;;  %v1521_v61 = vsel %vm5677_vm3, %v1511_v17, %v1503_v51  ;;  %vm5681_vm3 = vmmov %vm5680_vm1 }
 0x383   :  { %2456 = vmatpush.msk.msra.mxu2 %vm5672_vm2, %v1424_v40  ;;  %2423 = vmatpush.msk.msrb.mxu1 %vm5664_vm5, %v1517_v32  ;;  %vm5683_vm9 = vmmov %vm5680_vm1 }
 0x384   :  { %2463 = vmatpush.msk.msra.mxu0 %vm5674_vm7, %v1521_v61 }
 0x385   :  { %1580 = vmatmul.f32.gmra.mxu0 %v2584_v46  ;;  %2457 = vmatpush.msk.msra.mxu2 %vm5609_vm6, %v3705_v58  ;;  %v2587_v58 = vld [vmem:[#allocation5 + $0x38] sm:$0xff] }
 0x386   :  { %2424 = vmatpush.msk.msrb.mxu1 %vm5664_vm5, %v1516_v20  ;;  %2464 = vmatpush.msk.msra.mxu0 %vm5674_vm7, %v1520_v7 }
 0x387   :  { %2425 = vmatmul.msk.f32.vlgmr.msrb.gmra.mxu1 %vm5680_vm1, %v2585_v42  ;;  %1557 = vmatmul.f32.gmra.mxu2 %v2586_v41 }
 0x388   :  { %2458 = vmatpush.msk.msra.mxu2 %vm5609_vm6, %v3687_v39  ;;  %1644 = vmatmul.f32.gmra.mxu3 %v2586_v41  ;;  %v1030_v39 = vpop.f32.mrf.mxu1 }
 0x389   :  { %v1060_v23 = vadd.f32 %v1059_v1, %v1030_v39  ;;  %v1123_v29 = vpop.f32.mrf.mxu0 }
 0x38a   :  { %2459 = vmatpush.msk.msra.mxu2 %vm5609_vm6, %v3717_v19  ;;  %v2591_v19 = vld [vmem:[#allocation5 + $0x58] sm:$0xff] }
 0x38c   :  { %2460 = vmatpush.msk.msra.mxu2 %vm5609_vm6, %v3731_v33 }
 0x38d   :  { %1583 = vmatmul.f32.gmra.mxu0 %v2587_v58 }
 0x38f   :  { %2426 = vmatmul.msk.f32.gmra.mxu1 %vm5681_vm3, %v2588_v28  ;;  %1664 = vmatmul.f32.vlgmr.msra.gmra.mxu2 %v2582_v21  ;;  %vm5686_vm3 = vmmov %vm5680_vm1 }
 0x390   :  { %v1033_v33 = vpop.f32.mrf.mxu1 }
 0x391   :  { %v1063_v30 = vadd.f32 %v1062_v38, %v1033_v33  ;;  %v5695_v33 = vld [vmem:[#allocation22_spill] sm:$0xff] }
 0x395   :  { %1586 = vmatmul.f32.gmra.mxu0 %v2589_v24 }
 0x396   :  { %v1065_v57 = vpop.f32.mrf.mxu3 }
 0x397   :  { %2427 = vmatmul.msk.f32.gmra.mxu1 %vm5682_vm4, %v2590_v9  ;;  %1667 = vmatmul.f32.gmra.mxu2 %v2584_v46  ;;  %vm5688_vm4 = vmmov %vm5680_vm1 }
 0x398   :  { %v1036_v14 = vpop.f32.mrf.mxu1 }
 0x399   :  { %v1066_v0 = vadd.f32 %v1065_v57, %v1036_v14 }
 0x39d   :  { %2465 = vmatmul.msk.f32.vlgmr.msra.gmra.mxu0 %vm5683_vm9, %v2585_v42  ;;  %vm5707_vm9 = vcmp.lt.s32.totalorder %v2912_v18, 127 }
 0x39e   :  { %v1088_v12 = vpop.f32.mrf.mxu2 }
 0x39f   :  { %2428 = vmatmul.msk.f32.gmra.mxu1 %vm5684_vm13, %v2591_v19  ;;  %1670 = vmatmul.f32.gmra.mxu2 %v2587_v58  ;;  %v4643_v13 = vadd.f32 %v1088_v12, %v1060_v23  ;;  %v1068_v55 = vpop.f32.mrf.mxu3  ;;  %vm5708_vm13 = vmmov %vm5707_vm9 }
 0x3a1   :  { %5685 = vst [vmem:[#allocation44_spill] sm:$0xff] %v4643_v13  ;;  %v2593_v13 = vld [vmem:[%s5331_s3 + $0x8] sm:$0xff] }
 0x3a5   :  { %2466 = vmatmul.msk.f32.gmra.mxu0 %vm5680_vm1, %v2588_v28  ;;  %vm5710_vm1 = vcmp.lt.s32.totalorder %v2912_v18, 112 }
 0x3a7   :  { %1673 = vmatmul.f32.gmra.mxu2 %v2589_v24  ;;  %v1091_v54 = vpop.f32.mrf.mxu2 }
 0x3a8   :  { %v4646_v37 = vadd.f32 %v1091_v54, %v1063_v30  ;;  %v5696_v30 = vld [vmem:[#allocation23_spill] sm:$0xff] }
 0x3a9   :  { %v1039_v22 = vpop.f32.mrf.mxu1 }
 0x3aa   :  { %5687 = vst [vmem:[#allocation45_spill] sm:$0xff] %v4646_v37  ;;  %v1069_v51 = vadd.f32 %v1068_v55, %v1039_v22  ;;  %v5697_v55 = vld [vmem:[#allocation21_spill] sm:$0xff] }
 0x3ab   :  { %v1126_v20 = vpop.f32.mrf.mxu0 }
 0x3ad   :  { %2467 = vmatmul.msk.f32.gmra.mxu0 %vm5686_vm3, %v2590_v9  ;;  %v1175_v15 = vpop.f32.mrf.mxu3  ;;  %vm5711_vm3 = vmmov %vm5710_vm1 }
 0x3af   :  { %v1094_v36 = vpop.f32.mrf.mxu2 }
 0x3b0   :  { %v4649_v31 = vadd.f32 %v1094_v36, %v1066_v0  ;;  %v5698_v36 = vld [vmem:[#allocation26_spill] sm:$0xff] }
 0x3b1   :  { %v1146_v49 = vpop.f32.mrf.mxu1 }
 0x3b2   :  { %5689 = vst [vmem:[#allocation40_spill] sm:$0xff] %v4649_v31  ;;  %v1147_v5 = vadd.f32 %v1146_v49, %v1117_v27 }
 0x3b4   :  { %v4651_v6 = vadd.f32 %v1175_v15, %v1147_v5 }
 0x3b5   :  { %2468 = vmatmul.msk.f32.gmra.mxu0 %vm5688_vm4, %v2591_v19  ;;  %vm5712_vm4 = vcmp.lt.s32.totalorder %v2912_v18, 113 }
 0x3b6   :  { %5690 = vst [vmem:[#allocation37_spill] sm:$0xff] %v4651_v6 }
 0x3b7   :  { %v1097_v21 = vpop.f32.mrf.mxu2 }
 0x3b8   :  { %v4653_v8 = vadd.f32 %v1097_v21, %v1069_v51  ;;  %v1178_v45 = vpop.f32.mrf.mxu3 }
 0x3b9   :  { %v1149_v48 = vpop.f32.mrf.mxu1 }
 0x3ba   :  { %5691 = vst [vmem:[#allocation41_spill] sm:$0xff] %v4653_v8  ;;  %v1150_v3 = vadd.f32 %v1149_v48, %v1120_v50 }
 0x3bc   :  { %v4655_v43 = vadd.f32 %v1178_v45, %v1150_v3 }
 0x3be   :  { %5692 = vst [vmem:[#allocation43_spill] sm:$0xff] %v4655_v43  ;;  %v2743_v43 = vmov 3  }
 0x3c0   :  { %v1181_v32 = vpop.f32.mrf.mxu3 }
 0x3c1   :  { %v1152_v40 = vpop.f32.mrf.mxu1 }
 0x3c2   :  { %v1153_v17 = vadd.f32 %v1152_v40, %v1123_v29 }
 0x3c4   :  { %v4657_v61 = vadd.f32 %v1181_v32, %v1153_v17 }
 0x3c6   :  { %5693 = vst [vmem:[#allocation39_spill] sm:$0xff] %v4657_v61  ;;  %v2594_v61 = vld [vmem:[%s5331_s3 + $0x10] sm:$0xff] }
 0x3c8   :  { %v1184_v42 = vpop.f32.mrf.mxu3 }
 0x3c9   :  { %v1155_v7 = vpop.f32.mrf.mxu1 }
 0x3ca   :  { %v1156_v46 = vadd.f32 %v1155_v7, %v1126_v20 }
 0x3cc   :  { %v4659_v41 = vadd.f32 %v1184_v42, %v1156_v46 }
 0x3ce   :  { %5694 = vst [vmem:[#allocation17_spill] sm:$0xff] %v4659_v41 }
 0x3ef   :  { %v1549_v58 = vpop.f32.mrf.mxu2  ;;  %v1636_v15 = vpop.f32.mrf.mxu3 }
 0x3f7   :  { %v1552_v28 = vpop.f32.mrf.mxu2  ;;  %v1639_v32 = vpop.f32.mrf.mxu3 }
 0x3f9   :  { %v1578_v24 = vpop.f32.mrf.mxu0 }
 0x3fa   :  { %v1579_v1 = vadd.f32 %v1578_v24, %v1549_v58 }
 0x401   :  { %v1555_v9 = vpop.f32.mrf.mxu2 }
 0x402   :  { %v1581_v39 = vpop.f32.mrf.mxu0 }
 0x403   :  { %v1582_v0 = vadd.f32 %v1581_v39, %v1552_v28  ;;  %v5700_v39 = vld [vmem:[#allocation28_spill] sm:$0xff] }
 0x404   :  { %v1607_v23 = vpop.f32.mrf.mxu1 }
 0x405   :  { %v1608_v19 = vadd.f32 %v1607_v23, %v1579_v1 }
 0x407   :  { %v1706_v38 = vmul.f32 %v1608_v19, %v5695_v33 }
 0x409   :  { %v1714_v12 = vadd.f32 %v1706_v38, %v5696_v30 }
 0x40a   :  { %v1584_v14 = vpop.f32.mrf.mxu0  ;;  %v1558_v57 = vpop.f32.mrf.mxu2 }
 0x40b   :  { %v4663_v54 = vmax.f32 %v1714_v12, 0.0  ;;  %v1585_v42 = vadd.f32 %v1584_v14, %v1555_v9  ;;  %v5701_v9 = vld [vmem:[#allocation29_spill] sm:$0xff] }
 0x40c   :  { %v1610_v22 = vpop.f32.mrf.mxu1 }
 0x40d   :  { %v1611_v27 = vadd.f32 %v1610_v22, %v1582_v0  ;;  %1866 = vrot.lane.b32.xlu1 %v4663_v54, %s2739_s11  ;;  %1898 = vrot.lane.b32.xlu0 %v4663_v54, %s2738_s10  ;;  %v1642_v22 = vpop.f32.mrf.mxu3 }
 0x40e   :  { %1930 = vrot.lane.b32.xlu2 %v4663_v54, %s2737_s9 }
 0x40f   :  { %v1708_v51 = vmul.f32 %v1611_v27, %v5697_v55 }
 0x411   :  { %v1716_v49 = vadd.f32 %v1708_v51, %v5698_v36 }
 0x412   :  { %v1587_v5 = vpop.f32.mrf.mxu0  ;;  %v1665_v21 = vpop.f32.mrf.mxu2 }
 0x413   :  { %v4673_v50 = vmax.f32 %v1716_v49, 0.0  ;;  %v1666_v48 = vadd.f32 %v1665_v21, %v1636_v15  ;;  %v1588_v14 = vadd.f32 %v1587_v5, %v1558_v57  ;;  %v5704_v57 = vld [vmem:[#allocation31_spill] sm:$0xff] }
 0x414   :  { %v1613_v7 = vpop.f32.mrf.mxu1 }
 0x415   :  { %1932 = vrot.lane.b32.xlu1 %v4673_v50, %s2737_s9  ;;  %1794 = vrot.lane.b32.xlu0 %v4663_v54, %s2735_s7  ;;  %v1614_v28 = vadd.f32 %v1613_v7, %v1585_v42 }
 0x416   :  { %1826 = vrot.lane.b32.xlu2 %v4663_v54, %s2734_s2 }
 0x417   :  { %v1710_v1 = vmul.f32 %v1614_v28, %v5700_v39 }
 0x419   :  { %v1718_v19 = vadd.f32 %v1710_v1, %v5701_v9 }
 0x41a   :  { %v1694_v3 = vpop.f32.mrf.mxu0  ;;  %v1668_v20 = vpop.f32.mrf.mxu2 }
 0x41b   :  { %v1695_v45 = vadd.f32 %v1694_v3, %v1666_v48  ;;  %v1669_v46 = vadd.f32 %v1668_v20, %v1639_v32  ;;  %v4705_v38 = vmax.f32 %v1718_v19, 0.0 }
 0x41c   :  { %v1616_v12 = vpop.f32.mrf.mxu1 }
 0x41d   :  { %v1707_v29 = vmul.f32 %v1695_v45, %v5695_v33  ;;  %1828 = vrot.lane.b32.xlu1 %v4673_v50, %s2734_s2  ;;  %v1617_v0 = vadd.f32 %v1616_v12, %v1588_v14 }
 0x41e   :  { %1900 = vrot.lane.b32.xlu2 %v4673_v50, %s2738_s10 }
 0x41f   :  { %v1715_v40 = vadd.f32 %v1707_v29, %v5696_v30  ;;  %v1645_v29 = vpop.f32.mrf.mxu3 }
 0x421   :  { %v4687_v17 = vmax.f32 %v1715_v40, 0.0 }
 0x422   :  { %v1697_v58 = vpop.f32.mrf.mxu0  ;;  %v1671_v27 = vpop.f32.mrf.mxu2 }
 0x423   :  { %5699 = vst [vmem:[#allocation42_spill] sm:$0xff] %v4687_v17  ;;  %1938 = vrot.lane.b32.xlu0 %v4687_v17, %s2737_s9  ;;  %v1698_v24 = vadd.f32 %v1697_v58, %v1669_v46 }
 0x425   :  { %1906 = vrot.lane.b32.xlu1 %v4687_v17, %s2738_s10  ;;  %v1709_v23 = vmul.f32 %v1698_v24, %v5697_v55  ;;  %v5703_v55 = vld [vmem:[#allocation25_spill] sm:$0xff] }
 0x426   :  { %1796 = vrot.lane.b32.xlu2 %v4673_v50, %s2735_s7  ;;  %v1712_v51 = vmul.f32 %v1617_v0, %v5703_v55 }
 0x427   :  { %v1717_v33 = vadd.f32 %v1709_v23, %v5698_v36  ;;  %v1672_v36 = vadd.f32 %v1671_v27, %v1642_v22 }
 0x428   :  { %v1720_v5 = vadd.f32 %v1712_v51, %v5704_v57  ;;  %v2742_v51 = vmov 2  }
 0x429   :  { %v4709_v30 = vmax.f32 %v1717_v33, 0.0  ;;  %2574 = vset.pattern.permute.xlu2 %v2742_v51  ;;  %2575 = vset.pattern.permute.xlu0 %v2742_v51 }
 0x42a   :  { %v1700_v49 = vpop.f32.mrf.mxu0  ;;  %v4729_v21 = vmax.f32 %v1720_v5, 0.0  ;;  %v1674_v40 = vpop.f32.mrf.mxu2  ;;  %2576 = vset.pattern.permute.xlu1 %v2742_v51 }
 0x42b   :  { %1834 = vrot.lane.b32.xlu0 %v4687_v17, %s2734_s2  ;;  %5702 = vst [vmem:[#allocation35_spill] sm:$0xff] %v4709_v30  ;;  %v1701_v15 = vadd.f32 %v1700_v49, %v1672_v36  ;;  %v1675_v32 = vadd.f32 %v1674_v40, %v1645_v29 }
 0x42d   :  { %1802 = vrot.lane.b32.xlu1 %v4687_v17, %s2735_s7  ;;  %v1711_v48 = vmul.f32 %v1701_v15, %v5700_v39 }
 0x42e   :  { %1874 = vrot.lane.b32.xlu2 %v4687_v17, %s2739_s11 }
 0x42f   :  { %v1719_v3 = vadd.f32 %v1711_v48, %v5701_v9 }
 0x431   :  { %v4739_v45 = vmax.f32 %v1719_v3, 0.0 }
 0x432   :  { %v1703_v20 = vpop.f32.mrf.mxu0 }
 0x433   :  { %1868 = vrot.lane.b32.xlu0 %v4673_v50, %s2739_s11  ;;  %5705 = vst [vmem:[#allocation32_spill] sm:$0xff] %v4739_v45  ;;  %v1704_v7 = vadd.f32 %v1703_v20, %v1675_v32 }
 0x435   :  { %1902 = vrot.lane.b32.xlu1 %v4705_v38, %s2738_s10  ;;  %v1713_v46 = vmul.f32 %v1704_v7, %v5703_v55 }
 0x436   :  { %1940 = vrot.lane.b32.xlu2 %v4709_v30, %s2737_s9 }
 0x437   :  { %v1721_v42 = vadd.f32 %v1713_v46, %v5704_v57 }
 0x439   :  { %v4765_v28 = vmax.f32 %v1721_v42, 0.0 }
 0x43b   :  { %1934 = vrot.lane.b32.xlu0 %v4705_v38, %s2737_s9  ;;  %5706 = vst [vmem:[#allocation12_spill] sm:$0xff] %v4765_v28 }
 0x43d   :  { %1798 = vrot.lane.b32.xlu1 %v4705_v38, %s2735_s7 }
 0x43e   :  { %1836 = vrot.lane.b32.xlu2 %v4709_v30, %s2734_s2 }
 0x443   :  { %1830 = vrot.lane.b32.xlu0 %v4705_v38, %s2734_s2 }
 0x445   :  { %1876 = vrot.lane.b32.xlu1 %v4709_v30, %s2739_s11 }
 0x446   :  { %1870 = vrot.lane.b32.xlu2 %v4705_v38, %s2739_s11 }
 0x44b   :  { %1908 = vrot.lane.b32.xlu0 %v4709_v30, %s2738_s10 }
 0x44d   :  { %1936 = vrot.lane.b32.xlu1 %v4729_v21, %s2737_s9 }
 0x44e   :  { %1766 = vrot.lane.b32.xlu2 %v4705_v38, %s2731_s28 }
 0x453   :  { %1804 = vrot.lane.b32.xlu0 %v4709_v30, %s2735_s7 }
 0x455   :  { %1942 = vrot.lane.b32.xlu1 %v4739_v45, %s2737_s9 }
 0x456   :  { %1832 = vrot.lane.b32.xlu2 %v4729_v21, %s2734_s2 }
 0x45b   :  { %1904 = vrot.lane.b32.xlu0 %v4729_v21, %s2738_s10 }
 0x45d   :  { %1838 = vrot.lane.b32.xlu1 %v4739_v45, %s2734_s2 }
 0x45e   :  { %1910 = vrot.lane.b32.xlu2 %v4739_v45, %s2738_s10 }
 0x463   :  { %1800 = vrot.lane.b32.xlu0 %v4729_v21, %s2735_s7 }
 0x465   :  { %1872 = vrot.lane.b32.xlu1 %v4729_v21, %s2739_s11 }
 0x466   :  { %1806 = vrot.lane.b32.xlu2 %v4739_v45, %s2735_s7 }
 0x468   :  { %v4761_v58 = vpop.permute.xlu2 %1930 }
 0x46b   :  { %1878 = vrot.lane.b32.xlu0 %v4739_v45, %s2739_s11 }
 0x46d   :  { %1768 = vrot.lane.b32.xlu1 %v4729_v21, %s2731_s28 }
 0x46e   :  { %1944 = vrot.lane.b32.xlu2 %v4765_v28, %s2737_s9 }
 0x470   :  { %v1827_v24 = vpop.permute.xlu2 %1826 }
 0x473   :  { %1774 = vrot.lane.b32.xlu0 %v4739_v45, %s2731_s28 }
 0x475   :  { %1772 = vrot.lane.b32.xlu1 %v4709_v30, %s2731_s28 }
 0x476   :  { %1762 = vrot.lane.b32.xlu2 %v4663_v54, %s2731_s28 }
 0x478   :  { %v4777_v39 = vpop.permute.xlu2 %1900 }
 0x47b   :  { %1840 = vrot.lane.b32.xlu0 %v4765_v28, %s2734_s2 }
 0x47d   :  { %1912 = vrot.lane.b32.xlu1 %v4765_v28, %s2738_s10 }
 0x47e   :  { %1732 = vrot.lane.b32.xlu2 %v4673_v50, %s2733_s6 }
 0x47f   :  { %v1867_v1 = vpop.permute.xlu1 %1866  ;;  %v1899_v9 = vpop.permute.xlu0 %1898 }
 0x480   :  { %v4785_v23 = vpop.permute.xlu2 %1796 }
 0x483   :  { %1764 = vrot.lane.b32.xlu0 %v4673_v50, %s2731_s28 }
 0x485   :  { %1808 = vrot.lane.b32.xlu1 %v4765_v28, %s2735_s7 }
 0x486   :  { %1880 = vrot.lane.b32.xlu2 %v4765_v28, %s2739_s11 }
 0x487   :  { %v4793_v19 = vpop.permute.xlu1 %1932  ;;  %v1795_v0 = vpop.permute.xlu0 %1794 }
 0x488   :  { %v1875_v33 = vpop.permute.xlu2 %1874 }
 0x489   :  { %v4797_v12 = vsel %vm5707_vm9, %v1867_v1, %v1875_v33  ;;  %v4801_v14 = vsel %vm5708_vm13, %v1875_v33, %v1867_v1  ;;  %vm5713_vm9 = vmmov %vm5712_vm4  ;;  %vm5715_vm13 = vcmp.lt.s32.totalorder %v2912_v18, 1 }
 0x48a   :  { %5709 = vst [vmem:[#allocation30_spill] sm:$0xff] %v4801_v14 }
 0x48b   :  { %1770 = vrot.lane.b32.xlu0 %v4687_v17, %s2731_s28 }
 0x48d   :  { %1736 = vrot.lane.b32.xlu1 %v4729_v21, %s2733_s6 }
 0x48e   :  { %1776 = vrot.lane.b32.xlu2 %v4765_v28, %s2731_s28 }
 0x48f   :  { %v1829_v22 = vpop.permute.xlu1 %1828 }
 0x490   :  { %v4809_v27 = vpop.permute.xlu2 %1940 }
 0x491   :  { %v4815_v55 = vsel %vm5710_vm1, %v4809_v27, %v4793_v19  ;;  %vm5716_vm1 = vmmov %vm5715_vm13 }
 0x493   :  { %1734 = vrot.lane.b32.xlu0 %v4705_v38, %s2733_s6 }
 0x495   :  { %1742 = vrot.lane.b32.xlu1 %v4739_v45, %s2733_s6  ;;  %v4821_v36 = vpop.permute.xlu0 %1938 }
 0x496   :  { %v4827_v49 = vsel %vm5711_vm3, %v4821_v36, %v4761_v58  ;;  %1744 = vrot.lane.b32.xlu2 %v4765_v28, %s2733_s6  ;;  %vm5717_vm3 = vmmov %vm5716_vm1 }
 0x497   :  { %v1907_v57 = vpop.permute.xlu1 %1906 }
 0x498   :  { %v4833_v5 = vsel %vm5712_vm4, %v1899_v9, %v1907_v57  ;;  %v4837_v15 = vsel %vm5713_vm9, %v1907_v57, %v1899_v9  ;;  %v1837_v48 = vpop.permute.xlu2 %1836  ;;  %vm5718_vm4 = vmmov %vm5716_vm1  ;;  %vm5719_vm9 = vcmp.lt.s32.totalorder %v2912_v18, 15 }
 0x499   :  { %5714 = vst [vmem:[#allocation27_spill] sm:$0xff] %v4837_v15  ;;  %v4841_v3 = vsel %vm5715_vm13, %v1829_v22, %v1837_v48  ;;  %v4845_v29 = vsel %vm5716_vm1, %v1837_v48, %v1829_v22  ;;  %vm5720_vm13 = vmmov %vm5719_vm9  ;;  %v2592_v48 = vld [vmem:[%s5331_s3] sm:$0xff]  ;;  %vm5721_vm1 = vcmp.lt.s32.totalorder %v2912_v18, 127 }
 0x49b   :  { %1740 = vrot.lane.b32.xlu0 %v4709_v30, %s2733_s6 }
 0x49d   :  { %1730 = vrot.lane.b32.xlu1 %v4663_v54, %s2733_s6  ;;  %v1835_v40 = vpop.permute.xlu0 %1834 }
 0x49e   :  { %v4853_v32 = vsel %vm5717_vm3, %v1827_v24, %v1835_v40  ;;  %v4857_v20 = vsel %vm5718_vm4, %v1835_v40, %v1827_v24  ;;  %1738 = vrot.lane.b32.xlu2 %v4687_v17, %s2733_s6  ;;  %vm5722_vm3 = vmmov %vm5721_vm1  ;;  %vm5724_vm4 = vcmp.lt.s32.totalorder %v2912_v18, 113 }
 0x49f   :  { %v1803_v7 = vpop.permute.xlu1 %1802 }
 0x4a0   :  { %v4863_v46 = vsel %vm5719_vm9, %v1795_v0, %v1803_v7  ;;  %v4867_v42 = vsel %vm5720_vm13, %v1803_v7, %v1795_v0  ;;  %v4869_v1 = vpop.permute.xlu2 %1870  ;;  %vm5725_vm9 = vmmov %vm5724_vm4  ;;  %vm5726_vm13 = vcmp.lt.s32.totalorder %v2912_v18, 112 }
 0x4a3   :  { %1968 = vrot.lane.b32.xlu0 %v4729_v21, %s2736_s8 }
 0x4a5   :  { %1964 = vrot.lane.b32.xlu1 %v4673_v50, %s2736_s8  ;;  %v1869_v24 = vpop.permute.xlu0 %1868 }
 0x4a6   :  { %1966 = vrot.lane.b32.xlu2 %v4705_v38, %s2736_s8 }
 0x4a7   :  { %v4877_v9 = vpop.permute.xlu1 %1902 }
 0x4a8   :  { %v4879_v33 = vpop.permute.xlu2 %1766 }
 0x4ab   :  { %1974 = vrot.lane.b32.xlu0 %v4739_v45, %s2736_s8 }
 0x4ad   :  { %1976 = vrot.lane.b32.xlu1 %v4765_v28, %s2736_s8  ;;  %v1935_v0 = vpop.permute.xlu0 %1934 }
 0x4ae   :  { %1972 = vrot.lane.b32.xlu2 %v4709_v30, %s2736_s8 }
 0x4af   :  { %v4887_v22 = vpop.permute.xlu1 %1798 }
 0x4b0   :  { %v1833_v51 = vpop.permute.xlu2 %1832 }
 0x4b3   :  { %1962 = vrot.lane.b32.xlu0 %v4663_v54, %s2736_s8 }
 0x4b5   :  { %1970 = vrot.lane.b32.xlu1 %v4687_v17, %s2736_s8  ;;  %v1831_v57 = vpop.permute.xlu0 %1830 }
 0x4b6   :  { %1188 = vperm.xlu2 %2574, %v2592_v48  }
 0x4b7   :  { %v1877_v40 = vpop.permute.xlu1 %1876 }
 0x4b8   :  { %v4898_v7 = vsel %vm5721_vm1, %v1869_v24, %v1877_v40  ;;  %v4902_v41 = vsel %vm5722_vm3, %v1877_v40, %v1869_v24  ;;  %v1911_v8 = vpop.permute.xlu2 %1910  ;;  %v2595_v40 = vld [vmem:[%s5331_s3 + $0x18] sm:$0xff]  ;;  %vm5727_vm1 = vmmov %vm5726_vm13  ;;  %s2744_s3 = smov [#allocation8]  }
 0x4b9   :  { %5723 = vst [vmem:[#allocation19_spill] sm:$0xff] %v4902_v41  ;;  %v4907_v6 = vsel %vm5724_vm4, %v1911_v8, %v4877_v9  ;;  %vm5728_vm3 = vmmov %vm5727_vm1  ;;  %s2213_s29 = sshll.u32 %s2744_s3, 4  ;;  %s2214_s29 = int_to_ptr.vmem [resolvable:$true] %s2213_s29 }
 0x4ba   :  { %vm5729_vm4 = vmmov %vm5727_vm1 }
 0x4bb   :  { %1192 = vperm.xlu0 %2575, %v2593_v13  }
 0x4bd   :  { %1196 = vperm.xlu1 %2576, %v2594_v61   ;;  %v1909_v31 = vpop.permute.xlu0 %1908 }
 0x4be   :  { %v4918_v24 = vsel %vm5725_vm9, %v1909_v31, %v4777_v39  ;;  %1200 = vperm.xlu2 %2574, %v2595_v40   ;;  %vm5730_vm9 = vmmov %vm5727_vm1 }
 0x4bf   :  { %v1937_v17 = vpop.permute.xlu1 %1936 }
 0x4c0   :  { %v4923_v30 = vpop.permute.xlu2 %1806 }
 0x4c3   :  { %2579 = vset.pattern.permute.xlu0 %v2743_v43 }
 0x4c4   :  { %1220 = vperm.xlu0 %2579, %v2594_v61  }
 0x4c5   :  { %2577 = vset.pattern.permute.xlu1 %v2743_v43  ;;  %v4925_v37 = vpop.permute.xlu0 %1804 }
 0x4c6   :  { %1212 = vperm.xlu1 %2577, %v2592_v48   ;;  %2578 = vset.pattern.permute.xlu2 %v2743_v43 }
 0x4c7   :  { %v1943_v45 = vpop.permute.xlu1 %1942  ;;  %1216 = vperm.xlu2 %2578, %v2593_v13   ;;  %v1947_v13 = vsel %vm5730_vm9, %v4793_v19, %v4809_v27 }
 0x4c8   :  { %v4929_v2 = vsel %vm5726_vm13, %v1943_v45, %v1935_v0  ;;  %v1945_v28 = vpop.permute.xlu2 %1944  ;;  %v1948_v43 = vsel %vm5729_vm4, %v1935_v0, %v1943_v45  ;;  %vm5731_vm13 = vmmov %vm5727_vm1  ;;  %vm5736_vm4 = vnez %v5601_v63 }
 0x4c9   :  { %v1949_v14 = vsel %vm5727_vm1, %v1937_v17, %v1945_v28  ;;  %v4935_v41 = vsel %vm5728_vm3, %v1945_v28, %v1937_v17  ;;  %v1946_v17 = vsel %vm5731_vm13, %v4761_v58, %v4821_v36  ;;  %vm5732_vm1 = vcmp.lt.s32.totalorder %v2912_v18, 127 }
 0x4ca   :  { %2485 = vmatpush.msk.msra.mxu3 %vm5621_vm10, %v1949_v14  ;;  %vm5738_vm13 = vcmp.lt.s32.totalorder %v2912_v18, 113 }
 0x4cc   :  { %2486 = vmatpush.msk.msra.mxu3 %vm5621_vm10, %v1948_v43 }
 0x4cd   :  { %v4947_v61 = vpop.permute.xlu0 %1904 }
 0x4ce   :  { %2487 = vmatpush.msk.msra.mxu3 %vm5621_vm10, %v1947_v13  ;;  %1224 = vperm.xlu1 %2577, %v2595_v40  }
 0x4cf   :  { %v1839_v45 = vpop.permute.xlu1 %1838 }
 0x4d0   :  { %2488 = vmatpush.msk.msra.mxu3 %vm5621_vm10, %v1946_v17  ;;  %v4957_v28 = vpop.permute.xlu2 %1762  ;;  %vm5734_vm10 = vcmp.lt.s32.totalorder %v2912_v18, 1 }
 0x4d1   :  { %vm5735_vm3 = vmmov %vm5734_vm10 }
 0x4d2   :  { %vm5737_vm9 = vmmov %vm5735_vm3 }
 0x4d5   :  { %v1801_v14 = vpop.permute.xlu0 %1800 }
 0x4d7   :  { %v4959_v0 = vpop.permute.xlu1 %1872 }
 0x4d8   :  { %v4961_v19 = vpop.permute.xlu2 %1732 }
 0x4dd   :  { %v1879_v27 = vpop.permute.xlu0 %1878 }
 0x4de   :  { %v4966_v48 = vsel %vm5732_vm1, %v1879_v27, %v4869_v1  ;;  %vm5739_vm1 = vmmov %vm5735_vm3 }
 0x4df   :  { %5733 = vst [vmem:[#allocation24_spill] sm:$0xff] %v4966_v48  ;;  %v1769_v40 = vpop.permute.xlu1 %1768  ;;  %v1848_v48 = vsel %vm5737_vm9, %v1839_v45, %v1831_v57  ;;  %v1844_v15 = vsel %vm5739_vm1, %v1831_v57, %v1839_v45  ;;  %vm5742_vm9 = vcmp.lt.s32.totalorder %v2912_v18, 127  ;;  %vm5747_vm1 = vnez %v5453_v60 }
 0x4e0   :  { %v4968_v43 = vpop.permute.xlu2 %1880 }
 0x4e5   :  { %v1775_v58 = vpop.permute.xlu0 %1774 }
 0x4e7   :  { %v1773_v36 = vpop.permute.xlu1 %1772 }
 0x4e8   :  { %v1777_v59 = vpop.permute.xlu2 %1776 }
 0x4ed   :  { %v1841_v13 = vpop.permute.xlu0 %1840 }
 0x4ee   :  { %v1845_v17 = vsel %vm5734_vm10, %v1833_v51, %v1841_v13  ;;  %v1849_v35 = vsel %vm5735_vm3, %v1841_v13, %v1833_v51  ;;  %vm5740_vm10 = vmmov %vm5738_vm13  ;;  %v2602_v13 = vld [vmem:[#allocation7 + $0x30] sm:$0xff] }
 0x4ef   :  { %v4974_v11 = vpop.permute.xlu1 %1912  ;;  %2469 = vmatpush.msk.msra.mxu1 %vm2965_vm8, %v1849_v35  ;;  %2509 = vmatpush.msk.msrb.mxu0 %vm5736_vm4, %v1845_v17  ;;  %v1916_v35 = vsel %vm5740_vm10, %v4877_v9, %v1911_v8  ;;  %vm5741_vm3 = vmmov %vm5740_vm10  ;;  %v5784_v17 = vld [vmem:[#allocation24_spill] sm:$0xff] }
 0x4f0   :  { %v1917_v44 = vsel %vm5738_vm13, %v4947_v61, %v4974_v11  ;;  %v1745_v51 = vpop.permute.xlu2 %1744  ;;  %v1915_v57 = vsel %vm5741_vm3, %v4777_v39, %v1909_v31  ;;  %v1885_v31 = vsel %vm5742_vm9, %v4959_v0, %v4968_v43  ;;  %vm5743_vm13 = vcmp.lt.s32.totalorder %v2912_v18, 15 }
 0x4f1   :  { %2470 = vmatpush.msk.msra.mxu1 %vm2965_vm8, %v1848_v48  ;;  %2489 = vmatpush.msk.msra.mxu3 %vm3318_vm14, %v1917_v44  ;;  %v5775_v48 = vld [vmem:[#allocation27_spill] sm:$0xff] }
 0x4f2   :  { %2510 = vmatpush.msk.msrb.mxu0 %vm5736_vm4, %v1844_v15 }
 0x4f3   :  { %2471 = vmatpush.msk.msra.mxu1 %vm2965_vm8, %v4845_v29  ;;  %2490 = vmatpush.msk.msra.mxu3 %vm3318_vm14, %v1916_v35 }
 0x4f4   :  { %2511 = vmatpush.msk.msrb.mxu0 %vm5736_vm4, %v4841_v3 }
 0x4f5   :  { %v1765_v44 = vpop.permute.xlu0 %1764  ;;  %2472 = vmatpush.msk.msra.mxu1 %vm2965_vm8, %v4857_v20  ;;  %2491 = vmatpush.msk.msra.mxu3 %vm3318_vm14, %v1915_v57  ;;  %vm5744_vm8 = vmmov %vm5743_vm13  ;;  %v5785_v57 = vld [vmem:[#allocation19_spill] sm:$0xff] }
 0x4f6   :  { %2512 = vmatpush.msk.msrb.mxu0 %vm5736_vm4, %v4853_v32  ;;  %vm5746_vm4 = vmmov %vm5742_vm9 }
 0x4f7   :  { %v1809_v8 = vpop.permute.xlu1 %1808  ;;  %2492 = vmatpush.msk.msra.mxu3 %vm3318_vm14, %v4833_v5  ;;  %vm5745_vm14 = vmmov %vm5744_vm8  ;;  %v1884_v63 = vsel %vm5746_vm4, %v4869_v1, %v1879_v27  ;;  %v5124_v1 = vld [vmem:[#allocation7 + $0x8] sm:$0xff] }
 0x4f8   :  { %v1813_v34 = vsel %vm5743_vm13, %v1801_v14, %v1809_v8  ;;  %v1817_v39 = vsel %vm5744_vm8, %v1809_v8, %v1801_v14  ;;  %v1816_v16 = vsel %vm5745_vm14, %v4923_v30, %v4887_v22  ;;  %vm5748_vm10 = vmmov %vm5744_vm8  ;;  %vm5751_vm13 = vcmp.lt.s32.totalorder %v2912_v18, 16 }
 0x4f9   :  { %2473 = vmatpush.msk.msra.mxu1 %vm3035_vm11, %v1817_v39  ;;  %2493 = vmatpush.msk.msra.mxu3 %vm3378_vm12, %v1885_v31  ;;  %v1812_v5 = vsel %vm5748_vm10, %v4887_v22, %v4923_v30  ;;  %vm5749_vm3 = vmmov %vm5744_vm8  ;;  %v1739_v30 = vpop.permute.xlu2 %1738  ;;  %v2603_v39 = vld [vmem:[#allocation7 + $0x10] sm:$0xff] }
 0x4fa   :  { %2513 = vmatpush.msk.msrb.mxu0 %vm5747_vm1, %v1813_v34  ;;  %v1815_v15 = vsel %vm5749_vm3, %v4925_v37, %v4785_v23  ;;  %vm5750_vm9 = vmmov %vm5749_vm3  ;;  %v5788_v34 = vld [vmem:[#allocation30_spill] sm:$0xff] }
 0x4fb   :  { %2474 = vmatpush.msk.msra.mxu1 %vm3035_vm11, %v1816_v16  ;;  %2494 = vmatpush.msk.msra.mxu3 %vm3378_vm12, %v1884_v63  ;;  %v1811_v3 = vsel %vm5750_vm9, %v4785_v23, %v4925_v37  ;;  %v1785_v37 = vsel %vm5751_vm13, %v1777_v59, %v1769_v40  ;;  %vm5752_vm8 = vmmov %vm5751_vm13  ;;  %vm5760_vm9 = vcmp.lt.s32.totalorder %v2912_v18, 17  ;;  %v5790_v16 = vld [vmem:[#allocation12_spill] sm:$0xff] }
 0x4fc   :  { %2514 = vmatpush.msk.msrb.mxu0 %vm5747_vm1, %v1812_v5  ;;  %v1781_v23 = vsel %vm5752_vm8, %v1769_v40, %v1777_v59  ;;  %vm5755_vm14 = vmmov %vm5752_vm8  ;;  %v5198_v40 = vld [vmem:[#allocation7 + $0x50] sm:$0xff]  ;;  %v5793_v5 = vld [vmem:[#allocation32_spill] sm:$0xff] }
 0x4fd   :  { %v1771_v29 = vpop.permute.xlu0 %1770  ;;  %2475 = vmatpush.msk.msra.mxu1 %vm3035_vm11, %v1815_v15  ;;  %2495 = vmatpush.msk.msra.mxu3 %vm3378_vm12, %v4898_v7  ;;  %v1780_v60 = vsel %vm5755_vm14, %v4879_v33, %v1775_v58  ;;  %vm5756_vm4 = vmmov %vm5752_vm8 }
 0x4fe   :  { %2515 = vmatpush.msk.msrb.mxu0 %vm5747_vm1, %v1811_v3  ;;  %v1783_v47 = vsel %vm5756_vm4, %v1773_v36, %v1765_v44  ;;  %vm5761_vm13 = vmmov %vm5760_vm9 }
 0x4ff   :  { %v1737_v32 = vpop.permute.xlu1 %1736  ;;  %2476 = vmatpush.msk.msra.mxu1 %vm3035_vm11, %v4867_v42  ;;  %2496 = vmatpush.msk.msra.mxu3 %vm3378_vm12, %v4797_v12  ;;  %vm5753_vm11 = vmmov %vm5752_vm8  ;;  %vm5754_vm12 = vnez %v5449_v53  ;;  %vm5762_vm8 = vnez %v5461_v26 }
 0x500   :  { %2516 = vmatpush.msk.msrb.mxu0 %vm5747_vm1, %v4863_v46  ;;  %v1784_v56 = vsel %vm5753_vm11, %v1775_v58, %v4879_v33  ;;  %vm5757_vm1 = vmmov %vm5756_vm4  ;;  %v1749_v9 = vsel %vm5761_vm13, %v1737_v32, %v1745_v51  ;;  %vm5773_vm13 = vcmp.lt.s32.totalorder %v2912_v18, 111 }
 0x501   :  { %2477 = vmatpush.msk.msra.mxu1 %vm3016_vm15, %v1785_v37  ;;  %2497 = vmatpush.msk.msra.mxu3 %vm5666_vm0, %v4729_v21  ;;  %v1779_v21 = vsel %vm5757_vm1, %v1765_v44, %v1773_v36  ;;  %vm5758_vm10 = vmmov %vm5757_vm1  ;;  %v1967_v46 = vpop.permute.xlu2 %1966 }
 0x502   :  { %2517 = vmatpush.msk.msrb.mxu0 %vm5754_vm12, %v1781_v23  ;;  %vm5759_vm3 = vmmov %vm5757_vm1  ;;  %v5796_v23 = vld [vmem:[#allocation35_spill] sm:$0xff] }
 0x503   :  { %2478 = vmatpush.msk.msra.mxu1 %vm3016_vm15, %v1784_v56  ;;  %2498 = vmatpush.msk.msra.mxu3 %vm5666_vm0, %v4705_v38  ;;  %v1782_v38 = vsel %vm5758_vm10, %v1771_v29, %v4957_v28  ;;  %v1778_v20 = vsel %vm5759_vm3, %v4957_v28, %v1771_v29  ;;  %vm5765_vm11 = vmmov %vm5760_vm9  ;;  %v5155_v28 = vld [vmem:[#allocation7 + $0x20] sm:$0xff]  ;;  %vm5770_vm10 = vnez %v5573_v25  ;;  %vm5771_vm3 = vcmp.lt.s32.totalorder %v2912_v18, 113 }
 0x504   :  { %2518 = vmatpush.msk.msrb.mxu0 %vm5754_vm12, %v1780_v60  ;;  %vm5767_vm14 = vmmov %vm5760_vm9 }
 0x505   :  { %v1735_v12 = vpop.permute.xlu0 %1734  ;;  %2479 = vmatpush.msk.msra.mxu1 %vm3016_vm15, %v1783_v47  ;;  %2499 = vmatpush.msk.msra.mxu3 %vm5666_vm0, %v4673_v50  ;;  %v1753_v50 = vsel %vm5760_vm9, %v1745_v51, %v1737_v32  ;;  %vm5768_vm4 = vmmov %vm5760_vm9  ;;  %v5795_v32 = vld [vmem:[#allocation43_spill] sm:$0xff] }
 0x506   :  { %2519 = vmatpush.msk.msrb.mxu0 %vm5754_vm12, %v1779_v21  ;;  %vm5769_vm1 = vmmov %vm5768_vm4  ;;  %v5797_v21 = vld [vmem:[#allocation42_spill] sm:$0xff] }
 0x507   :  { %v1743_v42 = vpop.permute.xlu1 %1742  ;;  %2480 = vmatpush.msk.msra.mxu1 %vm3016_vm15, %v1782_v38  ;;  %2500 = vmatpush.msk.msra.mxu3 %vm5666_vm0, %v4663_v54  ;;  %vm5763_vm15 = vmmov %vm5760_vm9  ;;  %vm5764_vm0 = vnez %v5464_v10  ;;  %v5174_v10 = vld [vmem:[#allocation7 + $0x38] sm:$0xff] }
 0x508   :  { %2520 = vmatpush.msk.msrb.mxu0 %vm5754_vm12, %v1778_v20  ;;  %2039 = vmatmul.f32.vlgmr.msra.gmra.mxu3 %v5124_v1  ;;  %v1752_v52 = vsel %vm5763_vm15, %v1743_v42, %v1735_v12  ;;  %v1748_v53 = vsel %vm5765_vm11, %v1735_v12, %v1743_v42  ;;  %vm5766_vm12 = vmmov %vm5760_vm9  ;;  %vm5772_vm9 = vnez %v5586_v62  ;;  %vm5776_vm15 = vcmp.lt.s32.totalorder %v2912_v18, 127  ;;  %v2604_v18 = vld [vmem:[#allocation7 + $0x48] sm:$0xff]  ;;  %v2605_v12 = vld [vmem:[#allocation2 + $0x10] sm:$0xff] }
 0x509   :  { %2481 = vmatpush.msk.msra.mxu1 %vm5762_vm8, %v1753_v50  ;;  %v1973_v14 = vpop.permute.xlu2 %1972  ;;  %v2606_v20 = vld [vmem:[#allocation2 + $0x18] sm:$0xff]  ;;  %v2607_v42 = vld [vmem:[#allocation7 + $0x28] sm:$0xff] }
 0x50a   :  { %2521 = vmatpush.msk.msrb.mxu0 %vm5764_vm0, %v1749_v9 }
 0x50b   :  { %2482 = vmatpush.msk.msra.mxu1 %vm5762_vm8, %v1752_v52  ;;  %v5800_v52 = vld [vmem:[#allocation40_spill] sm:$0xff] }
 0x50c   :  { %2522 = vmatpush.msk.msrb.mxu0 %vm5764_vm0, %v1748_v53 }
 0x50d   :  { %v1741_v4 = vpop.permute.xlu0 %1740 }
 0x50e   :  { %v1747_v54 = vsel %vm5766_vm12, %v4961_v19, %v1741_v4  ;;  %v1751_v33 = vsel %vm5767_vm14, %v1741_v4, %v4961_v19  ;;  %v2598_v19 = vld [vmem:[#allocation7] sm:$0xff]  ;;  %v5801_v4 = vld [vmem:[#allocation39_spill] sm:$0xff] }
 0x50f   :  { %v1731_v22 = vpop.permute.xlu1 %1730  ;;  %2483 = vmatpush.msk.msra.mxu1 %vm5762_vm8, %v1751_v33  ;;  %2523 = vmatpush.msk.msrb.mxu0 %vm5764_vm0, %v1747_v54 }
 0x510   :  { %v1746_v7 = vsel %vm5768_vm4, %v1731_v22, %v1739_v30  ;;  %v1750_v45 = vsel %vm5769_vm1, %v1739_v30, %v1731_v22  ;;  %2042 = vmatmul.f32.gmra.mxu3 %v5155_v28  ;;  %v5794_v30 = vld [vmem:[#allocation45_spill] sm:$0xff]  ;;  %v5802_v22 = vld [vmem:[#allocation44_spill] sm:$0xff] }
 0x511   :  { %2484 = vmatpush.msk.msra.mxu1 %vm5762_vm8, %v1750_v45  ;;  %2524 = vmatpush.msk.msrb.mxu0 %vm5764_vm0, %v1746_v7  ;;  %vm5774_vm8 = vmmov %vm5773_vm13  ;;  %v5803_v45 = vld [vmem:[#allocation37_spill] sm:$0xff] }
 0x512   :  { %2097 = vmatmul.f32.vlgmr.msrb.gmra.mxu0 %v2598_v19  ;;  %2010 = vmatmul.f32.vlgmr.msra.gmra.mxu1 %v2598_v19  ;;  %vm5779_vm0 = vmmov %vm5774_vm8 }
 0x513   :  { %2525 = vmatpush.msk.msrb.mxu1 %vm5770_vm10, %v4935_v41  ;;  %v1921_v41 = vsel %vm5771_vm3, %v4974_v11, %v4947_v61  ;;  %vm5780_vm11 = vmmov %vm5779_vm0 }
 0x514   :  { %vm5782_vm12 = vmmov %vm5779_vm0 }
 0x515   :  { %2526 = vmatpush.msk.msrb.mxu1 %vm5770_vm10, %v4929_v2  ;;  %v1969_v27 = vpop.permute.xlu0 %1968  ;;  %v2600_v2 = vld [vmem:[#allocation7 + $0x18] sm:$0xff]  ;;  %vm5783_vm14 = vmmov %vm5779_vm0 }
 0x516   :  { %vm5786_vm4 = vmmov %vm5779_vm0 }
 0x517   :  { %2527 = vmatpush.msk.msrb.mxu1 %vm5770_vm10, %v4815_v55  ;;  %v1965_v26 = vpop.permute.xlu1 %1964  ;;  %v5183_v55 = vpop.permute.xlu2 %1188  ;;  %vm5787_vm1 = vmmov %vm5779_vm0 }
 0x518   :  { %2045 = vmatmul.f32.gmra.mxu3 %v5174_v10  ;;  %v1203_v7 = vmul.f32 %v5183_v55, %v5802_v22 }
 0x519   :  { %2528 = vmatpush.msk.msrb.mxu1 %vm5770_vm10, %v4827_v49  ;;  %vm5789_vm10 = vcmask 261120  }
 0x51a   :  { %2100 = vmatmul.f32.gmra.mxu0 %v2600_v2  ;;  %2013 = vmatmul.f32.gmra.mxu1 %v2600_v2  ;;  %vm5792_vm3 = vmmov %vm5789_vm10 }
 0x51b   :  { %2529 = vmatpush.msk.msrb.mxu1 %vm5772_vm9, %v1921_v41  ;;  %v2608_v41 = vld [vmem:[#allocation2 + $0x20] sm:$0xff] }
 0x51d   :  { %2530 = vmatpush.msk.msrb.mxu1 %vm5772_vm9, %v4907_v6  ;;  %v1975_v25 = vpop.permute.xlu0 %1974  ;;  %v1889_v6 = vsel %vm5776_vm15, %v4968_v43, %v4959_v0  ;;  %v1979_v0 = vsel %vm5782_vm12, %v1965_v26, %v1973_v14  ;;  %v1983_v43 = vsel %vm5783_vm14, %v1973_v14, %v1965_v26  ;;  %v1204_v14 = vmul.f32 %v5183_v55, %v5803_v45 }
 0x51e   :  { %v1980_v36 = vsel %vm5779_vm0, %v1967_v46, %v1975_v25  ;;  %v1984_v62 = vsel %vm5780_vm11, %v1975_v25, %v1967_v46  ;;  %v2609_v25 = vld [vmem:[#allocation2 + $0x28] sm:$0xff] }
 0x51f   :  { %2531 = vmatpush.msk.msrb.mxu1 %vm5772_vm9, %v4918_v24  ;;  %v1977_v49 = vpop.permute.xlu1 %1976  ;;  %v5226_v35 = vpop.permute.xlu2 %1200  ;;  %v2611_v24 = vld [vmem:[#allocation2] sm:$0xff] }
 0x520   :  { %v1981_v11 = vsel %vm5773_vm13, %v1969_v27, %v1977_v49  ;;  %v1985_v61 = vsel %vm5774_vm8, %v1977_v49, %v1969_v27  ;;  %2048 = vmatmul.f32.gmra.mxu3 %v5198_v40 }
 0x521   :  { %2532 = vmatpush.msk.msrb.mxu1 %vm5772_vm9, %v5775_v48  ;;  %2501 = vmatpush.msk.msrb.mxu2 %vm5664_vm5, %v1981_v11 }
 0x522   :  { %2541 = vmatpush.msk.msrb.mxu3 %vm5674_vm7, %v1985_v61  ;;  %2103 = vmatmul.f32.gmra.mxu0 %v2602_v13  ;;  %v2610_v61 = vld [vmem:[#allocation7 + $0x40] sm:$0xff] }
 0x523   :  { %2533 = vmatpush.msk.msrb.mxu1 %vm5672_vm2, %v1889_v6  ;;  %2502 = vmatpush.msk.msrb.mxu2 %vm5664_vm5, %v1980_v36  ;;  %v2612_v36 = vld [vmem:[#allocation2 + $0x8] sm:$0xff] }
 0x524   :  { %2542 = vmatpush.msk.msrb.mxu3 %vm5674_vm7, %v1984_v62  ;;  %2016 = vmatmul.f32.gmra.mxu1 %v2602_v13 }
 0x525   :  { %2534 = vmatpush.msk.msrb.mxu1 %vm5672_vm2, %v5784_v17  ;;  %v1963_v51 = vpop.permute.xlu0 %1962  ;;  %2503 = vmatpush.msk.msrb.mxu2 %vm5664_vm5, %v1979_v0  ;;  %v5806_v0 = vld [vmem:[#allocation41_spill] sm:$0xff] }
 0x526   :  { %2543 = vmatpush.msk.msrb.mxu3 %vm5674_vm7, %v1983_v43  ;;  %v1209_v43 = vmul.f32 %v5226_v35, %v5806_v0  ;;  %v5807_v17 = vld [vmem:[#allocation17_spill] sm:$0xff] }
 0x527   :  { %2535 = vmatpush.msk.msrb.mxu1 %vm5672_vm2, %v5785_v57  ;;  %v1971_v44 = vpop.permute.xlu1 %1970  ;;  %v5256_v3 = vpop.permute.xlu2 %1216 }
 0x528   :  { %v1978_v8 = vsel %vm5786_vm4, %v1963_v51, %v1971_v44  ;;  %v1982_v31 = vsel %vm5787_vm1, %v1971_v44, %v1963_v51  ;;  %v1210_v51 = vmul.f32 %v5226_v35, %v5807_v17 }
 0x529   :  { %2536 = vmatpush.msk.msrb.mxu1 %vm5672_vm2, %v5788_v34  ;;  %2504 = vmatpush.msk.msrb.mxu2 %vm5664_vm5, %v1978_v8  ;;  %vm5798_vm5 = vmmov %vm5792_vm3  ;;  %v2614_v34 = vld [vmem:[#allocation2 + $0x30] sm:$0xff] }
 0x52a   :  { %2544 = vmatpush.msk.msrb.mxu3 %vm5674_vm7, %v1982_v31  ;;  %2505 = vmatmul.msk.f32.vlgmr.msrb.gmra.mxu2 %vm5789_vm10, %v2603_v39  ;;  %vm5799_vm2 = vmmov %vm5792_vm3  ;;  %v2613_v31 = vld [vmem:[#allocation7 + $0x58] sm:$0xff] }
 0x52b   :  { %2537 = vmatpush.msk.msrb.mxu1 %vm5609_vm6, %v5790_v16  ;;  %2545 = vmatmul.msk.f32.vlgmr.msrb.gmra.mxu3 %vm5792_vm3, %v2603_v39  ;;  %vm5805_vm7 = vmmov %vm5799_vm2 }
 0x52c   :  { %2106 = vmatmul.f32.gmra.mxu0 %v2604_v18  ;;  %2019 = vmatmul.f32.gmra.mxu1 %v2604_v18  ;;  %vm5808_vm9 = vmmov %vm5799_vm2 }
 0x52d   :  { %2538 = vmatpush.msk.msrb.mxu1 %vm5609_vm6, %v5793_v5  ;;  %v5254_v15 = vpop.permute.xlu0 %1192  ;;  %vm5809_vm13 = vmmov %vm5799_vm2 }
 0x52e   :  { %v1205_v29 = vmul.f32 %v5254_v15, %v5794_v30  ;;  %v1206_v37 = vmul.f32 %v5254_v15, %v5795_v32 }
 0x52f   :  { %2539 = vmatpush.msk.msrb.mxu1 %vm5609_vm6, %v5796_v23  ;;  %v5265_v56 = vpop.permute.xlu1 %1196 }
 0x530   :  { %v1229_v60 = vadd.f32 %v5256_v3, %v1205_v29  ;;  %v1230_v47 = vadd.f32 %v5256_v3, %v1206_v37  ;;  %v1207_v53 = vmul.f32 %v5265_v56, %v5800_v52  ;;  %v1208_v54 = vmul.f32 %v5265_v56, %v5801_v4 }
 0x531   :  { %2540 = vmatpush.msk.msrb.mxu1 %vm5609_vm6, %v5797_v21  ;;  %vm5804_vm6 = vmmov %vm5799_vm2 }
 0x532   :  { %v1237_v38 = vadd.f32 %v2605_v12, %v1229_v60  ;;  %v1238_v46 = vadd.f32 %v2606_v20, %v1230_v47  ;;  %2506 = vmatmul.msk.f32.gmra.mxu2 %vm5798_vm5, %v2607_v42 }
 0x533   :  { %2546 = vmatmul.msk.f32.gmra.mxu3 %vm5799_vm2, %v2607_v42 }
 0x534   :  { %v1245_v50 = vmax.f32 %v1237_v38, 0.0  ;;  %v1246_v9 = vmax.f32 %v1238_v46, 0.0  ;;  %2126 = vmatmul.f32.vlgmr.msrb.gmra.mxu1 %v5124_v1 }
 0x536   :  { %1253 = vst [vmem:[#allocation8 + $0x10] sm:$0xff] %v1245_v50  ;;  %v5278_v33 = vpop.permute.xlu0 %1220 }
 0x537   :  { %1254 = vst [vmem:[#allocation8 + $0x18] sm:$0xff] %v1246_v9  ;;  %v1231_v19 = vadd.f32 %v5278_v33, %v1207_v53  ;;  %v1232_v27 = vadd.f32 %v5278_v33, %v1208_v54 }
 0x538   :  { %v5287_v26 = vpop.permute.xlu1 %1212 }
 0x539   :  { %v1239_v2 = vadd.f32 %v2608_v41, %v1231_v19  ;;  %v1240_v49 = vadd.f32 %v2609_v25, %v1232_v27  ;;  %v1227_v11 = vadd.f32 %v5287_v26, %v1203_v7  ;;  %v1228_v1 = vadd.f32 %v5287_v26, %v1204_v14 }
 0x53a   :  { %2507 = vmatmul.msk.f32.gmra.mxu2 %vm5804_vm6, %v2610_v61 }
 0x53b   :  { %v1247_v48 = vmax.f32 %v1239_v2, 0.0  ;;  %v1248_v6 = vmax.f32 %v1240_v49, 0.0  ;;  %v1235_v58 = vadd.f32 %v2611_v24, %v1227_v11  ;;  %v1236_v62 = vadd.f32 %v2612_v36, %v1228_v1  ;;  %2547 = vmatmul.msk.f32.gmra.mxu3 %vm5805_vm7, %v2610_v61  ;;  %v2617_v11 = vld [vmem:[#allocation2 + $0x50] sm:$0xff]  ;;  %v2618_v61 = vld [vmem:[#allocation2 + $0x48] sm:$0xff] }
 0x53c   :  { %2129 = vmatmul.f32.gmra.mxu1 %v5155_v28  ;;  %v2615_v28 = vld [vmem:[#allocation2 + $0x38] sm:$0xff] }
 0x53d   :  { %1255 = vst [vmem:[#allocation8 + $0x20] sm:$0xff] %v1247_v48  ;;  %v1243_v59 = vmax.f32 %v1235_v58, 0.0  ;;  %v1244_v13 = vmax.f32 %v1236_v62, 0.0 }
 0x53e   :  { %1256 = vst [vmem:[#allocation8 + $0x28] sm:$0xff] %v1248_v6 }
 0x53f   :  { %1251 = vst [vmem:[#allocation8] sm:$0xff] %v1243_v59 }
 0x540   :  { %1252 = vst [vmem:[#allocation8 + $0x8] sm:$0xff] %v1244_v13  ;;  %v5298_v57 = vpop.permute.xlu1 %1224 }
 0x541   :  { %v1233_v44 = vadd.f32 %v5298_v57, %v1209_v43  ;;  %v1234_v8 = vadd.f32 %v5298_v57, %v1210_v51 }
 0x542   :  { %2508 = vmatmul.msk.f32.gmra.mxu2 %vm5808_vm9, %v2613_v31 }
 0x543   :  { %v1241_v39 = vadd.f32 %v2614_v34, %v1233_v44  ;;  %v1242_v16 = vadd.f32 %v2615_v28, %v1234_v8  ;;  %2548 = vmatmul.msk.f32.gmra.mxu3 %vm5809_vm13, %v2613_v31  ;;  %v2619_v8 = vld [vmem:[#allocation2 + $0x60] sm:$0xff]  ;;  %v2620_v34 = vld [vmem:[#allocation2 + $0x58] sm:$0xff] }
 0x544   :  { %2132 = vmatmul.f32.gmra.mxu1 %v5174_v10 }
 0x545   :  { %v1249_v63 = vmax.f32 %v1241_v39, 0.0  ;;  %v1250_v18 = vmax.f32 %v1242_v16, 0.0 }
 0x547   :  { %1257 = vst [vmem:[#allocation8 + $0x30] sm:$0xff] %v1249_v63 }
 0x548   :  { %1258 = vst [vmem:[#allocation8 + $0x38] sm:$0xff] %v1250_v18 }
 0x54c   :  { %2135 = vmatmul.f32.gmra.mxu1 %v5198_v40  ;;  %v2616_v40 = vld [vmem:[#allocation2 + $0x40] sm:$0xff] }
 0x58b   :  { %v2040_v5 = vpop.f32.mrf.mxu3 }
 0x58f   :  { %v2011_v30 = vpop.f32.mrf.mxu1  ;;  %v2098_v21 = vpop.f32.mrf.mxu0 }
 0x590   :  { %v2041_v12 = vadd.f32 %v2040_v5, %v2011_v30 }
 0x593   :  { %v2043_v29 = vpop.f32.mrf.mxu3 }
 0x597   :  { %v2014_v32 = vpop.f32.mrf.mxu1  ;;  %v2101_v54 = vpop.f32.mrf.mxu0 }
 0x598   :  { %v2044_v9 = vadd.f32 %v2043_v29, %v2014_v32 }
 0x59b   :  { %v2046_v37 = vpop.f32.mrf.mxu3 }
 0x59f   :  { %v2104_v13 = vpop.f32.mrf.mxu0 }
 0x5a1   :  { %v2017_v23 = vpop.f32.mrf.mxu1 }
 0x5a2   :  { %v2047_v49 = vadd.f32 %v2046_v37, %v2017_v23 }
 0x5a3   :  { %v2049_v60 = vpop.f32.mrf.mxu3 }
 0x5a9   :  { %v2020_v47 = vpop.f32.mrf.mxu1  ;;  %v2107_v32 = vpop.f32.mrf.mxu0 }
 0x5aa   :  { %v2050_v44 = vadd.f32 %v2049_v60, %v2020_v47  ;;  %v2621_v47 = vld [vmem:[#allocation2 + $0x70] sm:$0xff] }
 0x5ad   :  { %v2069_v38 = vpop.f32.mrf.mxu2 }
 0x5ae   :  { %v2070_v20 = vadd.f32 %v2069_v38, %v2041_v12  ;;  %v2156_v46 = vpop.f32.mrf.mxu3  ;;  %v2622_v12 = vld [vmem:[#allocation2 + $0x68] sm:$0xff] }
 0x5b0   :  { %v2168_v42 = vmul.f32 %v2070_v20, %v5183_v55 }
 0x5b1   :  { %v2127_v50 = vpop.f32.mrf.mxu1 }
 0x5b2   :  { %v2176_v10 = vadd.f32 %v2168_v42, %v5287_v26  ;;  %v2128_v53 = vadd.f32 %v2127_v50, %v2098_v21 }
 0x5b4   :  { %v2184_v52 = vadd.f32 %v2616_v40, %v2176_v10  ;;  %v2157_v45 = vadd.f32 %v2156_v46, %v2128_v53 }
 0x5b5   :  { %v2072_v4 = vpop.f32.mrf.mxu2 }
 0x5b6   :  { %v2192_v22 = vmax.f32 %v2184_v52, 0.0  ;;  %v2073_v7 = vadd.f32 %v2072_v4, %v2044_v9  ;;  %v2159_v14 = vpop.f32.mrf.mxu3  ;;  %v2169_v27 = vmul.f32 %v2157_v45, %v5183_v55 }
 0x5b8   :  { %2201 = vst [vmem:[#allocation8 + $0x40] sm:$0xff] %v2192_v22  ;;  %v2170_v19 = vmul.f32 %v2073_v7, %v5254_v15  ;;  %v2177_v2 = vadd.f32 %v2169_v27, %v5287_v26 }
 0x5b9   :  { %v2130_v25 = vpop.f32.mrf.mxu1 }
 0x5ba   :  { %v2178_v41 = vadd.f32 %v2170_v19, %v5256_v3  ;;  %v2185_v48 = vadd.f32 %v2618_v61, %v2177_v2  ;;  %v2131_v6 = vadd.f32 %v2130_v25, %v2101_v54 }
 0x5bc   :  { %v2186_v1 = vadd.f32 %v2617_v11, %v2178_v41  ;;  %v2193_v36 = vmax.f32 %v2185_v48, 0.0  ;;  %v2160_v59 = vadd.f32 %v2159_v14, %v2131_v6 }
 0x5bd   :  { %v2075_v24 = vpop.f32.mrf.mxu2 }
 0x5be   :  { %v2194_v58 = vmax.f32 %v2186_v1, 0.0  ;;  %v2076_v62 = vadd.f32 %v2075_v24, %v2047_v49  ;;  %v2171_v0 = vmul.f32 %v2160_v59, %v5254_v15  ;;  %2202 = vst [vmem:[#allocation8 + $0x48] sm:$0xff] %v2193_v36  ;;  %v2162_v26 = vpop.f32.mrf.mxu3 }
 0x5c0   :  { %2203 = vst [vmem:[#allocation8 + $0x50] sm:$0xff] %v2194_v58  ;;  %v2172_v55 = vmul.f32 %v2076_v62, %v5265_v56  ;;  %v2179_v17 = vadd.f32 %v2171_v0, %v5256_v3 }
 0x5c1   :  { %v2133_v51 = vpop.f32.mrf.mxu1 }
 0x5c2   :  { %v2180_v43 = vadd.f32 %v2172_v55, %v5278_v33  ;;  %v2187_v39 = vadd.f32 %v2620_v34, %v2179_v17  ;;  %v2134_v28 = vadd.f32 %v2133_v51, %v2104_v13 }
 0x5c4   :  { %v2188_v31 = vadd.f32 %v2619_v8, %v2180_v43  ;;  %v2195_v18 = vmax.f32 %v2187_v39, 0.0  ;;  %v2163_v30 = vadd.f32 %v2162_v26, %v2134_v28 }
 0x5c5   :  { %v2078_v16 = vpop.f32.mrf.mxu2 }
 0x5c6   :  { %v2196_v63 = vmax.f32 %v2188_v31, 0.0  ;;  %v2079_v5 = vadd.f32 %v2078_v16, %v2050_v44  ;;  %v2173_v29 = vmul.f32 %v2163_v30, %v5265_v56  ;;  %2204 = vst [vmem:[#allocation8 + $0x58] sm:$0xff] %v2195_v18  ;;  %v2165_v60 = vpop.f32.mrf.mxu3 }
 0x5c8   :  { %2205 = vst [vmem:[#allocation8 + $0x60] sm:$0xff] %v2196_v63  ;;  %v2174_v15 = vmul.f32 %v2079_v5, %v5226_v35  ;;  %v2181_v37 = vadd.f32 %v2173_v29, %v5278_v33  ;;  %v2623_v33 = vld [vmem:[#allocation2 + $0x78] sm:$0xff] }
 0x5c9   :  { %v2136_v23 = vpop.f32.mrf.mxu1 }
 0x5ca   :  { %v2182_v3 = vadd.f32 %v2174_v15, %v5298_v57  ;;  %v2189_v38 = vadd.f32 %v2622_v12, %v2181_v37  ;;  %v2137_v20 = vadd.f32 %v2136_v23, %v2107_v32 }
 0x5cc   :  { %v2190_v21 = vadd.f32 %v2621_v47, %v2182_v3  ;;  %v2197_v42 = vmax.f32 %v2189_v38, 0.0  ;;  %v2166_v10 = vadd.f32 %v2165_v60, %v2137_v20 }
 0x5ce   :  { %v2198_v46 = vmax.f32 %v2190_v21, 0.0  ;;  %v2175_v50 = vmul.f32 %v2166_v10, %v5226_v35  ;;  %2206 = vst [vmem:[#allocation8 + $0x68] sm:$0xff] %v2197_v42 }
 0x5d0   :  { %2207 = vst [vmem:[#allocation8 + $0x70] sm:$0xff] %v2198_v46  ;;  %v2183_v56 = vadd.f32 %v2175_v50, %v5298_v57 }
 0x5d2   :  { %v2191_v9 = vadd.f32 %v2623_v33, %v2183_v56 }
 0x5d4   :  { %v2199_v40 = vmax.f32 %v2191_v9, 0.0 }
 0x5d6   :  { %2208 = vst [vmem:[#allocation8 + $0x78] sm:$0xff] %v2199_v40 }
 0x5d7   :  { %2221 = dma.vmem_to_hbm [thread:$0]  %s2214_s29, 2048, %s2216_s0, [#allocation4], %s2730_s27, %s2730_s27, %s2731_s28  }
 0x5d8   :  { %2724 = dma.done.wait [#allocation4], 2048  }
 0x5d9   :  { %2725 = vsyncadd [#allocation4], 4294965248 }
 0x5da   :  { %2226 = vsyncpa [#allocation3], 1 }
 0x5db   :  { %2227 = vsyncpa [#allocation6], 1 }
 0x5dc   :  { %2228 = vsyncpa [#allocation4], 1 }

</bundles_post_ra>
